<compile_context>
chip_gen: v6e
topology: v6e:2x2x1
jax: 0.10.0
libtpu: 0.0.40
codegen_flags: <defaults>
</compile_context>

<pallas_src>
import functools

import jax
import jax.numpy as jnp
import numpy as np
from jax.experimental import pallas as pl
from jax.experimental.pallas import tpu as pltpu

NEG_INF = -1e30


def gat_fused_kernel(x_ref, bias_ref, w0_ref, a0_ref, b0_ref,
                     bm0_ref, oc0_ref, rd0_ref,
                     w1_ref, a1_ref, b1_ref, out_ref, *,
                     heads0, dim0, heads1, dim1, negative_slope):
    """Fused 2-layer GAT forward (eval mode) on a dense edge mask.

    x_ref:    (N, F_in)          node features
    bias_ref: (N, N)             additive mask: 0 on edges u->v, -1e30 off-edge
    w*_ref:   (F_in, H*D)        shared linear projections
    a*_ref:   (H*D, 2H)          block-diag [attn_l | attn_r] matrices
    b*_ref:   (1, H*D)           biases
    bm0_ref:  (H0*N, H0*D0)      0/1 block-diagonal mask for layer-0 aggregation
    oc0_ref:  (H0*N, H0)         0/1 per-head "ones column" (denominator)
    rd0_ref:  (H0, H0*D0)        0/1 per-head lane-expansion of 1/denominator
    out_ref:  (N, dim1)          head-averaged logits (classes padded to dim1)
    """
    bias_mat = bias_ref[...]                                  # (N, N)

    def gat_conv(h_in, w, a_blk, nheads, d, blockmask, onescol, rdexp):
        n = h_in.shape[0]
        # Shared projection + all heads' attention terms: two MXU matmuls.
        z = jnp.dot(h_in, w, preferred_element_type=jnp.float32)       # (N, H*D)
        e_lr = jnp.dot(z, a_blk, preferred_element_type=jnp.float32)   # (N, 2H)
        el_t = jnp.transpose(e_lr[:, :nheads])                         # (H, N)

        # Pack attention logits lane-dense: head h occupies cols [h*N,(h+1)*N).
        # Mask added before LeakyReLU: off-edge -> ~ -2e29 -> exp == 0 exactly.
        blocks = []
        for hh in range(nheads):                                        # static
            er_col = e_lr[:, nheads + hh:nheads + hh + 1]               # (N, 1)
            blocks.append(er_col + el_t[hh:hh + 1, :] + bias_mat)       # (N, N)
        e_pk = blocks[0] if nheads == 1 else jnp.concatenate(blocks, axis=1)
        e_pk = jnp.where(e_pk > 0, e_pk, negative_slope * e_pk)         # LeakyReLU
        # One shared row-max per destination (softmax is shift-invariant).
        m = jnp.max(e_pk, axis=1, keepdims=True)                        # (N, 1)
        p = jnp.exp(e_pk - m)                                           # (N, H*N)

        # Block-diagonal aggregation with the denominator folded in as an
        # extra 0/1 column per head: one lane-dense MXU matmul.
        if nheads == 1:
            z_blk = z                                                    # (N, D)
            oc = jnp.ones((n, 1), jnp.float32)
        else:
            z_blk = jnp.concatenate([z] * nheads, axis=0) * blockmask    # (H*N, H*D)
            oc = onescol
        z_aug = jnp.concatenate([z_blk, oc], axis=1)                     # (H*N, H*D+H)
        agg = jnp.dot(p, z_aug, preferred_element_type=jnp.float32)      # (N, H*D+H)

        wsum = agg[:, :nheads * d]                                       # (N, H*D)
        denom = agg[:, nheads * d:nheads * d + nheads]                   # (N, H)
        inv = pl.reciprocal(jnp.maximum(denom, 1e-20), approx=True)
        if nheads == 1:
            return wsum * inv                                            # broadcast
        inv_exp = jnp.dot(inv, rdexp, preferred_element_type=jnp.float32)  # (N, H*D)
        return wsum * inv_exp

    # Layer 0: GATConv(in_dim, hidden, heads0), heads concatenated, bias+ReLU
    # fused into the producing expression (no VMEM scratch round trip).
    h1 = gat_conv(x_ref[...], w0_ref[...], a0_ref[...], heads0, dim0,
                  bm0_ref[...], oc0_ref[...], rd0_ref[...])
    h1 = jnp.maximum(h1 + b0_ref[...], 0.0)                              # (N, H0*D0)

    # Output layer: GATConv(heads0*hidden, classes_pad, heads1), no activation.
    h2 = gat_conv(h1, w1_ref[...], a1_ref[...], heads1, dim1,
                  None, None, None) + b1_ref[...]                        # (N, H1*dim1)

    # logits = mean over output heads -> single store.
    acc = h2[:, 0:dim1]
    for hh in range(1, heads1):
        acc = acc + h2[:, hh * dim1:(hh + 1) * dim1]
    out_ref[...] = acc * (1.0 / heads1)


# --------------------------- host-side constant builders ---------------------------

def build_attn_blocks(al, ar):
    """(H, D) attn_l/attn_r -> (H*D, 2H) block-diagonal [AL | AR] so per-head
    lane reductions become one MXU matmul: z @ blocks = [EL | ER]."""
    h, d = al.shape
    eye = jnp.eye(h, dtype=al.dtype)
    al_blk = (al[:, :, None] * eye[:, None, :]).reshape(h * d, h)
    ar_blk = (ar[:, :, None] * eye[:, None, :]).reshape(h * d, h)
    return jnp.concatenate([al_blk, ar_blk], axis=1)


def build_agg_constants(nheads, d, n):
    """0/1 constants for the block-diagonal aggregation matmul."""
    row_head = jnp.repeat(jnp.arange(nheads), n)        # (H*N,)
    col_head = jnp.repeat(jnp.arange(nheads), d)        # (H*D,)
    heads_idx = jnp.arange(nheads)
    blockmask = (row_head[:, None] == col_head[None, :]).astype(jnp.float32)   # (H*N, H*D)
    onescol = (row_head[:, None] == heads_idx[None, :]).astype(jnp.float32)    # (H*N, H)
    rdexp = (heads_idx[:, None] == col_head[None, :]).astype(jnp.float32)      # (H, H*D)
    return blockmask, onescol, rdexp


def pad_head_blocks(arr, heads, dim, dim_pad):
    """Pad the last axis (heads*dim) to (heads*dim_pad), per head block."""
    if dim_pad == dim:
        return arr
    lead = arr.shape[:-1]
    r = arr.reshape(lead + (heads, dim))
    r = jnp.pad(r, [(0, 0)] * (len(lead) + 1) + [(0, dim_pad - dim)])
    return r.reshape(lead + (heads * dim_pad,))


def gat_node_classifier_forward(x, adj, params, *, num_heads, num_hidden,
                                num_out_heads, num_classes,
                                negative_slope=0.2):
    n = x.shape[0]
    # Precondition: every row of adj has >=1 nonzero (self-loop) -- see header.
    bias_mat = jnp.where(adj > 0, 0.0, NEG_INF).astype(jnp.float32)

    c_pad = -(-num_classes // 8) * 8  # pad output classes to a multiple of 8 lanes

    a0 = build_attn_blocks(params["al0"], params["ar0"])            # (H0*hid, 2H0)
    bm0, oc0, rd0 = build_agg_constants(num_heads, num_hidden, n)

    al1 = jnp.pad(params["al1"], ((0, 0), (0, c_pad - num_classes)))
    ar1 = jnp.pad(params["ar1"], ((0, 0), (0, c_pad - num_classes)))
    a1 = build_attn_blocks(al1, ar1)                                 # (H1*c_pad, 2H1)
    w1 = pad_head_blocks(params["w1"], num_out_heads, num_classes, c_pad)
    b1 = pad_head_blocks(params["b1"], num_out_heads, num_classes, c_pad)

    kernel = functools.partial(
        gat_fused_kernel,
        heads0=num_heads, dim0=num_hidden,
        heads1=num_out_heads, dim1=c_pad,
        negative_slope=negative_slope)
    vmem = pl.BlockSpec(memory_space=pltpu.MemorySpace.VMEM)
    out_pad = pl.pallas_call(
        kernel,
        out_shape=jax.ShapeDtypeStruct((n, c_pad), jnp.float32),
        in_specs=[vmem] * 11,
        out_specs=vmem,
        compiler_params=pltpu.CompilerParams(
            vmem_limit_bytes=32 * 1024 * 1024),
    )(x, bias_mat, params["w0"], a0, params["b0"], bm0, oc0, rd0, w1, a1, b1)
    return out_pad[:, :num_classes]


# --------------------------- pure-JAX reference ---------------------------

def gat_layer_ref(h, adj, w, al, ar, b, num_heads, out_dim,
                  negative_slope, apply_relu):
    z = h @ w
    zr = z.reshape(-1, num_heads, out_dim)                     # (N, H, D)
    el = jnp.sum(zr * al[None], axis=-1)                       # (N, H)
    er = jnp.sum(zr * ar[None], axis=-1)                       # (N, H)
    e = er[:, None, :] + el[None, :, :]                        # (Ndst, Nsrc, H)
    e = jnp.where(e > 0, e, negative_slope * e)
    mask = adj[:, :, None] > 0
    e = jnp.where(mask, e, NEG_INF)
    e = e - jnp.max(e, axis=1, keepdims=True)
    p = jnp.where(mask, jnp.exp(e), 0.0)
    alpha = p / jnp.maximum(jnp.sum(p, axis=1, keepdims=True), 1e-20)
    out = jnp.einsum('vuh,uhd->vhd', alpha, zr)
    out = out + b.reshape(1, num_heads, out_dim)
    if apply_relu:
        out = jnp.maximum(out, 0.0)
    return out.reshape(-1, num_heads * out_dim)


def forward_ref(x, adj, params, *, num_heads, num_hidden, num_out_heads,
                num_classes):
    h = gat_layer_ref(x, adj, params["w0"], params["al0"], params["ar0"],
                      params["b0"], num_heads, num_hidden, 0.2, True)
    out = gat_layer_ref(h, adj, params["w1"], params["al1"], params["ar1"],
                        params["b1"], num_out_heads, num_classes, 0.2, False)
    return out.reshape(-1, num_out_heads, num_classes).mean(axis=1)


def init_params(key, in_dim, num_hidden, num_heads, num_classes, num_out_heads):
    """Deterministic Xavier-ish init matching dgl.nn.GATConv parameter shapes."""
    ks = jax.random.split(key, 8)

    def glorot(k, shape):
        fan_in, fan_out = shape[0], shape[-1]
        scale = jnp.sqrt(6.0 / (fan_in + fan_out))
        return jax.random.uniform(k, shape, jnp.float32, -scale, scale)

    return {
        # Layer 0: GATConv(in_dim, num_hidden, num_heads, activation=relu)
        "w0": glorot(ks[0], (in_dim, num_heads * num_hidden)),
        "al0": glorot(ks[1], (num_heads, num_hidden)),
        "ar0": glorot(ks[2], (num_heads, num_hidden)),
        "b0": 0.1 * glorot(ks[6], (1, num_heads * num_hidden)),
        # Output layer: GATConv(num_heads*num_hidden, num_classes, num_out_heads)
        "w1": glorot(ks[3], (num_heads * num_hidden, num_out_heads * num_classes)),
        "al1": glorot(ks[4], (num_out_heads, num_classes)),
        "ar1": glorot(ks[5], (num_out_heads, num_classes)),
        "b1": 0.1 * glorot(ks[7], (1, num_out_heads * num_classes)),
    }


if __name__ == "__main__":
    N = 64             # number of nodes
    IN_DIM = 16        # input feature dim
    NUM_HIDDEN = 8     # module default num_hidden
    NUM_HEADS = 8      # module default num_heads
    NUM_OUT_HEADS = 1  # module default num_out_heads
    NUM_CLASSES = 7

    key = jax.random.PRNGKey(0)
    k_feat, k_adj, k_param = jax.random.split(key, 3)

    # Node features.
    x = jax.random.normal(k_feat, (N, IN_DIM), dtype=jnp.float32)

    # Deterministic graph: random sparse edges + ring + self-loops
    # (self-loops guarantee every node has >=1 incoming edge -- required by
    # the masked-exp / folded-denominator formulation).
    rand_adj = (jax.random.uniform(k_adj, (N, N)) < 0.08).astype(jnp.float32)
    eye = jnp.eye(N, dtype=jnp.float32)
    ring = jnp.roll(eye, 1, axis=1) + jnp.roll(eye, -1, axis=1)
    adj = jnp.clip(rand_adj + ring + eye, 0.0, 1.0)

    params = init_params(k_param, IN_DIM, NUM_HIDDEN, NUM_HEADS,
                         NUM_CLASSES, NUM_OUT_HEADS)

    fwd = functools.partial(gat_node_classifier_forward,
                            num_heads=NUM_HEADS, num_hidden=NUM_HIDDEN,
                            num_out_heads=NUM_OUT_HEADS,
                            num_classes=NUM_CLASSES)

    logits = jax.block_until_ready(fwd(x, adj, params))

    logits_ref = forward_ref(x, adj, params,
                             num_heads=NUM_HEADS, num_hidden=NUM_HIDDEN,
                             num_out_heads=NUM_OUT_HEADS,
                             num_classes=NUM_CLASSES)

    assert logits.shape == (N, NUM_CLASSES), logits.shape
    # Tolerance covers the in-kernel approximate reciprocal (EUP vrcp).
    np.testing.assert_allclose(np.asarray(logits), np.asarray(logits_ref),
                               rtol=2e-3, atol=2e-3)
    print("KERNEL_OK")
</pallas_src>

<mosaic_0001>
module attributes {stable_mosaic.version = 11 : i64} {
  func.func @gat_fused_kernel(%arg0: memref<64x16xf32, #tpu.memory_space<vmem>>, %arg1: memref<64x64xf32, #tpu.memory_space<vmem>>, %arg2: memref<16x64xf32, #tpu.memory_space<vmem>>, %arg3: memref<64x16xf32, #tpu.memory_space<vmem>>, %arg4: memref<1x64xf32, #tpu.memory_space<vmem>>, %arg5: memref<512x64xf32, #tpu.memory_space<vmem>>, %arg6: memref<512x8xf32, #tpu.memory_space<vmem>>, %arg7: memref<8x64xf32, #tpu.memory_space<vmem>>, %arg8: memref<64x8xf32, #tpu.memory_space<vmem>>, %arg9: memref<8x2xf32, #tpu.memory_space<vmem>>, %arg10: memref<1x8xf32, #tpu.memory_space<vmem>>, %arg11: memref<64x8xf32, #tpu.memory_space<vmem>>) attributes {dimension_semantics = [], scalar_prefetch = 0 : i64, scratch_operands = 0 : i64, tpu.core_type = #tpu.core_type<tc>} {
    %c0 = arith.constant 0 : index
    %c0_0 = arith.constant 0 : index
    %0 = vector.load %arg1[%c0, %c0_0] : memref<64x64xf32, #tpu.memory_space<vmem>>, vector<64x64xf32>
    %c0_1 = arith.constant 0 : index
    %c0_2 = arith.constant 0 : index
    %1 = vector.load %arg0[%c0_1, %c0_2] : memref<64x16xf32, #tpu.memory_space<vmem>>, vector<64x16xf32>
    %c0_3 = arith.constant 0 : index
    %c0_4 = arith.constant 0 : index
    %2 = vector.load %arg2[%c0_3, %c0_4] : memref<16x64xf32, #tpu.memory_space<vmem>>, vector<16x64xf32>
    %c0_5 = arith.constant 0 : index
    %c0_6 = arith.constant 0 : index
    %3 = vector.load %arg3[%c0_5, %c0_6] : memref<64x16xf32, #tpu.memory_space<vmem>>, vector<64x16xf32>
    %c0_7 = arith.constant 0 : index
    %c0_8 = arith.constant 0 : index
    %4 = vector.load %arg5[%c0_7, %c0_8] : memref<512x64xf32, #tpu.memory_space<vmem>>, vector<512x64xf32>
    %c0_9 = arith.constant 0 : index
    %c0_10 = arith.constant 0 : index
    %5 = vector.load %arg6[%c0_9, %c0_10] : memref<512x8xf32, #tpu.memory_space<vmem>>, vector<512x8xf32>
    %c0_11 = arith.constant 0 : index
    %c0_12 = arith.constant 0 : index
    %6 = vector.load %arg7[%c0_11, %c0_12] : memref<8x64xf32, #tpu.memory_space<vmem>>, vector<8x64xf32>
    %cst = arith.constant dense<0.000000e+00> : vector<64x64xf32>
    %7 = tpu.matmul %1, %2, %cst {dimension_numbers = #tpu.dot_dimension_numbers<[1], [0], [0], [1], [0, 0, 1, 1], [], []>} : vector<64x16xf32>, vector<16x64xf32>, vector<64x64xf32> -> vector<64x64xf32>
    %cst_13 = arith.constant dense<0.000000e+00> : vector<64x16xf32>
    %8 = tpu.matmul %7, %3, %cst_13 {dimension_numbers = #tpu.dot_dimension_numbers<[1], [0], [0], [1], [0, 0, 1, 1], [], []>} : vector<64x64xf32>, vector<64x16xf32>, vector<64x16xf32> -> vector<64x16xf32>
    %9 = vector.extract_strided_slice %8 {offsets = [0, 0], sizes = [64, 8], strides = [1, 1]} : vector<64x16xf32> to vector<64x8xf32>
    %10 = tpu.transpose %9, [1, 0] : vector<64x8xf32> -> vector<8x64xf32>
    %11 = vector.extract_strided_slice %8 {offsets = [0, 8], sizes = [64, 1], strides = [1, 1]} : vector<64x16xf32> to vector<64x1xf32>
    %12 = vector.extract_strided_slice %10 {offsets = [0, 0], sizes = [1, 64], strides = [1, 1]} : vector<8x64xf32> to vector<1x64xf32>
    %13 = vector.broadcast %11 : vector<64x1xf32> to vector<64x64xf32>
    %14 = vector.broadcast %12 : vector<1x64xf32> to vector<64x64xf32>
    %15 = arith.addf %13, %14 : vector<64x64xf32>
    %16 = arith.addf %15, %0 : vector<64x64xf32>
    %17 = vector.extract_strided_slice %8 {offsets = [0, 9], sizes = [64, 1], strides = [1, 1]} : vector<64x16xf32> to vector<64x1xf32>
    %18 = vector.extract_strided_slice %10 {offsets = [1, 0], sizes = [1, 64], strides = [1, 1]} : vector<8x64xf32> to vector<1x64xf32>
    %19 = vector.broadcast %17 : vector<64x1xf32> to vector<64x64xf32>
    %20 = vector.broadcast %18 : vector<1x64xf32> to vector<64x64xf32>
    %21 = arith.addf %19, %20 : vector<64x64xf32>
    %22 = arith.addf %21, %0 : vector<64x64xf32>
    %23 = vector.extract_strided_slice %8 {offsets = [0, 10], sizes = [64, 1], strides = [1, 1]} : vector<64x16xf32> to vector<64x1xf32>
    %24 = vector.extract_strided_slice %10 {offsets = [2, 0], sizes = [1, 64], strides = [1, 1]} : vector<8x64xf32> to vector<1x64xf32>
    %25 = vector.broadcast %23 : vector<64x1xf32> to vector<64x64xf32>
    %26 = vector.broadcast %24 : vector<1x64xf32> to vector<64x64xf32>
    %27 = arith.addf %25, %26 : vector<64x64xf32>
    %28 = arith.addf %27, %0 : vector<64x64xf32>
    %29 = vector.extract_strided_slice %8 {offsets = [0, 11], sizes = [64, 1], strides = [1, 1]} : vector<64x16xf32> to vector<64x1xf32>
    %30 = vector.extract_strided_slice %10 {offsets = [3, 0], sizes = [1, 64], strides = [1, 1]} : vector<8x64xf32> to vector<1x64xf32>
    %31 = vector.broadcast %29 : vector<64x1xf32> to vector<64x64xf32>
    %32 = vector.broadcast %30 : vector<1x64xf32> to vector<64x64xf32>
    %33 = arith.addf %31, %32 : vector<64x64xf32>
    %34 = arith.addf %33, %0 : vector<64x64xf32>
    %35 = vector.extract_strided_slice %8 {offsets = [0, 12], sizes = [64, 1], strides = [1, 1]} : vector<64x16xf32> to vector<64x1xf32>
    %36 = vector.extract_strided_slice %10 {offsets = [4, 0], sizes = [1, 64], strides = [1, 1]} : vector<8x64xf32> to vector<1x64xf32>
    %37 = vector.broadcast %35 : vector<64x1xf32> to vector<64x64xf32>
    %38 = vector.broadcast %36 : vector<1x64xf32> to vector<64x64xf32>
    %39 = arith.addf %37, %38 : vector<64x64xf32>
    %40 = arith.addf %39, %0 : vector<64x64xf32>
    %41 = vector.extract_strided_slice %8 {offsets = [0, 13], sizes = [64, 1], strides = [1, 1]} : vector<64x16xf32> to vector<64x1xf32>
    %42 = vector.extract_strided_slice %10 {offsets = [5, 0], sizes = [1, 64], strides = [1, 1]} : vector<8x64xf32> to vector<1x64xf32>
    %43 = vector.broadcast %41 : vector<64x1xf32> to vector<64x64xf32>
    %44 = vector.broadcast %42 : vector<1x64xf32> to vector<64x64xf32>
    %45 = arith.addf %43, %44 : vector<64x64xf32>
    %46 = arith.addf %45, %0 : vector<64x64xf32>
    %47 = vector.extract_strided_slice %8 {offsets = [0, 14], sizes = [64, 1], strides = [1, 1]} : vector<64x16xf32> to vector<64x1xf32>
    %48 = vector.extract_strided_slice %10 {offsets = [6, 0], sizes = [1, 64], strides = [1, 1]} : vector<8x64xf32> to vector<1x64xf32>
    %49 = vector.broadcast %47 : vector<64x1xf32> to vector<64x64xf32>
    %50 = vector.broadcast %48 : vector<1x64xf32> to vector<64x64xf32>
    %51 = arith.addf %49, %50 : vector<64x64xf32>
    %52 = arith.addf %51, %0 : vector<64x64xf32>
    %53 = vector.extract_strided_slice %8 {offsets = [0, 15], sizes = [64, 1], strides = [1, 1]} : vector<64x16xf32> to vector<64x1xf32>
    %54 = vector.extract_strided_slice %10 {offsets = [7, 0], sizes = [1, 64], strides = [1, 1]} : vector<8x64xf32> to vector<1x64xf32>
    %55 = vector.broadcast %53 : vector<64x1xf32> to vector<64x64xf32>
    %56 = vector.broadcast %54 : vector<1x64xf32> to vector<64x64xf32>
    %57 = arith.addf %55, %56 : vector<64x64xf32>
    %58 = arith.addf %57, %0 : vector<64x64xf32>
    %59 = tpu.concatenate %16, %22, %28, %34, %40, %46, %52, %58 in 1 : vector<64x64xf32>, vector<64x64xf32>, vector<64x64xf32>, vector<64x64xf32>, vector<64x64xf32>, vector<64x64xf32>, vector<64x64xf32>, vector<64x64xf32> -> vector<64x512xf32>
    %cst_14 = arith.constant 0.000000e+00 : f32
    %60 = vector.broadcast %cst_14 : f32 to vector<64x512xf32>
    %61 = arith.cmpf ogt, %59, %60 : vector<64x512xf32>
    %cst_15 = arith.constant 2.000000e-01 : f32
    %62 = vector.broadcast %cst_15 : f32 to vector<64x512xf32>
    %63 = arith.mulf %62, %59 : vector<64x512xf32>
    %64 = arith.select %61, %59, %63 : vector<64x512xi1>, vector<64x512xf32>
    %cst_16 = arith.constant dense<0xFF800000> : vector<64xf32>
    %65 = vector.multi_reduction <maximumf>, %64, %cst_16 [1] : vector<64x512xf32> to vector<64xf32>
    %66 = vector.shape_cast %65 : vector<64xf32> to vector<64x1xf32>
    %67 = vector.broadcast %66 : vector<64x1xf32> to vector<64x512xf32>
    %68 = arith.subf %64, %67 : vector<64x512xf32>
    %69 = math.exp %68 : vector<64x512xf32>
    %70 = tpu.concatenate %7, %7, %7, %7, %7, %7, %7, %7 in 0 : vector<64x64xf32>, vector<64x64xf32>, vector<64x64xf32>, vector<64x64xf32>, vector<64x64xf32>, vector<64x64xf32>, vector<64x64xf32>, vector<64x64xf32> -> vector<512x64xf32>
    %71 = arith.mulf %70, %4 : vector<512x64xf32>
    %72 = tpu.concatenate %71, %5 in 1 : vector<512x64xf32>, vector<512x8xf32> -> vector<512x72xf32>
    %cst_17 = arith.constant dense<0.000000e+00> : vector<64x72xf32>
    %73 = tpu.matmul %69, %72, %cst_17 {dimension_numbers = #tpu.dot_dimension_numbers<[1], [0], [0], [1], [0, 0, 1, 1], [], []>} : vector<64x512xf32>, vector<512x72xf32>, vector<64x72xf32> -> vector<64x72xf32>
    %74 = vector.extract_strided_slice %73 {offsets = [0, 0], sizes = [64, 64], strides = [1, 1]} : vector<64x72xf32> to vector<64x64xf32>
    %75 = vector.extract_strided_slice %73 {offsets = [0, 64], sizes = [64, 8], strides = [1, 1]} : vector<64x72xf32> to vector<64x8xf32>
    %cst_18 = arith.constant 9.99999968E-21 : f32
    %76 = vector.broadcast %cst_18 : f32 to vector<64x8xf32>
    %77 = arith.maximumf %75, %76 : vector<64x8xf32>
    %78 = tpu.reciprocal %77 {approx = true} : vector<64x8xf32> -> vector<64x8xf32>
    %cst_19 = arith.constant dense<0.000000e+00> : vector<64x64xf32>
    %79 = tpu.matmul %78, %6, %cst_19 {dimension_numbers = #tpu.dot_dimension_numbers<[1], [0], [0], [1], [0, 0, 1, 1], [], []>} : vector<64x8xf32>, vector<8x64xf32>, vector<64x64xf32> -> vector<64x64xf32>
    %80 = arith.mulf %74, %79 : vector<64x64xf32>
    %c0_20 = arith.constant 0 : index
    %c0_21 = arith.constant 0 : index
    %81 = vector.load %arg4[%c0_20, %c0_21] : memref<1x64xf32, #tpu.memory_space<vmem>>, vector<1x64xf32>
    %82 = vector.broadcast %81 : vector<1x64xf32> to vector<64x64xf32>
    %83 = arith.addf %80, %82 : vector<64x64xf32>
    %cst_22 = arith.constant 0.000000e+00 : f32
    %84 = vector.broadcast %cst_22 : f32 to vector<64x64xf32>
    %85 = arith.maximumf %83, %84 : vector<64x64xf32>
    %c0_23 = arith.constant 0 : index
    %c0_24 = arith.constant 0 : index
    %86 = vector.load %arg8[%c0_23, %c0_24] : memref<64x8xf32, #tpu.memory_space<vmem>>, vector<64x8xf32>
    %c0_25 = arith.constant 0 : index
    %c0_26 = arith.constant 0 : index
    %87 = vector.load %arg9[%c0_25, %c0_26] : memref<8x2xf32, #tpu.memory_space<vmem>>, vector<8x2xf32>
    %cst_27 = arith.constant dense<0.000000e+00> : vector<64x8xf32>
    %88 = tpu.matmul %85, %86, %cst_27 {dimension_numbers = #tpu.dot_dimension_numbers<[1], [0], [0], [1], [0, 0, 1, 1], [], []>} : vector<64x64xf32>, vector<64x8xf32>, vector<64x8xf32> -> vector<64x8xf32>
    %cst_28 = arith.constant dense<0.000000e+00> : vector<64x2xf32>
    %89 = tpu.matmul %88, %87, %cst_28 {dimension_numbers = #tpu.dot_dimension_numbers<[1], [0], [0], [1], [0, 0, 1, 1], [], []>} : vector<64x8xf32>, vector<8x2xf32>, vector<64x2xf32> -> vector<64x2xf32>
    %90 = vector.extract_strided_slice %89 {offsets = [0, 0], sizes = [64, 1], strides = [1, 1]} : vector<64x2xf32> to vector<64x1xf32>
    %91 = tpu.transpose %90, [1, 0] : vector<64x1xf32> -> vector<1x64xf32>
    %92 = vector.extract_strided_slice %89 {offsets = [0, 1], sizes = [64, 1], strides = [1, 1]} : vector<64x2xf32> to vector<64x1xf32>
    %93 = vector.broadcast %92 : vector<64x1xf32> to vector<64x64xf32>
    %94 = vector.broadcast %91 : vector<1x64xf32> to vector<64x64xf32>
    %95 = arith.addf %93, %94 : vector<64x64xf32>
    %96 = arith.addf %95, %0 : vector<64x64xf32>
    %cst_29 = arith.constant 0.000000e+00 : f32
    %97 = vector.broadcast %cst_29 : f32 to vector<64x64xf32>
    %98 = arith.cmpf ogt, %96, %97 : vector<64x64xf32>
    %cst_30 = arith.constant 2.000000e-01 : f32
    %99 = vector.broadcast %cst_30 : f32 to vector<64x64xf32>
    %100 = arith.mulf %99, %96 : vector<64x64xf32>
    %101 = arith.select %98, %96, %100 : vector<64x64xi1>, vector<64x64xf32>
    %cst_31 = arith.constant dense<0xFF800000> : vector<64xf32>
    %102 = vector.multi_reduction <maximumf>, %101, %cst_31 [1] : vector<64x64xf32> to vector<64xf32>
    %103 = vector.shape_cast %102 : vector<64xf32> to vector<64x1xf32>
    %104 = vector.broadcast %103 : vector<64x1xf32> to vector<64x64xf32>
    %105 = arith.subf %101, %104 : vector<64x64xf32>
    %106 = math.exp %105 : vector<64x64xf32>
    %cst_32 = arith.constant 1.000000e+00 : f32
    %107 = vector.broadcast %cst_32 : f32 to vector<64x1xf32>
    %108 = tpu.concatenate %88, %107 in 1 : vector<64x8xf32>, vector<64x1xf32> -> vector<64x9xf32>
    %cst_33 = arith.constant dense<0.000000e+00> : vector<64x9xf32>
    %109 = tpu.matmul %106, %108, %cst_33 {dimension_numbers = #tpu.dot_dimension_numbers<[1], [0], [0], [1], [0, 0, 1, 1], [], []>} : vector<64x64xf32>, vector<64x9xf32>, vector<64x9xf32> -> vector<64x9xf32>
    %110 = vector.extract_strided_slice %109 {offsets = [0, 0], sizes = [64, 8], strides = [1, 1]} : vector<64x9xf32> to vector<64x8xf32>
    %111 = vector.extract_strided_slice %109 {offsets = [0, 8], sizes = [64, 1], strides = [1, 1]} : vector<64x9xf32> to vector<64x1xf32>
    %cst_34 = arith.constant 9.99999968E-21 : f32
    %112 = vector.broadcast %cst_34 : f32 to vector<64x1xf32>
    %113 = arith.maximumf %111, %112 : vector<64x1xf32>
    %114 = tpu.reciprocal %113 {approx = true} : vector<64x1xf32> -> vector<64x1xf32>
    %115 = vector.broadcast %114 : vector<64x1xf32> to vector<64x8xf32>
    %116 = arith.mulf %110, %115 : vector<64x8xf32>
    %c0_35 = arith.constant 0 : index
    %c0_36 = arith.constant 0 : index
    %117 = vector.load %arg10[%c0_35, %c0_36] : memref<1x8xf32, #tpu.memory_space<vmem>>, vector<1x8xf32>
    %118 = vector.broadcast %117 : vector<1x8xf32> to vector<64x8xf32>
    %119 = arith.addf %116, %118 : vector<64x8xf32>
    %cst_37 = arith.constant 1.000000e+00 : f32
    %120 = vector.broadcast %cst_37 : f32 to vector<64x8xf32>
    %121 = arith.mulf %119, %120 : vector<64x8xf32>
    %c0_38 = arith.constant 0 : index
    %c0_39 = arith.constant 0 : index
    %122 = vector.load %arg11[%c0_38, %c0_39] : memref<64x8xf32, #tpu.memory_space<vmem>>, vector<64x8xf32>
    tpu.vector_store %arg11[%c0_38, %c0_39], %121 {strides = array<i32>} : memref<64x8xf32, #tpu.memory_space<vmem>>, vector<64x8xf32>,
    return
  }
}

</mosaic_0001>

<bundles_post_ra>
// kernel: tpu_custom_call.1
= control target key start
LH: loop header
LB: loop body
LE: loop exit
PB: predicated region body
PF: predicated region fallthrough
CT: control target
= control target key end

     0   :  { %vm193_vm0 = vcmask 130048   ;;  %s3344_s23 = smov 64   ;;  %vm323_vm1 = vcmask 523264   ;;  %s5387_s6 = inlined_call_operand.vmem [shape: f32[512,8], index: 6, kind: input, shape index: {}]   ;;  %s5388_s2 = inlined_call_operand.vmem [shape: f32[16,64], index: 2, kind: input, shape index: {}]   ;;  %s5389_s0 = inlined_call_operand.vmem [shape: f32[64,16], index: 0, kind: input, shape index: {}]   ;;  %s5390_s3 = inlined_call_operand.vmem [shape: f32[64,16], index: 3, kind: input, shape index: {}]   ;;  %s5391_s5 = inlined_call_operand.vmem [shape: f32[512,64], index: 5, kind: input, shape index: {}]   ;;  %s5392_s1 = inlined_call_operand.vmem [shape: f32[64,64], index: 1, kind: input, shape index: {}]   ;;  %s5393_s7 = inlined_call_operand.vmem [shape: f32[8,64], index: 7, kind: input, shape index: {}]   ;;  %s5394_s8 = inlined_call_operand.vmem [shape: f32[64,8], index: 8, kind: input, shape index: {}]   ;;  %s5395_s9 = inlined_call_operand.vmem [shape: f32[8,2], index: 9, kind: input, shape index: {}]   ;;  %s5396_s4 = inlined_call_operand.vmem [shape: f32[1,64], index: 4, kind: input, shape index: {}]   ;;  %s5397_s10 = inlined_call_operand.vmem [shape: f32[1,8], index: 10, kind: input, shape index: {}]   ;;  %s5398_s11 = inlined_call_operand.vmem [shape: f32[64,8], index: 11, kind: output, shape index: {}]  }
   0x1   :  { %v159_v0 = vld [vmem:[%s5387_s6 + $0xf8] sm:$0xff]  ;;  %v55_v2 = vld [vmem:[%s5388_s2 + $0x8] sm:$0xff]  ;;  %v54_v3 = vld [vmem:[%s5388_s2] sm:$0xff] }
   0x2   :  { %v143_v1 = vld [vmem:[%s5387_s6 + $0x78] sm:$0xff]  ;;  %1491 = vrot.lane.b32.xlu1 %v159_v0, %s3344_s23  ;;  %v46_v4 = vld [vmem:[%s5389_s0] sm:$0xff]  ;;  %2985 = vmatprep.subr.mxu0 %v55_v2  ;;  %v158_v6 = vld [vmem:[%s5387_s6 + $0xf0] sm:$0xff] }
   0x3   :  { %1459 = vrot.lane.b32.xlu0 %v143_v1, %s3344_s23  ;;  %2989 = vmatprep.mubr.msk.f32.mxu0 %vm193_vm0, %v46_v4  ;;  %v156_v5 = vld [vmem:[%s5387_s6 + $0xe0] sm:$0xff]  ;;  %v47_v7 = vld [vmem:[%s5389_s0 + $0x8] sm:$0xff]  ;;  %v48_v8 = vld [vmem:[%s5389_s0 + $0x10] sm:$0xff] }
   0x4   :  { %2986 = vmatpush3.msra.mxu0 %v55_v2  ;;  %v155_v9 = vld [vmem:[%s5387_s6 + $0xd8] sm:$0xff]  ;;  %v142_v10 = vld [vmem:[%s5387_s6 + $0x70] sm:$0xff]  ;;  %v50_v12 = vld [vmem:[%s5389_s0 + $0x20] sm:$0xff] }
   0x5   :  { %2987 = vmatprep.subr.mxu0 %v54_v3  ;;  %v49_v11 = vld [vmem:[%s5389_s0 + $0x18] sm:$0xff]  ;;  %v157_v14 = vld [vmem:[%s5387_s6 + $0xe8] sm:$0xff]  ;;  %v52_v16 = vld [vmem:[%s5389_s0 + $0x30] sm:$0xff] }
   0x6   :  { %2988 = vmatpush3.msra.mxu0 %v54_v3  ;;  %1485 = vrot.lane.b32.xlu1 %v156_v5, %s3344_s23  ;;  %v139_v13 = vld [vmem:[%s5387_s6 + $0x58] sm:$0xff]  ;;  %v51_v15 = vld [vmem:[%s5389_s0 + $0x28] sm:$0xff]  ;;  %v152_v17 = vld [vmem:[%s5387_s6 + $0xc0] sm:$0xff] }
   0x7   :  { %1489 = vrot.lane.b32.xlu0 %v158_v6, %s3344_s23  ;;  %2990 = vmatmul.mubr.msk.f32.vlgmr.msra.gmra.mxu0 %vm193_vm0, %v47_v7  ;;  %v141_v18 = vld [vmem:[%s5387_s6 + $0x68] sm:$0xff]  ;;  %v53_v19 = vld [vmem:[%s5389_s0 + $0x38] sm:$0xff]  ;;  %v136_v20 = vld [vmem:[%s5387_s6 + $0x40] sm:$0xff]  ;;  %v5399_v7 = vmov 10  }
   0x8   :  { %2992 = vmatprep.mubr.msk.f32.mxu0 %vm193_vm0, %v48_v8  ;;  %v140_v21 = vld [vmem:[%s5387_s6 + $0x60] sm:$0xff]  ;;  %v135_v22 = vld [vmem:[%s5387_s6 + $0x38] sm:$0xff]  ;;  %v154_v23 = vld [vmem:[%s5387_s6 + $0xd0] sm:$0xff]  ;;  %3161 = vset.pattern.permute.xlu0 %v5399_v7  ;;  %v5401_v8 = vmov 9  }
   0x9   :  { %v175_v24 = vld [vmem:[%s5387_s6 + $0x178] sm:$0xff]  ;;  %v138_v25 = vld [vmem:[%s5387_s6 + $0x50] sm:$0xff]  ;;  %v189_v26 = vld [vmem:[%s5387_s6 + $0x1e8] sm:$0xff]  ;;  %3156 = vset.pattern.permute.xlu1 %v5401_v8 }
   0xa   :  { %1483 = vrot.lane.b32.xlu1 %v155_v9, %s3344_s23  ;;  %v153_v27 = vld [vmem:[%s5387_s6 + $0xc8] sm:$0xff]  ;;  %v146_v28 = vld [vmem:[%s5387_s6 + $0x90] sm:$0xff]  ;;  %v151_v31 = vld [vmem:[%s5387_s6 + $0xb8] sm:$0xff] }
   0xb   :  { %1457 = vrot.lane.b32.xlu0 %v142_v10, %s3344_s23  ;;  %2993 = vmatmul.mubr.msk.f32.gmra.mxu0 %vm193_vm0, %v49_v11  ;;  %v137_v29 = vld [vmem:[%s5387_s6 + $0x48] sm:$0xff]  ;;  %v130_v32 = vld [vmem:[%s5387_s6 + $0x10] sm:$0xff]  ;;  %v188_v34 = vld [vmem:[%s5387_s6 + $0x1e0] sm:$0xff] }
   0xc   :  { %2995 = vmatprep.mubr.msk.f32.mxu0 %vm193_vm0, %v50_v12  ;;  %v173_v30 = vld [vmem:[%s5387_s6 + $0x168] sm:$0xff]  ;;  %v150_v33 = vld [vmem:[%s5387_s6 + $0xb0] sm:$0xff]  ;;  %v172_v38 = vld [vmem:[%s5387_s6 + $0x160] sm:$0xff] }
   0xd   :  { %v134_v35 = vld [vmem:[%s5387_s6 + $0x30] sm:$0xff]  ;;  %v145_v36 = vld [vmem:[%s5387_s6 + $0x88] sm:$0xff]  ;;  %v63_v40 = vld [vmem:[%s5390_s3 + $0x38] sm:$0xff] }
   0xe   :  { %1451 = vrot.lane.b32.xlu1 %v139_v13, %s3344_s23  ;;  %v149_v37 = vld [vmem:[%s5387_s6 + $0xa8] sm:$0xff]  ;;  %3001 = vmatprep.subr.mxu1 %v63_v40  ;;  %v191_v42 = vld [vmem:[%s5387_s6 + $0x1f8] sm:$0xff]  ;;  %v62_v43 = vld [vmem:[%s5390_s3 + $0x30] sm:$0xff] }
   0xf   :  { %1487 = vrot.lane.b32.xlu0 %v157_v14, %s3344_s23  ;;  %2996 = vmatmul.mubr.msk.f32.gmra.mxu0 %vm193_vm0, %v51_v15  ;;  %v133_v39 = vld [vmem:[%s5387_s6 + $0x28] sm:$0xff]  ;;  %v187_v45 = vld [vmem:[%s5387_s6 + $0x1d8] sm:$0xff]  ;;  %v148_v46 = vld [vmem:[%s5387_s6 + $0xa0] sm:$0xff] }
  0x10   :  { %2998 = vmatprep.mubr.msk.f32.mxu0 %vm193_vm0, %v52_v16  ;;  %v129_v41 = vld [vmem:[%s5387_s6 + $0x8] sm:$0xff]  ;;  %3002 = vmatpush3.msra.mxu1 %v63_v40  ;;  %v60_v47 = vld [vmem:[%s5390_s3 + $0x20] sm:$0xff]  ;;  %v59_v48 = vld [vmem:[%s5390_s3 + $0x18] sm:$0xff] }
  0x11   :  { %3003 = vmatprep.subr.mxu1 %v62_v43  ;;  %v61_v44 = vld [vmem:[%s5390_s3 + $0x28] sm:$0xff]  ;;  %v144_v49 = vld [vmem:[%s5387_s6 + $0x80] sm:$0xff]  ;;  %v58_v51 = vld [vmem:[%s5390_s3 + $0x10] sm:$0xff] }
  0x12   :  { %1477 = vrot.lane.b32.xlu1 %v152_v17, %s3344_s23  ;;  %3004 = vmatpush3.msra.mxu1 %v62_v43  ;;  %v132_v50 = vld [vmem:[%s5387_s6 + $0x20] sm:$0xff]  ;;  %v57_v52 = vld [vmem:[%s5390_s3 + $0x8] sm:$0xff]  ;;  %v190_v54 = vld [vmem:[%s5387_s6 + $0x1f0] sm:$0xff] }
  0x13   :  { %1455 = vrot.lane.b32.xlu0 %v141_v18, %s3344_s23  ;;  %2999 = vmatmul.mubr.msk.f32.gmra.mxu0 %vm193_vm0, %v53_v19  ;;  %v128_v53 = vld [vmem:[%s5387_s6] sm:$0xff]  ;;  %v186_v56 = vld [vmem:[%s5387_s6 + $0x1d0] sm:$0xff]  ;;  %v147_v57 = vld [vmem:[%s5387_s6 + $0x98] sm:$0xff] }
  0x14   :  { %3005 = vmatprep.subr.mxu1 %v61_v44  ;;  %v56_v55 = vld [vmem:[%s5390_s3] sm:$0xff]  ;;  %v170_v58 = vld [vmem:[%s5387_s6 + $0x150] sm:$0xff]  ;;  %v185_v60 = vld [vmem:[%s5387_s6 + $0x1c8] sm:$0xff] }
  0x15   :  { %3006 = vmatpush3.msra.mxu1 %v61_v44  ;;  %v174_v59 = vld [vmem:[%s5387_s6 + $0x170] sm:$0xff]  ;;  %v131_v61 = vld [vmem:[%s5387_s6 + $0x18] sm:$0xff]  ;;  %v169_v62 = vld [vmem:[%s5387_s6 + $0x148] sm:$0xff] }
  0x16   :  { %1445 = vrot.lane.b32.xlu1 %v136_v20, %s3344_s23  ;;  %3007 = vmatprep.subr.mxu1 %v60_v47  ;;  %v171_v63 = vld [vmem:[%s5387_s6 + $0x158] sm:$0xff]  ;;  %v184_v0 = vld [vmem:[%s5387_s6 + $0x1c0] sm:$0xff] }
  0x17   :  { %1453 = vrot.lane.b32.xlu0 %v140_v21, %s3344_s23  ;;  %3008 = vmatpush3.msra.mxu1 %v60_v47  ;;  %v168_v1 = vld [vmem:[%s5387_s6 + $0x140] sm:$0xff]  ;;  %v183_v2 = vld [vmem:[%s5387_s6 + $0x1b8] sm:$0xff] }
  0x18   :  { %3009 = vmatprep.subr.mxu1 %v59_v48  ;;  %v79_v8 = vld [vmem:[%s5391_s5 + $0x78] sm:$0xff] }
  0x19   :  { %3010 = vmatpush3.msra.mxu1 %v59_v48 }
  0x1a   :  { %1443 = vrot.lane.b32.xlu1 %v135_v22, %s3344_s23  ;;  %3011 = vmatprep.subr.mxu1 %v58_v51 }
  0x1b   :  { %1481 = vrot.lane.b32.xlu0 %v154_v23, %s3344_s23  ;;  %3012 = vmatpush3.msra.mxu1 %v58_v51  ;;  %v89_v51 = vld [vmem:[%s5391_s5 + $0xc8] sm:$0xff] }
  0x1c   :  { %3013 = vmatprep.subr.mxu1 %v57_v52 }
  0x1d   :  { %3014 = vmatpush3.msra.mxu1 %v57_v52  ;;  %v121_v52 = vld [vmem:[%s5391_s5 + $0x1c8] sm:$0xff] }
  0x1e   :  { %1523 = vrot.lane.b32.xlu1 %v175_v24, %s3344_s23  ;;  %3015 = vmatprep.subr.mxu1 %v56_v55 }
  0x1f   :  { %1449 = vrot.lane.b32.xlu0 %v138_v25, %s3344_s23  ;;  %3016 = vmatpush3.msra.mxu1 %v56_v55  ;;  %v93_v55 = vld [vmem:[%s5391_s5 + $0xe8] sm:$0xff] }
  0x22   :  { %1551 = vrot.lane.b32.xlu1 %v189_v26, %s3344_s23 }
  0x23   :  { %1479 = vrot.lane.b32.xlu0 %v153_v27, %s3344_s23 }
  0x26   :  { %1465 = vrot.lane.b32.xlu1 %v146_v28, %s3344_s23 }
  0x27   :  { %1447 = vrot.lane.b32.xlu0 %v137_v29, %s3344_s23 }
  0x2a   :  { %1519 = vrot.lane.b32.xlu1 %v173_v30, %s3344_s23 }
  0x2b   :  { %1475 = vrot.lane.b32.xlu0 %v151_v31, %s3344_s23 }
  0x2e   :  { %1433 = vrot.lane.b32.xlu1 %v130_v32, %s3344_s23 }
  0x2f   :  { %1473 = vrot.lane.b32.xlu0 %v150_v33, %s3344_s23 }
  0x32   :  { %1549 = vrot.lane.b32.xlu1 %v188_v34, %s3344_s23 }
  0x33   :  { %1441 = vrot.lane.b32.xlu0 %v134_v35, %s3344_s23 }
  0x36   :  { %1463 = vrot.lane.b32.xlu1 %v145_v36, %s3344_s23 }
  0x37   :  { %1471 = vrot.lane.b32.xlu0 %v149_v37, %s3344_s23 }
  0x3a   :  { %1517 = vrot.lane.b32.xlu1 %v172_v38, %s3344_s23 }
  0x3b   :  { %1439 = vrot.lane.b32.xlu0 %v133_v39, %s3344_s23 }
  0x3e   :  { %1431 = vrot.lane.b32.xlu1 %v129_v41, %s3344_s23 }
  0x3f   :  { %1555 = vrot.lane.b32.xlu0 %v191_v42, %s3344_s23 }
  0x42   :  { %1547 = vrot.lane.b32.xlu1 %v187_v45, %s3344_s23 }
  0x43   :  { %1469 = vrot.lane.b32.xlu0 %v148_v46, %s3344_s23 }
  0x46   :  { %1461 = vrot.lane.b32.xlu1 %v144_v49, %s3344_s23  ;;  %v105_v49 = vld [vmem:[%s5391_s5 + $0x148] sm:$0xff] }
  0x47   :  { %1437 = vrot.lane.b32.xlu0 %v132_v50, %s3344_s23 }
  0x4a   :  { %1429 = vrot.lane.b32.xlu1 %v128_v53, %s3344_s23  ;;  %v73_v53 = vld [vmem:[%s5391_s5 + $0x48] sm:$0xff] }
  0x4b   :  { %1553 = vrot.lane.b32.xlu0 %v190_v54, %s3344_s23  ;;  %v107_v54 = vld [vmem:[%s5391_s5 + $0x158] sm:$0xff] }
  0x4e   :  { %1545 = vrot.lane.b32.xlu1 %v186_v56, %s3344_s23  ;;  %v125_v56 = vld [vmem:[%s5391_s5 + $0x1e8] sm:$0xff] }
  0x4f   :  { %1467 = vrot.lane.b32.xlu0 %v147_v57, %s3344_s23 }
  0x52   :  { %1513 = vrot.lane.b32.xlu1 %v170_v58, %s3344_s23  ;;  %v95_v58 = vld [vmem:[%s5391_s5 + $0xf8] sm:$0xff] }
  0x53   :  { %1521 = vrot.lane.b32.xlu0 %v174_v59, %s3344_s23  ;;  %v91_v59 = vld [vmem:[%s5391_s5 + $0xd8] sm:$0xff] }
  0x56   :  { %1543 = vrot.lane.b32.xlu1 %v185_v60, %s3344_s23  ;;  %v123_v60 = vld [vmem:[%s5391_s5 + $0x1d8] sm:$0xff] }
  0x57   :  { %1435 = vrot.lane.b32.xlu0 %v131_v61, %s3344_s23  ;;  %v75_v61 = vld [vmem:[%s5391_s5 + $0x58] sm:$0xff] }
  0x5a   :  { %1511 = vrot.lane.b32.xlu1 %v169_v62, %s3344_s23 }
  0x5b   :  { %1515 = vrot.lane.b32.xlu0 %v171_v63, %s3344_s23  ;;  %v77_v63 = vld [vmem:[%s5391_s5 + $0x68] sm:$0xff] }
  0x5e   :  { %1541 = vrot.lane.b32.xlu1 %v184_v0, %s3344_s23  ;;  %v90_v0 = vld [vmem:[%s5391_s5 + $0xd0] sm:$0xff] }
  0x5f   :  { %1509 = vrot.lane.b32.xlu0 %v168_v1, %s3344_s23  ;;  %v122_v1 = vld [vmem:[%s5391_s5 + $0x1d0] sm:$0xff] }
  0x62   :  { %1539 = vrot.lane.b32.xlu1 %v183_v2, %s3344_s23 }
  0x74   :  { %v3672_v3 = vpop.permute.xlu1 %1491 }
  0x75   :  { %v3674_v4 = vpop.permute.xlu0 %1459 }
  0x78   :  { %v3676_v5 = vpop.permute.xlu1 %1485 }
  0x79   :  { %v3678_v6 = vpop.permute.xlu0 %1489 }
  0x7c   :  { %v3682_v9 = vpop.permute.xlu1 %1483 }
  0x7d   :  { %v3684_v10 = vpop.permute.xlu0 %1457 }
  0x80   :  { %v3686_v11 = vpop.permute.xlu1 %1451 }
  0x81   :  { %v3688_v12 = vpop.permute.xlu0 %1487 }
  0x84   :  { %v3690_v13 = vpop.permute.xlu1 %1477 }
  0x85   :  { %v3692_v14 = vpop.permute.xlu0 %1455 }
  0x88   :  { %v3694_v15 = vpop.permute.xlu1 %1445 }
  0x89   :  { %5437 = vst [vmem:[#allocation2_spill] sm:$0xff] %v3694_v15  ;;  %v3696_v16 = vpop.permute.xlu0 %1453 }
  0x8c   :  { %v3698_v17 = vpop.permute.xlu1 %1443 }
  0x8d   :  { %5438 = vst [vmem:[#allocation3_spill] sm:$0xff] %v3698_v17  ;;  %v3700_v18 = vpop.permute.xlu0 %1481  ;;  %v76_v17 = vld [vmem:[%s5391_s5 + $0x60] sm:$0xff] }
  0x90   :  { %v3702_v19 = vpop.permute.xlu1 %1523 }
  0x91   :  { %v3704_v20 = vpop.permute.xlu0 %1449 }
  0x94   :  { %v3706_v21 = vpop.permute.xlu1 %1551 }
  0x95   :  { %v3708_v22 = vpop.permute.xlu0 %1479 }
  0x98   :  { %v3710_v23 = vpop.permute.xlu1 %1465 }
  0x99   :  { %5439 = vst [vmem:[#allocation4_spill] sm:$0xff] %v3710_v23  ;;  %v3712_v24 = vpop.permute.xlu0 %1447 }
  0x9c   :  { %v3714_v25 = vpop.permute.xlu1 %1519 }
  0x9d   :  { %v3716_v26 = vpop.permute.xlu0 %1475 }
  0x9e   :  { %5440 = vst [vmem:[#allocation5_spill] sm:$0xff] %v3716_v26  ;;  %v108_v26 = vld [vmem:[%s5391_s5 + $0x160] sm:$0xff] }
  0xa0   :  { %v3718_v27 = vpop.permute.xlu1 %1433 }
  0xa1   :  { %5441 = vst [vmem:[#allocation6_spill] sm:$0xff] %v3718_v27  ;;  %v3720_v28 = vpop.permute.xlu0 %1473 }
  0xa2   :  { %5442 = vst [vmem:[#allocation7_spill] sm:$0xff] %v3720_v28 }
  0xa4   :  { %v3722_v29 = vpop.permute.xlu1 %1549 }
  0xa5   :  { %v3724_v30 = vpop.permute.xlu0 %1441 }
  0xa6   :  { %5443 = vst [vmem:[#allocation8_spill] sm:$0xff] %v3724_v30 }
  0xa8   :  { %v3726_v31 = vpop.permute.xlu1 %1463 }
  0xa9   :  { %5444 = vst [vmem:[#allocation9_spill] sm:$0xff] %v3726_v31  ;;  %v3728_v32 = vpop.permute.xlu0 %1471 }
  0xaa   :  { %5445 = vst [vmem:[#allocation10_spill] sm:$0xff] %v3728_v32 }
  0xac   :  { %v3730_v33 = vpop.permute.xlu1 %1517 }
  0xad   :  { %v3732_v34 = vpop.permute.xlu0 %1439 }
  0xae   :  { %5446 = vst [vmem:[#allocation11_spill] sm:$0xff] %v3732_v34 }
  0xb0   :  { %v3734_v35 = vpop.permute.xlu1 %1431 }
  0xb1   :  { %5447 = vst [vmem:[#allocation12_spill] sm:$0xff] %v3734_v35  ;;  %v3736_v36 = vpop.permute.xlu0 %1555 }
  0xb4   :  { %v3738_v37 = vpop.permute.xlu1 %1547 }
  0xb5   :  { %v3740_v38 = vpop.permute.xlu0 %1469 }
  0xb6   :  { %5448 = vst [vmem:[#allocation13_spill] sm:$0xff] %v3740_v38 }
  0xb8   :  { %v3742_v39 = vpop.permute.xlu1 %1461 }
  0xb9   :  { %5449 = vst [vmem:[#allocation14_spill] sm:$0xff] %v3742_v39  ;;  %v3744_v40 = vpop.permute.xlu0 %1437 }
  0xba   :  { %5450 = vst [vmem:[#allocation15_spill] sm:$0xff] %v3744_v40  ;;  %v109_v40 = vld [vmem:[%s5391_s5 + $0x168] sm:$0xff] }
  0xbc   :  { %v3746_v41 = vpop.permute.xlu1 %1429 }
  0xbd   :  { %5451 = vst [vmem:[#allocation16_spill] sm:$0xff] %v3746_v41  ;;  %v3748_v42 = vpop.permute.xlu0 %1553  ;;  %v111_v41 = vld [vmem:[%s5391_s5 + $0x178] sm:$0xff] }
  0xc0   :  { %v3750_v43 = vpop.permute.xlu1 %1545 }
  0xc1   :  { %v3758_v46 = vpop.permute.xlu0 %1467 }
  0xc2   :  { %5454 = vst [vmem:[#allocation19_spill] sm:$0xff] %v3758_v46 }
  0xc4   :  { %v3764_v48 = vpop.permute.xlu1 %1513 }
  0xc5   :  { %v3819_v2 = vpop.permute.xlu0 %1521 }
  0xc7   :  { %v3752_v44 = vpop.f32.mrf.mxu0 }
  0xc8   :  { %5452 = vst [vmem:[#allocation17_spill] sm:$0xff] %v3752_v44  ;;  %v3808_v62 = vmul.f32 %v3752_v44, %v105_v49  ;;  %v127_v49 = vld [vmem:[%s5391_s5 + $0x1f8] sm:$0xff]  ;;  %v3834_v35 = vmul.f32 %v3752_v44, %v89_v51  ;;  %v3837_v31 = vmul.f32 %v3752_v44, %v121_v52  ;;  %v3840_v27 = vmul.f32 %v3752_v44, %v73_v53  ;;  %v3842_v23 = vpop.permute.xlu1 %1543  ;;  %v92_v51 = vld [vmem:[%s5391_s5 + $0xe0] sm:$0xff] }
  0xc9   :  { %v3754_v45 = vpop.f32.mrf.mxu0  ;;  %v124_v52 = vld [vmem:[%s5391_s5 + $0x1e0] sm:$0xff] }
  0xca   :  { %5453 = vst [vmem:[#allocation18_spill] sm:$0xff] %v3754_v45  ;;  %3017 = vmatprep.mubr.msk.f32.mxu1 %vm323_vm1, %v3754_v45 }
  0xcb   :  { %v3760_v47 = vpop.f32.mrf.mxu0  ;;  %3018 = vmatmul.mubr.msk.f32.vlgmr.msra.gmra.mxu1 %vm323_vm1, %v3752_v44 }
  0xcc   :  { %5455 = vst [vmem:[#allocation20_spill] sm:$0xff] %v3760_v47  ;;  %v3845_v46 = vmul.f32 %v3760_v47, %v107_v54  ;;  %v3857_v53 = vmul.f32 %v3760_v47, %v91_v59  ;;  %v3863_v54 = vmul.f32 %v3760_v47, %v75_v61 }
  0xcd   :  { %v3769_v50 = vpop.f32.mrf.mxu0 }
  0xce   :  { %3020 = vmatprep.mubr.msk.f32.mxu1 %vm323_vm1, %v3769_v50  ;;  %v3872_v32 = vmul.f32 %v3769_v50, %v90_v0  ;;  %v3875_v59 = vmul.f32 %v3769_v50, %v122_v1  ;;  %v78_v0 = vld [vmem:[%s5391_s5 + $0x70] sm:$0xff] }
  0xcf   :  { %v3791_v57 = vpop.f32.mrf.mxu0  ;;  %3021 = vmatmul.mubr.msk.f32.gmra.mxu1 %vm323_vm1, %v3760_v47 }
  0xd0   :  { %v1330_v39 = vmul.f32 %v3791_v57, %v93_v55  ;;  %v3860_v55 = vmul.f32 %v3760_v47, %v123_v60  ;;  %v1362_v38 = vmul.f32 %v3791_v57, %v125_v56  ;;  %v1314_v34 = vmul.f32 %v3791_v57, %v77_v63  ;;  %v94_v56 = vld [vmem:[%s5391_s5 + $0xf0] sm:$0xff] }
  0xd1   :  { %v3821_v7 = vpop.f32.mrf.mxu0  ;;  %v126_v63 = vld [vmem:[%s5391_s5 + $0x1f0] sm:$0xff] }
  0xd2   :  { %3023 = vmatprep.mubr.msk.f32.mxu1 %vm323_vm1, %v3821_v7  ;;  %v1361_v28 = vmul.f32 %v3821_v7, %v124_v52 }
  0xd3   :  { %v3867_v44 = vpop.f32.mrf.mxu0  ;;  %3024 = vmatmul.mubr.msk.f32.gmra.mxu1 %vm323_vm1, %v3791_v57 }
  0xd4   :  { %v1332_v60 = vmul.f32 %v3867_v44, %v95_v58  ;;  %v1364_v61 = vmul.f32 %v3867_v44, %v127_v49  ;;  %v1316_v47 = vmul.f32 %v3867_v44, %v79_v8  ;;  %v1348_v30 = vmul.f32 %v3867_v44, %v111_v41  ;;  %v110_v8 = vld [vmem:[%s5391_s5 + $0x170] sm:$0xff] }
  0xd5   :  { %v3892_v1 = vpop.f32.mrf.mxu0  ;;  %v1650_v41 = vsel %vm323_vm1, %v1330_v39, %v3688_v12  ;;  %v1346_v58 = vmul.f32 %v3791_v57, %v109_v40  ;;  %v1329_v49 = vmul.f32 %v3821_v7, %v92_v51  ;;  %v3922_v51 = vpop.permute.xlu0 %1435 }
  0xd6   :  { %v1652_v15 = vsel %vm323_vm1, %v1332_v60, %v3672_v3  ;;  %v3912_v12 = vsel %vm323_vm1, %v1364_v61, %v3736_v36  ;;  %v1636_v39 = vsel %vm323_vm1, %v1316_v47, %v3674_v4  ;;  %v3918_v40 = vsel %vm323_vm1, %v1348_v30, %v3702_v19  ;;  %3026 = vmatprep.mubr.msk.f32.mxu1 %vm323_vm1, %v3892_v1  ;;  %v3928_v60 = vpop.permute.xlu1 %1511 }
  0xd7   :  { %5456 = vst [vmem:[#allocation21_spill] sm:$0xff] %v3918_v40  ;;  %2823 = vmatprep.subr.mxu0 %v1652_v15  ;;  %3113 = vmatprep.subr.mxu1 %v3912_v12  ;;  %v1331_v3 = vmul.f32 %v3892_v1, %v94_v56  ;;  %v1363_v36 = vmul.f32 %v3892_v1, %v126_v63  ;;  %v74_v15 = vld [vmem:[%s5391_s5 + $0x50] sm:$0xff] }
  0xd8   :  { %v1315_v52 = vmul.f32 %v3892_v1, %v78_v0  ;;  %2824 = vmatpush3.msra.mxu0 %v1636_v39  ;;  %3129 = vmatpush3.msra.mxu1 %v3918_v40  ;;  %v1347_v4 = vmul.f32 %v3892_v1, %v110_v8  ;;  %v1313_v19 = vmul.f32 %v3821_v7, %v76_v17  ;;  %v106_v17 = vld [vmem:[%s5391_s5 + $0x150] sm:$0xff]  ;;  %v72_v0 = vld [vmem:[%s5391_s5 + $0x40] sm:$0xff] }
  0xd9   :  { %v1345_v30 = vmul.f32 %v3821_v7, %v108_v26  ;;  %v1651_v47 = vsel %vm323_vm1, %v1331_v3, %v3678_v6  ;;  %v3941_v61 = vsel %vm323_vm1, %v1363_v36, %v3748_v42  ;;  %v3947_v63 = vsel %vm323_vm1, %v1362_v38, %v3706_v21  ;;  %3027 = vmatmul.mubr.msk.f32.gmra.mxu1 %vm323_vm1, %v3867_v44  ;;  %v104_v6 = vld [vmem:[%s5391_s5 + $0x140] sm:$0xff] }
  0xda   :  { %5457 = vst [vmem:[#allocation22_spill] sm:$0xff] %v3941_v61  ;;  %v1635_v56 = vsel %vm323_vm1, %v1315_v52, %v3684_v10  ;;  %5458 = vst [vmem:[#allocation23_spill] sm:$0xff] %v3947_v63  ;;  %2825 = vmatprep.subr.mxu0 %v1651_v47  ;;  %3114 = vmatprep.subr.mxu1 %v3941_v61  ;;  %v3960_v10 = vsel %vm323_vm1, %v1347_v4, %v3819_v2  ;;  %v5471_v47 = vld [vmem:[#allocation5_spill] sm:$0xff] }
  0xdb   :  { %5459 = vst [vmem:[#allocation24_spill] sm:$0xff] %v3960_v10  ;;  %v1634_v21 = vsel %vm323_vm1, %v1314_v34, %v3692_v14  ;;  %v3966_v26 = vsel %vm323_vm1, %v1346_v58, %v3714_v25  ;;  %2826 = vmatpush3.msra.mxu0 %v1635_v56  ;;  %3130 = vmatpush3.msra.mxu1 %v3960_v10 }
  0xdc   :  { %5460 = vst [vmem:[#allocation25_spill] sm:$0xff] %v3966_v26  ;;  %v1649_v38 = vsel %vm323_vm1, %v1329_v49, %v3676_v5  ;;  %v3973_v42 = vsel %vm323_vm1, %v1361_v28, %v3722_v29  ;;  %v1311_v2 = vmul.f32 %v3769_v50, %v74_v15  ;;  %2827 = vmatprep.subr.mxu0 %v1650_v41  ;;  %v88_v5 = vld [vmem:[%s5391_s5 + $0xc0] sm:$0xff]  ;;  %v1516_v28 = vpop.permute.xlu0 %1515  ;;  %v1542_v41 = vpop.permute.xlu1 %1541  ;;  %v70_v49 = vld [vmem:[%s5391_s5 + $0x30] sm:$0xff] }
  0xdd   :  { %5461 = vst [vmem:[#allocation26_spill] sm:$0xff] %v3973_v42  ;;  %3115 = vmatprep.subr.mxu1 %v3947_v63  ;;  %v1633_v14 = vsel %vm323_vm1, %v1313_v19, %v3696_v16  ;;  %v3981_v25 = vsel %vm323_vm1, %v1345_v30, %v3730_v33  ;;  %v1343_v34 = vmul.f32 %v3769_v50, %v106_v17  ;;  %v69_v19 = vld [vmem:[%s5391_s5 + $0x28] sm:$0xff] }
  0xde   :  { %5462 = vst [vmem:[#allocation27_spill] sm:$0xff] %v3981_v25  ;;  %v1341_v29 = vmul.f32 %v3754_v45, %v104_v6  ;;  %2828 = vmatpush3.msra.mxu0 %v1634_v21  ;;  %3131 = vmatpush3.msra.mxu1 %v3966_v26  ;;  %v1648_v16 = vsel %vm323_vm1, %v3857_v53, %v3682_v9  ;;  %v87_v53 = vld [vmem:[%s5391_s5 + $0xb8] sm:$0xff]  ;;  %v68_v6 = vld [vmem:[%s5391_s5 + $0x20] sm:$0xff] }
  0xdf   :  { %v3995_v33 = vsel %vm323_vm1, %v3860_v55, %v3738_v37  ;;  %v4002_v8 = vsel %vm323_vm1, %v3845_v46, %v1516_v28  ;;  %2829 = vmatprep.subr.mxu0 %v1649_v38  ;;  %3116 = vmatprep.subr.mxu1 %v3973_v42  ;;  %v1632_v9 = vsel %vm323_vm1, %v3863_v54, %v3686_v11  ;;  %v119_v54 = vld [vmem:[%s5391_s5 + $0x1b8] sm:$0xff]  ;;  %v5475_v28 = vld [vmem:[#allocation7_spill] sm:$0xff] }
  0xe0   :  { %5463 = vst [vmem:[#allocation28_spill] sm:$0xff] %v3995_v33  ;;  %5464 = vst [vmem:[#allocation29_spill] sm:$0xff] %v4002_v8  ;;  %v1646_v37 = vsel %vm323_vm1, %v3834_v35, %v3708_v22  ;;  %2830 = vmatpush3.msra.mxu0 %v1633_v14  ;;  %3132 = vmatpush3.msra.mxu1 %v3981_v25  ;;  %v1647_v46 = vsel %vm323_vm1, %v3872_v32, %v3700_v18  ;;  %v120_v22 = vld [vmem:[%s5391_s5 + $0x1c0] sm:$0xff]  ;;  %v71_v35 = vld [vmem:[%s5391_s5 + $0x38] sm:$0xff]  ;;  %v1510_v36 = vpop.permute.xlu0 %1509 }
  0xe1   :  { %v4021_v55 = vsel %vm323_vm1, %v3875_v59, %v3750_v43  ;;  %v1325_v11 = vmul.f32 %v3754_v45, %v88_v5  ;;  %2831 = vmatprep.subr.mxu0 %v1648_v16  ;;  %3117 = vmatprep.subr.mxu1 %v3995_v33  ;;  %v1631_v18 = vsel %vm323_vm1, %v1311_v2, %v3704_v20  ;;  %v86_v59 = vld [vmem:[%s5391_s5 + $0xb0] sm:$0xff]  ;;  %v5474_v2 = vld [vmem:[#allocation3_spill] sm:$0xff]  ;;  %v83_v5 = vld [vmem:[%s5391_s5 + $0x98] sm:$0xff] }
  0xe2   :  { %5465 = vst [vmem:[#allocation30_spill] sm:$0xff] %v4021_v55  ;;  %v4038_v32 = vsel %vm323_vm1, %v1343_v34, %v3764_v48  ;;  %v1309_v43 = vmul.f32 %v3754_v45, %v72_v0  ;;  %2832 = vmatpush3.msra.mxu0 %v1632_v9  ;;  %3133 = vmatpush3.msra.mxu1 %v4002_v8  ;;  %v5476_v0 = vld [vmem:[#allocation8_spill] sm:$0xff] }
  0xe3   :  { %5466 = vst [vmem:[#allocation31_spill] sm:$0xff] %v4038_v32  ;;  %v4048_v58 = vsel %vm323_vm1, %v3837_v31, %v3842_v23  ;;  %v1630_v20 = vsel %vm323_vm1, %v3840_v27, %v3712_v24  ;;  %v1324_v48 = vmul.f32 %v3867_v44, %v87_v53  ;;  %2833 = vmatprep.subr.mxu0 %v1647_v46  ;;  %v85_v23 = vld [vmem:[%s5391_s5 + $0xa8] sm:$0xff]  ;;  %v1540_v31 = vpop.permute.xlu1 %1539  ;;  %v5478_v46 = vld [vmem:[#allocation20_spill] sm:$0xff] }
  0xe4   :  { %5467 = vst [vmem:[#allocation32_spill] sm:$0xff] %v4048_v58  ;;  %3118 = vmatprep.subr.mxu1 %v4021_v55  ;;  %v1357_v39 = vmul.f32 %v3754_v45, %v120_v22  ;;  %v1308_v3 = vmul.f32 %v3867_v44, %v71_v35  ;;  %v1356_v24 = vmul.f32 %v3867_v44, %v119_v54  ;;  %v67_v22 = vld [vmem:[%s5391_s5 + $0x18] sm:$0xff]  ;;  %v5479_v35 = vld [vmem:[#allocation11_spill] sm:$0xff] }
  0xe5   :  { %v4067_v27 = vsel %vm323_vm1, %v3808_v62, %v3928_v60  ;;  %2834 = vmatpush3.msra.mxu0 %v1631_v18  ;;  %3134 = vmatpush3.msra.mxu1 %v4038_v32  ;;  %v1645_v52 = vsel %vm323_vm1, %v1325_v11, %v3690_v13  ;;  %v1323_v4 = vmul.f32 %v3892_v1, %v86_v59  ;;  %v5470_v62 = vld [vmem:[#allocation2_spill] sm:$0xff]  ;;  %v82_v18 = vld [vmem:[%s5391_s5 + $0x90] sm:$0xff] }
  0xe6   :  { %5468 = vst [vmem:[#allocation33_spill] sm:$0xff] %v4067_v27  ;;  %2835 = vmatprep.subr.mxu0 %v1646_v37  ;;  %3119 = vmatprep.subr.mxu1 %v4048_v58  ;;  %v4078_v30 = vsel %vm323_vm1, %v1357_v39, %v1542_v41  ;;  %v1629_v60 = vsel %vm323_vm1, %v1309_v43, %v5470_v62  ;;  %v84_v13 = vld [vmem:[%s5391_s5 + $0xa0] sm:$0xff]  ;;  %v5480_v43 = vld [vmem:[#allocation13_spill] sm:$0xff] }
  0xe7   :  { %5469 = vst [vmem:[#allocation34_spill] sm:$0xff] %v4078_v30  ;;  %v1307_v15 = vmul.f32 %v3892_v1, %v70_v49  ;;  %2836 = vmatpush3.msra.mxu0 %v1630_v20  ;;  %3135 = vmatpush3.msra.mxu1 %v4067_v27  ;;  %v1644_v56 = vsel %vm323_vm1, %v1324_v48, %v5471_v47  ;;  %v5477_v37 = vld [vmem:[#allocation10_spill] sm:$0xff]  ;;  %v66_v20 = vld [vmem:[%s5391_s5 + $0x10] sm:$0xff]  ;;  %v5481_v48 = vld [vmem:[#allocation15_spill] sm:$0xff] }
  0xe8   :  { %v1322_v17 = vmul.f32 %v3791_v57, %v85_v23  ;;  %v4094_v21 = vsel %vm323_vm1, %v1356_v24, %v1540_v31  ;;  %v4097_v38 = vsel %vm323_vm1, %v1341_v29, %v1510_v36  ;;  %2837 = vmatprep.subr.mxu0 %v1645_v52  ;;  %3120 = vmatprep.subr.mxu1 %v4078_v30  ;;  %v5482_v23 = vld [vmem:[#allocation19_spill] sm:$0xff]  ;;  %v5484_v47 = vld [vmem:[#allocation4_spill] sm:$0xff] }
  0xe9   :  { %5472 = vst [vmem:[#allocation2_spill] sm:$0xff] %v4094_v21  ;;  %5473 = vst [vmem:[#allocation5_spill] sm:$0xff] %v4097_v38  ;;  %v1628_v14 = vsel %vm323_vm1, %v1308_v3, %v5474_v2  ;;  %v1306_v34 = vmul.f32 %v3791_v57, %v69_v19  ;;  %2838 = vmatpush3.msra.mxu0 %v1629_v60  ;;  %3136 = vmatpush3.msra.mxu1 %v4097_v38  ;;  %v81_v3 = vld [vmem:[%s5391_s5 + $0x88] sm:$0xff]  ;;  %v5483_v19 = vld [vmem:[#allocation17_spill] sm:$0xff] }
  0xea   :  { %v1643_v16 = vsel %vm323_vm1, %v1323_v4, %v5475_v28  ;;  %v1321_v29 = vmul.f32 %v3821_v7, %v84_v13  ;;  %2839 = vmatprep.subr.mxu0 %v1644_v56  ;;  %v1627_v41 = vsel %vm323_vm1, %v1307_v15, %v5476_v0  ;;  %v1305_v9 = vmul.f32 %v3821_v7, %v68_v6  ;;  %v65_v36 = vld [vmem:[%s5391_s5 + $0x8] sm:$0xff]  ;;  %v80_v4 = vld [vmem:[%s5391_s5 + $0x80] sm:$0xff]  ;;  %v5489_v0 = vld [vmem:[#allocation16_spill] sm:$0xff] }
  0xeb   :  { %3121 = vmatprep.subr.mxu1 %v4094_v21  ;;  %2840 = vmatpush3.msra.mxu0 %v1628_v14  ;;  %v1642_v53 = vsel %vm323_vm1, %v1322_v17, %v5477_v37  ;;  %v1320_v11 = vmul.f32 %v5478_v46, %v83_v5  ;;  %v1626_v54 = vsel %vm323_vm1, %v1306_v34, %v5479_v35  ;;  %v64_v60 = vld [vmem:[%s5391_s5] sm:$0xff]  ;;  %v5486_v34 = vld [vmem:[#allocation9_spill] sm:$0xff]  ;;  %v3347_v37 = vmov 12  }
  0xec   :  { %2841 = vmatprep.subr.mxu0 %v1643_v16  ;;  %v1641_v59 = vsel %vm323_vm1, %v1321_v29, %v5480_v43  ;;  %v1625_v49 = vsel %vm323_vm1, %v1305_v9, %v5481_v48  ;;  %v1304_v39 = vmul.f32 %v5478_v46, %v67_v22  ;;  %v1319_v24 = vmul.f32 %v3769_v50, %v82_v18  ;;  %v5485_v6 = vld [vmem:[#allocation6_spill] sm:$0xff] }
  0xed   :  { %2842 = vmatpush3.msra.mxu0 %v1627_v41  ;;  %v1640_v31 = vsel %vm323_vm1, %v1320_v11, %v5482_v23  ;;  %v1303_v52 = vmul.f32 %v3769_v50, %v66_v20  ;;  %v1318_v62 = vmul.f32 %v5483_v19, %v81_v3  ;;  %v1302_v13 = vmul.f32 %v5483_v19, %v65_v36  ;;  %v5488_v16 = vld [vmem:[#allocation14_spill] sm:$0xff] }
  0xee   :  { %2843 = vmatprep.subr.mxu0 %v1642_v53  ;;  %v1624_v15 = vsel %vm323_vm1, %v1304_v39, %v3922_v51  ;;  %v1639_v56 = vsel %vm323_vm1, %v1319_v24, %v5484_v47  ;;  %v1317_v17 = vmul.f32 %v3754_v45, %v80_v4  ;;  %v1301_v14 = vmul.f32 %v3754_v45, %v64_v60  ;;  %v5487_v51 = vld [vmem:[#allocation12_spill] sm:$0xff] }
  0xef   :  { %2844 = vmatpush3.msra.mxu0 %v1626_v54  ;;  %v1623_v2 = vsel %vm323_vm1, %v1303_v52, %v5485_v6  ;;  %v1638_v5 = vsel %vm323_vm1, %v1318_v62, %v5486_v34  ;;  %v1622_v28 = vsel %vm323_vm1, %v1302_v13, %v5487_v51  ;;  %v3348_v53 = vmov 11   ;;  %v182_v47 = vld [vmem:[%s5387_s6 + $0x1b0] sm:$0xff]  ;;  %v181_v6 = vld [vmem:[%s5387_s6 + $0x1a8] sm:$0xff]  ;;  %v180_v34 = vld [vmem:[%s5387_s6 + $0x1a0] sm:$0xff] }
  0xf0   :  { %2845 = vmatprep.subr.mxu0 %v1641_v59  ;;  %v1637_v29 = vsel %vm323_vm1, %v1317_v17, %v5488_v16  ;;  %v1621_v41 = vsel %vm323_vm1, %v1301_v14, %v5489_v0  ;;  %v5490_v22 = vmov 9   ;;  %v3350_v35 = vmov 15   ;;  %v167_v16 = vld [vmem:[%s5387_s6 + $0x138] sm:$0xff] }
  0xf1   :  { %2846 = vmatpush3.msra.mxu0 %v1625_v49  ;;  %v5407_v54 = vmov 8   ;;  %v3352_v18 = vmov 14   ;;  %v5491_v43 = vmov 10  }
  0xf2   :  { %2847 = vmatprep.subr.mxu0 %v1640_v31 }
  0xf3   :  { %2848 = vmatpush3.msra.mxu0 %v1624_v15 }
  0xf4   :  { %2849 = vmatprep.subr.mxu0 %v1639_v56 }
  0xf5   :  { %2850 = vmatpush3.msra.mxu0 %v1623_v2 }
  0xf6   :  { %2851 = vmatprep.subr.mxu0 %v1638_v5 }
  0xf7   :  { %2852 = vmatpush3.msra.mxu0 %v1622_v28  ;;  %v179_v28 = vld [vmem:[%s5387_s6 + $0x198] sm:$0xff] }
  0xf8   :  { %2853 = vmatprep.subr.mxu0 %v1637_v29  ;;  %v178_v29 = vld [vmem:[%s5387_s6 + $0x190] sm:$0xff] }
  0xf9   :  { %2854 = vmatpush3.msra.mxu0 %v1621_v41 }
  0xfa   :  { %2879 = vmatprep.subr.mxu0 %v3912_v12  ;;  %v3349_v12 = vmov 13  }
 0x18b   :  { %v4168_v9 = vpop.f32.mrf.mxu1 }
 0x18c   :  { %602 = vperm.xlu0 %3161, %v4168_v9   ;;  %550 = vperm.xlu1 %3156, %v4168_v9  }
 0x18d   :  { %v4176_v11 = vpop.f32.mrf.mxu1 }
 0x18f   :  { %v4198_v59 = vpop.f32.mrf.mxu1 }
 0x190   :  { %3162 = vset.pattern.permute.xlu0 %v3347_v37  ;;  %3157 = vset.pattern.permute.xlu1 %v3348_v53 }
 0x191   :  { %706 = vperm.xlu0 %3162, %v4168_v9   ;;  %654 = vperm.xlu1 %3157, %v4168_v9   ;;  %v4212_v20 = vpop.f32.mrf.mxu1 }
 0x193   :  { %v4234_v48 = vpop.f32.mrf.mxu1 }
 0x195   :  { %3164 = vset.pattern.permute.xlu0 %v5490_v22  ;;  %3158 = vset.pattern.permute.xlu1 %v3349_v12  ;;  %v4256_v49 = vpop.f32.mrf.mxu1 }
 0x196   :  { %758 = vperm.xlu1 %3158, %v4168_v9   ;;  %546 = vperm.xlu0 %3164, %v4176_v11  }
 0x199   :  { %v4266_v39 = vpop.f32.mrf.mxu1 }
 0x19a   :  { %3159 = vset.pattern.permute.xlu1 %v3350_v35  ;;  %3165 = vset.pattern.permute.xlu0 %v3348_v53 }
 0x19b   :  { %862 = vperm.xlu1 %3159, %v4168_v9   ;;  %650 = vperm.xlu0 %3165, %v4176_v11   ;;  %v4308_v60 = vpop.f32.mrf.mxu1 }
 0x19f   :  { %3160 = vset.pattern.permute.xlu1 %v5407_v54  ;;  %3167 = vset.pattern.permute.xlu0 %v3350_v35 }
 0x1a0   :  { %492 = vperm.xlu1 %3160, %v4168_v9   ;;  %858 = vperm.xlu0 %3167, %v4176_v11  }
 0x1a4   :  { %3163 = vset.pattern.permute.xlu1 %v3352_v18  ;;  %3168 = vset.pattern.permute.xlu0 %v5407_v54 }
 0x1a5   :  { %810 = vperm.xlu1 %3163, %v4168_v9   ;;  %487 = vperm.xlu0 %3168, %v4176_v11  }
 0x1a9   :  { %3166 = vset.pattern.permute.xlu1 %v3349_v12  ;;  %3169 = vset.pattern.permute.xlu0 %v5491_v43 }
 0x1aa   :  { %754 = vperm.xlu1 %3166, %v4176_v11   ;;  %598 = vperm.xlu0 %3169, %v4176_v11  }
 0x1ae   :  { %3173 = vset.pattern.permute.xlu1 %v3348_v53  ;;  %3170 = vset.pattern.permute.xlu0 %v3347_v37 }
 0x1af   :  { %702 = vperm.xlu0 %3170, %v4176_v11   ;;  %662 = vperm.xlu1 %3173, %v4198_v59  }
 0x1b3   :  { %3171 = vset.pattern.permute.xlu0 %v3352_v18  ;;  %3176 = vset.pattern.permute.xlu1 %v5407_v54 }
 0x1b4   :  { %806 = vperm.xlu0 %3171, %v4176_v11   ;;  %502 = vperm.xlu1 %3176, %v4198_v59  }
 0x1b8   :  { %3172 = vset.pattern.permute.xlu0 %v5490_v22  ;;  %3179 = vset.pattern.permute.xlu1 %v3352_v18 }
 0x1b9   :  { %818 = vperm.xlu1 %3179, %v4198_v59   ;;  %558 = vperm.xlu0 %3172, %v4198_v59  }
 0x1bd   :  { %3180 = vset.pattern.permute.xlu1 %v5490_v22  ;;  %3174 = vset.pattern.permute.xlu0 %v3349_v12 }
 0x1be   :  { %766 = vperm.xlu0 %3174, %v4198_v59   ;;  %554 = vperm.xlu1 %3180, %v4212_v20  }
 0x1c2   :  { %3175 = vset.pattern.permute.xlu0 %v3350_v35  ;;  %3182 = vset.pattern.permute.xlu1 %v3349_v12 }
 0x1c3   :  { %870 = vperm.xlu0 %3175, %v4198_v59   ;;  %762 = vperm.xlu1 %3182, %v4212_v20  }
 0x1c7   :  { %3177 = vset.pattern.permute.xlu0 %v5491_v43  ;;  %3183 = vset.pattern.permute.xlu1 %v3350_v35 }
 0x1c8   :  { %610 = vperm.xlu0 %3177, %v4198_v59   ;;  %866 = vperm.xlu1 %3183, %v4212_v20  }
 0x1cc   :  { %3178 = vset.pattern.permute.xlu0 %v3347_v37  ;;  %3185 = vset.pattern.permute.xlu1 %v5491_v43 }
 0x1cd   :  { %714 = vperm.xlu0 %3178, %v4198_v59   ;;  %606 = vperm.xlu1 %3185, %v4212_v20  }
 0x1d1   :  { %3181 = vset.pattern.permute.xlu0 %v3348_v53  ;;  %3187 = vset.pattern.permute.xlu1 %v3352_v18 }
 0x1d2   :  { %658 = vperm.xlu0 %3181, %v4212_v20   ;;  %814 = vperm.xlu1 %3187, %v4212_v20  }
 0x1d6   :  { %3184 = vset.pattern.permute.xlu0 %v5407_v54  ;;  %3188 = vset.pattern.permute.xlu1 %v5490_v22 }
 0x1d7   :  { %497 = vperm.xlu0 %3184, %v4212_v20   ;;  %566 = vperm.xlu1 %3188, %v4234_v48  }
 0x1db   :  { %3186 = vset.pattern.permute.xlu0 %v3347_v37  ;;  %3190 = vset.pattern.permute.xlu1 %v3349_v12 }
 0x1dc   :  { %710 = vperm.xlu0 %3186, %v4212_v20   ;;  %774 = vperm.xlu1 %3190, %v4234_v48  }
 0x1e0   :  { %3189 = vset.pattern.permute.xlu0 %v3348_v53  ;;  %3191 = vset.pattern.permute.xlu1 %v3350_v35 }
 0x1e1   :  { %670 = vperm.xlu0 %3189, %v4234_v48   ;;  %878 = vperm.xlu1 %3191, %v4234_v48  }
 0x1e5   :  { %3193 = vset.pattern.permute.xlu0 %v5491_v43  ;;  %3192 = vset.pattern.permute.xlu1 %v5407_v54 }
 0x1e6   :  { %618 = vperm.xlu0 %3193, %v4234_v48   ;;  %512 = vperm.xlu1 %3192, %v4234_v48  }
 0x1ea   :  { %3194 = vset.pattern.permute.xlu0 %v3347_v37  ;;  %3195 = vset.pattern.permute.xlu1 %v3352_v18 }
 0x1eb   :  { %722 = vperm.xlu0 %3194, %v4234_v48   ;;  %826 = vperm.xlu1 %3195, %v4234_v48  }
 0x1ef   :  { %3201 = vset.pattern.permute.xlu0 %v5491_v43  ;;  %3196 = vset.pattern.permute.xlu1 %v5490_v22 }
 0x1f0   :  { %614 = vperm.xlu0 %3201, %v4256_v49   ;;  %562 = vperm.xlu1 %3196, %v4256_v49  }
 0x1f4   :  { %3202 = vset.pattern.permute.xlu0 %v3347_v37  ;;  %3197 = vset.pattern.permute.xlu1 %v3348_v53 }
 0x1f5   :  { %718 = vperm.xlu0 %3202, %v4256_v49   ;;  %666 = vperm.xlu1 %3197, %v4256_v49  }
 0x1f9   :  { %3204 = vset.pattern.permute.xlu0 %v5490_v22  ;;  %3198 = vset.pattern.permute.xlu1 %v3349_v12 }
 0x1fa   :  { %770 = vperm.xlu1 %3198, %v4256_v49   ;;  %574 = vperm.xlu0 %3204, %v4266_v39  }
 0x1fe   :  { %3199 = vset.pattern.permute.xlu1 %v3350_v35  ;;  %3205 = vset.pattern.permute.xlu0 %v3348_v53 }
 0x1ff   :  { %874 = vperm.xlu1 %3199, %v4256_v49   ;;  %678 = vperm.xlu0 %3205, %v4266_v39  }
 0x203   :  { %3200 = vset.pattern.permute.xlu1 %v5407_v54  ;;  %3206 = vset.pattern.permute.xlu0 %v3349_v12 }
 0x204   :  { %507 = vperm.xlu1 %3200, %v4256_v49   ;;  %782 = vperm.xlu0 %3206, %v4266_v39  }
 0x207   :  { %v4280_v3 = vpop.permute.xlu0 %602  ;;  %v4282_v23 = vpop.permute.xlu1 %550 }
 0x208   :  { %3203 = vset.pattern.permute.xlu1 %v3352_v18  ;;  %3207 = vset.pattern.permute.xlu0 %v3350_v35 }
 0x209   :  { %822 = vperm.xlu1 %3203, %v4256_v49   ;;  %886 = vperm.xlu0 %3207, %v4266_v39  }
 0x20c   :  { %v4288_v31 = vpop.permute.xlu0 %706  ;;  %v4290_v24 = vpop.permute.xlu1 %654 }
 0x20d   :  { %3208 = vset.pattern.permute.xlu1 %v5407_v54  ;;  %3209 = vset.pattern.permute.xlu0 %v5491_v43 }
 0x20e   :  { %522 = vperm.xlu1 %3208, %v4266_v39   ;;  %626 = vperm.xlu0 %3209, %v4266_v39  }
 0x211   :  { %v4296_v36 = vpop.permute.xlu1 %758  ;;  %v4298_v52 = vpop.permute.xlu0 %546 }
 0x212   :  { %3211 = vset.pattern.permute.xlu1 %v3352_v18  ;;  %3210 = vset.pattern.permute.xlu0 %v3347_v37 }
 0x213   :  { %834 = vperm.xlu1 %3211, %v4266_v39   ;;  %730 = vperm.xlu0 %3210, %v4266_v39  }
 0x216   :  { %v4304_v4 = vpop.permute.xlu1 %862  ;;  %v4306_v62 = vpop.permute.xlu0 %650 }
 0x217   :  { %3213 = vset.pattern.permute.xlu1 %v3348_v53  ;;  %3212 = vset.pattern.permute.xlu0 %v5490_v22 }
 0x218   :  { %674 = vperm.xlu1 %3213, %v4308_v60   ;;  %570 = vperm.xlu0 %3212, %v4308_v60  }
 0x21b   :  { %v4314_v15 = vpop.permute.xlu1 %492  ;;  %v4316_v13 = vpop.permute.xlu0 %858 }
 0x21c   :  { %3216 = vset.pattern.permute.xlu1 %v5407_v54  ;;  %3214 = vset.pattern.permute.xlu0 %v3349_v12  ;;  %v165_v12 = vld [vmem:[%s5387_s6 + $0x128] sm:$0xff] }
 0x21d   :  { %517 = vperm.xlu1 %3216, %v4308_v60   ;;  %778 = vperm.xlu0 %3214, %v4308_v60  }
 0x220   :  { %v4325_v56 = vpop.permute.xlu1 %810  ;;  %v4327_v17 = vpop.permute.xlu0 %487 }
 0x221   :  { %1537 = vrot.lane.b32.xlu1 %v182_v47, %s3344_s23  ;;  %3215 = vset.pattern.permute.xlu0 %v3350_v35  ;;  %v163_v47 = vld [vmem:[%s5387_s6 + $0x118] sm:$0xff] }
 0x222   :  { %882 = vperm.xlu0 %3215, %v4308_v60   ;;  %3219 = vset.pattern.permute.xlu1 %v3352_v18 }
 0x225   :  { %v4336_v2 = vpop.permute.xlu1 %754  ;;  %v4338_v14 = vpop.permute.xlu0 %598  ;;  %1535 = vrot.lane.b32.xlu1 %v181_v6, %s3344_s23 }
 0x226   :  { %3217 = vset.pattern.permute.xlu0 %v5491_v43  ;;  %v164_v43 = vld [vmem:[%s5387_s6 + $0x120] sm:$0xff] }
 0x227   :  { %622 = vperm.xlu0 %3217, %v4308_v60  }
 0x229   :  { %1533 = vrot.lane.b32.xlu1 %v180_v34, %s3344_s23 }
 0x22a   :  { %v4347_v5 = vpop.permute.xlu0 %702  ;;  %v4349_v51 = vpop.permute.xlu1 %662 }
 0x22b   :  { %3218 = vset.pattern.permute.xlu0 %v3347_v37  ;;  %v166_v37 = vld [vmem:[%s5387_s6 + $0x130] sm:$0xff] }
 0x22c   :  { %726 = vperm.xlu0 %3218, %v4308_v60  }
 0x22d   :  { %1531 = vrot.lane.b32.xlu1 %v179_v28, %s3344_s23  ;;  %v162_v28 = vld [vmem:[%s5387_s6 + $0x110] sm:$0xff] }
 0x22f   :  { %v4363_v0 = vpop.permute.xlu0 %806  ;;  %v4365_v41 = vpop.permute.xlu1 %502 }
 0x230   :  { %1507 = vrot.lane.b32.xlu0 %v167_v16, %s3344_s23 }
 0x231   :  { %1529 = vrot.lane.b32.xlu1 %v178_v29, %s3344_s23 }
 0x234   :  { %v4372_v53 = vpop.permute.xlu1 %818  ;;  %v4374_v22 = vpop.permute.xlu0 %558  ;;  %1505 = vrot.lane.b32.xlu0 %v166_v37, %s3344_s23 }
 0x235   :  { %5492 = vst [vmem:[#allocation3_spill] sm:$0xff] %v4372_v53  ;;  %830 = vperm.xlu1 %3219, %v4308_v60   ;;  %v117_v53 = vld [vmem:[%s5391_s5 + $0x1a8] sm:$0xff] }
 0x238   :  { %1503 = vrot.lane.b32.xlu0 %v165_v12, %s3344_s23 }
 0x239   :  { %v4382_v35 = vpop.permute.xlu0 %766  ;;  %v4384_v18 = vpop.permute.xlu1 %554 }
 0x23c   :  { %1501 = vrot.lane.b32.xlu0 %v164_v43, %s3344_s23 }
 0x23e   :  { %v4393_v6 = vpop.permute.xlu0 %870  ;;  %v4395_v34 = vpop.permute.xlu1 %762 }
 0x240   :  { %1499 = vrot.lane.b32.xlu0 %v163_v47, %s3344_s23 }
 0x243   :  { %v4401_v16 = vpop.permute.xlu0 %610  ;;  %v4403_v29 = vpop.permute.xlu1 %866 }
 0x244   :  { %1497 = vrot.lane.b32.xlu0 %v162_v28, %s3344_s23 }
 0x248   :  { %v4406_v37 = vpop.permute.xlu0 %714  ;;  %v4408_v12 = vpop.permute.xlu1 %606 }
 0x249   :  { %5493 = vst [vmem:[#allocation7_spill] sm:$0xff] %v4406_v37  ;;  %v1354_v37 = vmul.f32 %v3791_v57, %v117_v53 }
 0x24d   :  { %v4410_v43 = vpop.permute.xlu0 %658  ;;  %v4412_v54 = vpop.permute.xlu1 %814 }
 0x24e   :  { %5494 = vst [vmem:[#allocation8_spill] sm:$0xff] %v4412_v54 }
 0x252   :  { %v4414_v45 = vpop.permute.xlu0 %497  ;;  %v4416_v47 = vpop.permute.xlu1 %566 }
 0x253   :  { %5495 = vst [vmem:[#allocation10_spill] sm:$0xff] %v4414_v45 }
 0x257   :  { %v4418_v21 = vpop.permute.xlu0 %710  ;;  %v4420_v38 = vpop.permute.xlu1 %774 }
 0x258   :  { %5496 = vst [vmem:[#allocation20_spill] sm:$0xff] %v4418_v21  ;;  %v118_v21 = vld [vmem:[%s5391_s5 + $0x1b0] sm:$0xff] }
 0x25c   :  { %v4422_v30 = vpop.permute.xlu0 %670  ;;  %v4424_v27 = vpop.permute.xlu1 %878 }
 0x25e   :  { %453 = vxpose.xlu1.b32.start [1/8] (short) (narrow) %v4176_v11, 8 }
 0x261   :  { %v4427_v28 = vpop.permute.xlu0 %618  ;;  %v4429_v58 = vpop.permute.xlu1 %512 }
 0x262   :  { %5497 = vst [vmem:[#allocation11_spill] sm:$0xff] %v4429_v58  ;;  %454 = vxpose.xlu1.b32.cont [2/8] (short) (narrow) %v4168_v9, 8 }
 0x266   :  { %v4432_v32 = vpop.permute.xlu0 %722  ;;  %v4434_v55 = vpop.permute.xlu1 %826  ;;  %455 = vxpose.xlu1.b32.cont [3/8] (short) (narrow) %v4212_v20, 8 }
 0x267   :  { %5498 = vst [vmem:[#allocation13_spill] sm:$0xff] %v4432_v32 }
 0x26a   :  { %456 = vxpose.xlu1.b32.cont [4/8] (short) (narrow) %v4198_v59, 8 }
 0x26b   :  { %v4438_v8 = vpop.permute.xlu0 %614  ;;  %v4440_v33 = vpop.permute.xlu1 %562 }
 0x26e   :  { %457 = vxpose.xlu1.b32.cont [5/8] (short) (narrow) %v4256_v49, 8 }
 0x270   :  { %v4443_v11 = vpop.permute.xlu1 %666  ;;  %v4445_v25 = vpop.permute.xlu0 %718 }
 0x271   :  { %5499 = vst [vmem:[#allocation15_spill] sm:$0xff] %v4445_v25 }
 0x272   :  { %458 = vxpose.xlu1.b32.cont [6/8] (short) (narrow) %v4234_v48, 8 }
 0x275   :  { %v4448_v9 = vpop.permute.xlu1 %770  ;;  %v4450_v42 = vpop.permute.xlu0 %574 }
 0x276   :  { %459 = vxpose.xlu1.b32.cont [7/8] (short) (narrow) %v4308_v60, 8 }
 0x27a   :  { %v4453_v20 = vpop.permute.xlu1 %874  ;;  %460 = vxpose.xlu1.b32.end [8/8] (short) (narrow) %v4266_v39, 8  ;;  %v4456_v59 = vpop.permute.xlu0 %678 }
 0x27f   :  { %v4458_v26 = vpop.permute.xlu1 %507  ;;  %v4460_v49 = vpop.permute.xlu0 %782 }
 0x280   :  { %5500 = vst [vmem:[#allocation19_spill] sm:$0xff] %v4458_v26 }
 0x284   :  { %v4462_v63 = vpop.permute.xlu1 %822  ;;  %v4464_v10 = vpop.permute.xlu0 %886 }
 0x285   :  { %5501 = vst [vmem:[#allocation4_spill] sm:$0xff] %v4462_v63 }
 0x289   :  { %v4466_v48 = vpop.permute.xlu0 %626  ;;  %v4468_v61 = vpop.permute.xlu1 %522 }
 0x28a   :  { %5502 = vst [vmem:[#allocation6_spill] sm:$0xff] %v4466_v48  ;;  %5503 = vst [vmem:[#allocation9_spill] sm:$0xff] %v4468_v61 }
 0x28e   :  { %v4470_v40 = vpop.permute.xlu0 %730  ;;  %v4472_v60 = vpop.permute.xlu1 %834 }
 0x28f   :  { %5504 = vst [vmem:[#allocation12_spill] sm:$0xff] %v4470_v40  ;;  %5505 = vst [vmem:[#allocation14_spill] sm:$0xff] %v4472_v60  ;;  %v103_v40 = vld [vmem:[%s5391_s5 + $0x138] sm:$0xff] }
 0x290   :  { %v1340_v45 = vmul.f32 %v3867_v44, %v103_v40 }
 0x293   :  { %v4474_v19 = vpop.permute.xlu0 %570  ;;  %v4476_v39 = vpop.permute.xlu1 %674 }
 0x298   :  { %v4478_v25 = vpop.permute.xlu0 %778  ;;  %v4480_v26 = vpop.permute.xlu1 %517 }
 0x299   :  { %5506 = vst [vmem:[#allocation16_spill] sm:$0xff] %v4480_v26  ;;  %v1355_v26 = vmul.f32 %v3892_v1, %v118_v21 }
 0x29c   :  { %v1538_v63 = vpop.permute.xlu1 %1537 }
 0x29d   :  { %v4482_v32 = vpop.permute.xlu0 %882  ;;  %v4507_v61 = vsel %vm323_vm1, %v1355_v26, %v1538_v63  ;;  %v116_v63 = vld [vmem:[%s5391_s5 + $0x1a0] sm:$0xff] }
 0x29e   :  { %5509 = vst [vmem:[#allocation37_spill] sm:$0xff] %v4507_v61  ;;  %v1353_v53 = vmul.f32 %v3821_v7, %v116_v63 }
 0x2a0   :  { %v1536_v54 = vpop.permute.xlu1 %1535 }
 0x2a1   :  { %v4523_v26 = vsel %vm323_vm1, %v1354_v37, %v1536_v54  ;;  %v115_v54 = vld [vmem:[%s5391_s5 + $0x198] sm:$0xff] }
 0x2a2   :  { %v4484_v58 = vpop.permute.xlu0 %622  ;;  %v1352_v63 = vmul.f32 %v5478_v46, %v115_v54 }
 0x2a3   :  { %5507 = vst [vmem:[#allocation35_spill] sm:$0xff] %v4484_v58  ;;  %v102_v58 = vld [vmem:[%s5391_s5 + $0x130] sm:$0xff] }
 0x2a4   :  { %v1534_v44 = vpop.permute.xlu1 %1533  ;;  %v1339_v40 = vmul.f32 %v3892_v1, %v102_v58 }
 0x2a5   :  { %v4539_v37 = vsel %vm323_vm1, %v1353_v53, %v1534_v44 }
 0x2a6   :  { %5511 = vst [vmem:[#allocation39_spill] sm:$0xff] %v4539_v37 }
 0x2a7   :  { %v4486_v48 = vpop.permute.xlu0 %726 }
 0x2a8   :  { %5508 = vst [vmem:[#allocation36_spill] sm:$0xff] %v4486_v48 }
 0x2ab   :  { %v1508_v60 = vpop.permute.xlu0 %1507 }
 0x2ac   :  { %v4500_v48 = vsel %vm323_vm1, %v1340_v45, %v1508_v60  ;;  %v101_v45 = vld [vmem:[%s5391_s5 + $0x128] sm:$0xff] }
 0x2ad   :  { %3137 = vmatpush3.msra.mxu1 %v4500_v48  ;;  %v1338_v1 = vmul.f32 %v3791_v57, %v101_v45 }
 0x2ae   :  { %3122 = vmatprep.subr.mxu1 %v4507_v61 }
 0x2af   :  { %v1506_v21 = vpop.permute.xlu0 %1505 }
 0x2b0   :  { %v4516_v60 = vsel %vm323_vm1, %v1339_v40, %v1506_v21  ;;  %v100_v40 = vld [vmem:[%s5391_s5 + $0x120] sm:$0xff]  ;;  %v1532_v21 = vpop.permute.xlu1 %1531 }
 0x2b1   :  { %3138 = vmatpush3.msra.mxu1 %v4516_v60  ;;  %v1337_v57 = vmul.f32 %v3821_v7, %v100_v40  ;;  %v4555_v44 = vsel %vm323_vm1, %v1352_v63, %v1532_v21 }
 0x2b2   :  { %3123 = vmatprep.subr.mxu1 %v4523_v26  ;;  %5513 = vst [vmem:[#allocation41_spill] sm:$0xff] %v4555_v44 }
 0x2b3   :  { %v1504_v58 = vpop.permute.xlu0 %1503 }
 0x2b4   :  { %v4532_v61 = vsel %vm323_vm1, %v1338_v1, %v1504_v58  ;;  %v99_v1 = vld [vmem:[%s5391_s5 + $0x118] sm:$0xff]  ;;  %v1530_v7 = vpop.permute.xlu1 %1529 }
 0x2b5   :  { %5510 = vst [vmem:[#allocation38_spill] sm:$0xff] %v4532_v61  ;;  %3139 = vmatpush3.msra.mxu1 %v4532_v61  ;;  %v114_v61 = vld [vmem:[%s5391_s5 + $0x190] sm:$0xff]  ;;  %v1336_v53 = vmul.f32 %v5478_v46, %v99_v1 }
 0x2b6   :  { %3124 = vmatprep.subr.mxu1 %v4539_v37  ;;  %v1351_v54 = vmul.f32 %v3769_v50, %v114_v61  ;;  %v525_v61 = vlaneseq }
 0x2b7   :  { %v1502_v45 = vpop.permute.xlu0 %1501 }
 0x2b8   :  { %v4548_v58 = vsel %vm323_vm1, %v1337_v57, %v1502_v45  ;;  %v98_v57 = vld [vmem:[%s5391_s5 + $0x110] sm:$0xff]  ;;  %v4568_v21 = vsel %vm323_vm1, %v1351_v54, %v1530_v7 }
 0x2b9   :  { %5512 = vst [vmem:[#allocation40_spill] sm:$0xff] %v4548_v58  ;;  %3140 = vmatpush3.msra.mxu1 %v4548_v58  ;;  %5515 = vst [vmem:[#allocation43_spill] sm:$0xff] %v4568_v21  ;;  %v1335_v63 = vmul.f32 %v3769_v50, %v98_v57 }
 0x2ba   :  { %3125 = vmatprep.subr.mxu1 %v4555_v44  ;;  %v4576_v44 = vshrl.u32 %v525_v61, 7  ;;  %v4598_v61 = vld [vmem:[%s5392_s1 + $0x8] sm:$0xff] }
 0x2bb   :  { %v1500_v40 = vpop.permute.xlu0 %1499 }
 0x2bc   :  { %v4564_v45 = vsel %vm323_vm1, %v1336_v53, %v1500_v40  ;;  %v4578_v53 = vpop.permute.xlu1 %830  ;;  %v579_v40 = vsub.s32 1, %v4576_v44  ;;  %v683_v7 = vsub.s32 3, %v4576_v44  ;;  %v787_v54 = vsub.s32 5, %v4576_v44 }
 0x2bd   :  { %5514 = vst [vmem:[#allocation42_spill] sm:$0xff] %v4564_v45  ;;  %3141 = vmatpush3.msra.mxu1 %v4564_v45 }
 0x2be   :  { %3126 = vmatprep.subr.mxu1 %v4568_v21  ;;  %v891_v21 = vsub.s32 7, %v4576_v44 }
 0x2bf   :  { %v1498_v46 = vpop.permute.xlu0 %1497 }
 0x2c0   :  { %v4573_v1 = vsel %vm323_vm1, %v1335_v63, %v1498_v46 }
 0x2c1   :  { %5516 = vst [vmem:[#allocation44_spill] sm:$0xff] %v4573_v1  ;;  %3142 = vmatpush3.msra.mxu1 %v4573_v1 }
 0x2da   :  { %v4584_v50 = vpop.trf.xlu1 }
 0x2db   :  { %v4587_v57 = vrot.slane %v4584_v50, %v579_v40  ;;  %v4590_v63 = vrot.slane %v4584_v50, %v683_v7  ;;  %v4593_v46 = vrot.slane %v4584_v50, %v787_v54  ;;  %v4605_v40 = vrot.slane %v4584_v50, %v891_v21 }
 0x2dd   :  { %v582_v1 = vadd.f32 %v4587_v57, %v4282_v23  ;;  %v686_v45 = vadd.f32 %v4590_v63, %v4290_v24  ;;  %v790_v54 = vadd.f32 %v4593_v46, %v4296_v36  ;;  %v581_v37 = vadd.f32 %v4587_v57, %v4298_v52  ;;  %v4616_v23 = vld [vmem:[%s5392_s1] sm:$0xff]  ;;  %v4629_v52 = vld [vmem:[%s5392_s1 + $0x18] sm:$0xff] }
 0x2de   :  { %v688_v36 = vadd.f32 %v4590_v63, %v4349_v51  ;;  %v4642_v51 = vld [vmem:[%s5392_s1 + $0x10] sm:$0xff] }
 0x2df   :  { %v590_v7 = vadd.f32 %v582_v1, %v4598_v61  ;;  %v694_v58 = vadd.f32 %v686_v45, %v4598_v61  ;;  %v798_v24 = vadd.f32 %v790_v54, %v4598_v61  ;;  %v589_v21 = vadd.f32 %v581_v37, %v4616_v23 }
 0x2e0   :  { %v894_v45 = vadd.f32 %v4605_v40, %v4304_v4  ;;  %v696_v1 = vadd.f32 %v688_v36, %v4629_v52  ;;  %v685_v37 = vadd.f32 %v4590_v63, %v4306_v62  ;;  %v687_v4 = vadd.f32 %v4590_v63, %v4410_v43  ;;  %v4655_v43 = vld [vmem:[%s5392_s1 + $0x28] sm:$0xff] }
 0x2e1   :  { %919 = vrot.lane.b32.xlu1 %v590_v7, %s3344_s23  ;;  %951 = vrot.lane.b32.xlu0 %v694_v58, %s3344_s23  ;;  %v690_v62 = vadd.f32 %v4590_v63, %v4422_v30  ;;  %v893_v36 = vadd.f32 %v4605_v40, %v4316_v13  ;;  %v4676_v13 = vld [vmem:[%s5392_s1 + $0x20] sm:$0xff] }
 0x2e2   :  { %v902_v58 = vadd.f32 %v894_v45, %v4598_v61  ;;  %v693_v7 = vadd.f32 %v685_v37, %v4616_v23  ;;  %v695_v54 = vadd.f32 %v687_v4, %v4642_v51  ;;  %v689_v37 = vadd.f32 %v4590_v63, %v4443_v11  ;;  %v4689_v11 = vld [vmem:[%s5392_s1 + $0x38] sm:$0xff] }
 0x2e3   :  { %v698_v45 = vadd.f32 %v690_v62, %v4655_v43  ;;  %v901_v30 = vadd.f32 %v893_v36, %v4616_v23  ;;  %v896_v62 = vadd.f32 %v4605_v40, %v4393_v6  ;;  %v587_v36 = vadd.f32 %v4587_v57, %v4474_v19  ;;  %v4710_v6 = vld [vmem:[%s5392_s1 + $0x30] sm:$0xff] }
 0x2e4   :  { %v697_v4 = vadd.f32 %v689_v37, %v4676_v13 }
 0x2e5   :  { %983 = vrot.lane.b32.xlu1 %v798_v24, %s3344_s23  ;;  %917 = vrot.lane.b32.xlu0 %v589_v21, %s3344_s23  ;;  %v789_v24 = vadd.f32 %v4593_v46, %v4336_v2  ;;  %v898_v2 = vadd.f32 %v4605_v40, %v4424_v27 }
 0x2e7   :  { %v797_v21 = vadd.f32 %v789_v24, %v4616_v23 }
 0x2e9   :  { %1015 = vrot.lane.b32.xlu1 %v902_v58, %s3344_s23  ;;  %955 = vrot.lane.b32.xlu0 %v696_v1, %s3344_s23  ;;  %v906_v58 = vadd.f32 %v898_v2, %v4655_v43  ;;  %v584_v1 = vadd.f32 %v4587_v57, %v4374_v22  ;;  %v588_v22 = vadd.f32 %v4587_v57, %v4450_v42 }
 0x2ea   :  { %v904_v42 = vadd.f32 %v896_v62, %v4629_v52  ;;  %v595_v2 = vadd.f32 %v587_v36, %v4710_v6 }
 0x2eb   :  { %v592_v27 = vadd.f32 %v584_v1, %v4629_v52  ;;  %v596_v24 = vadd.f32 %v588_v22, %v4689_v11  ;;  %v895_v1 = vadd.f32 %v4605_v40, %v4403_v29 }
 0x2ed   :  { %949 = vrot.lane.b32.xlu1 %v693_v7, %s3344_s23  ;;  %953 = vrot.lane.b32.xlu0 %v695_v54, %s3344_s23  ;;  %v792_v7 = vadd.f32 %v4593_v46, %v4382_v35  ;;  %v900_v35 = vadd.f32 %v4605_v40, %v4464_v10 }
 0x2ef   :  { %v800_v54 = vadd.f32 %v792_v7, %v4629_v52 }
 0x2f1   :  { %981 = vrot.lane.b32.xlu1 %v797_v21, %s3344_s23  ;;  %959 = vrot.lane.b32.xlu0 %v698_v45, %s3344_s23  ;;  %v908_v21 = vadd.f32 %v900_v35, %v4689_v11  ;;  %v583_v45 = vadd.f32 %v4587_v57, %v4384_v18  ;;  %v899_v18 = vadd.f32 %v4605_v40, %v4482_v32  ;;  %v631_v35 = vsub.s32 2, %v4576_v44 }
 0x2f2   :  { %v586_v32 = vadd.f32 %v4587_v57, %v4416_v47  ;;  %v793_v47 = vadd.f32 %v4593_v46, %v4448_v9  ;;  %v796_v9 = vadd.f32 %v4593_v46, %v4460_v49  ;;  %v5436_v49 = vsub.s32 0, %v4576_v44 }
 0x2f3   :  { %v591_v10 = vadd.f32 %v583_v45, %v4642_v51 }
 0x2f4   :  { %v594_v37 = vadd.f32 %v586_v32, %v4655_v43  ;;  %v801_v22 = vadd.f32 %v793_v47, %v4676_v13 }
 0x2f5   :  { %1013 = vrot.lane.b32.xlu1 %v901_v30, %s3344_s23  ;;  %1023 = vrot.lane.b32.xlu0 %v906_v58, %s3344_s23  ;;  %v791_v30 = vadd.f32 %v4593_v46, %v4395_v34  ;;  %v907_v58 = vadd.f32 %v899_v18, %v4710_v6  ;;  %v903_v34 = vadd.f32 %v895_v1, %v4642_v51 }
 0x2f7   :  { %v799_v19 = vadd.f32 %v791_v30, %v4642_v51 }
 0x2f9   :  { %923 = vrot.lane.b32.xlu1 %v592_v27, %s3344_s23  ;;  %957 = vrot.lane.b32.xlu0 %v697_v4, %s3344_s23  ;;  %v794_v27 = vadd.f32 %v4593_v46, %v4420_v38  ;;  %v585_v4 = vadd.f32 %v4587_v57, %v4440_v33  ;;  %v897_v38 = vadd.f32 %v4605_v40, %v4453_v20 }
 0x2fa   :  { %v692_v33 = vadd.f32 %v4590_v63, %v4456_v59  ;;  %v691_v20 = vadd.f32 %v4590_v63, %v4476_v39  ;;  %v795_v59 = vadd.f32 %v4593_v46, %v4478_v25  ;;  %v4772_v39 = vrot.slane %v4584_v50, %v5436_v49  ;;  %v5531_v49 = vld [vmem:[#allocation12_spill] sm:$0xff] }
 0x2fb   :  { %v802_v29 = vadd.f32 %v794_v27, %v4655_v43  ;;  %v593_v7 = vadd.f32 %v585_v4, %v4676_v13  ;;  %v4775_v63 = vrot.slane %v4584_v50, %v631_v35  ;;  %v839_v25 = vsub.s32 6, %v4576_v44 }
 0x2fc   :  { %v700_v57 = vadd.f32 %v692_v33, %v4689_v11  ;;  %v699_v40 = vadd.f32 %v691_v20, %v4710_v6  ;;  %v803_v62 = vadd.f32 %v795_v59, %v4710_v6  ;;  %v529_v4 = vadd.f32 %v4772_v39, %v4327_v17 }
 0x2fd   :  { %987 = vrot.lane.b32.xlu1 %v800_v54, %s3344_s23  ;;  %931 = vrot.lane.b32.xlu0 %v596_v24, %s3344_s23  ;;  %v905_v54 = vadd.f32 %v897_v38, %v4676_v13  ;;  %v804_v24 = vadd.f32 %v796_v9, %v4689_v11  ;;  %v634_v45 = vadd.f32 %v4775_v63, %v4280_v3 }
 0x2fe   :  { %v4786_v36 = vrot.slane %v4584_v50, %v839_v25  ;;  %v633_v47 = vadd.f32 %v4775_v63, %v4338_v14  ;;  %v537_v17 = vadd.f32 %v529_v4, %v4616_v23 }
 0x300   :  { %v841_v25 = vadd.f32 %v4786_v36, %v4363_v0 }
 0x301   :  { %1019 = vrot.lane.b32.xlu1 %v904_v42, %s3344_s23  ;;  %1027 = vrot.lane.b32.xlu0 %v908_v21, %s3344_s23  ;;  %v735_v42 = vsub.s32 4, %v4576_v44  ;;  %v530_v21 = vadd.f32 %v4772_v39, %v4314_v15 }
 0x303   :  { %v4779_v46 = vrot.slane %v4584_v50, %v735_v42  ;;  %v842_v50 = vadd.f32 %v4786_v36, %v4325_v56 }
 0x305   :  { %921 = vrot.lane.b32.xlu1 %v591_v10, %s3344_s23  ;;  %929 = vrot.lane.b32.xlu0 %v595_v2, %s3344_s23  ;;  %v538_v10 = vadd.f32 %v530_v21, %v4598_v61  ;;  %v642_v2 = vadd.f32 %v634_v45, %v4598_v61  ;;  %v738_v30 = vadd.f32 %v4779_v46, %v4288_v31 }
 0x306   :  { %v737_v14 = vadd.f32 %v4779_v46, %v4347_v5 }
 0x307   :  { %v746_v3 = vadd.f32 %v738_v30, %v4598_v61  ;;  %v849_v30 = vadd.f32 %v841_v25, %v4616_v23 }
 0x308   :  { %v745_v42 = vadd.f32 %v737_v14, %v4616_v23  ;;  %v846_v14 = vadd.f32 %v4786_v36, %v4434_v55  ;;  %v5520_v55 = vld [vmem:[#allocation14_spill] sm:$0xff] }
 0x309   :  { %985 = vrot.lane.b32.xlu1 %v799_v19, %s3344_s23  ;;  %1025 = vrot.lane.b32.xlu0 %v907_v58, %s3344_s23 }
 0x30d   :  { %1017 = vrot.lane.b32.xlu1 %v903_v34, %s3344_s23 }
 0x311   :  { %927 = vrot.lane.b32.xlu1 %v594_v37, %s3344_s23 }
 0x315   :  { %991 = vrot.lane.b32.xlu1 %v802_v29, %s3344_s23 }
 0x319   :  { %925 = vrot.lane.b32.xlu1 %v593_v7, %s3344_s23  ;;  %v850_v7 = vadd.f32 %v842_v50, %v4598_v61  ;;  %v641_v61 = vadd.f32 %v633_v47, %v4616_v23  ;;  %v161_v47 = vld [vmem:[%s5387_s6 + $0x108] sm:$0xff] }
 0x31d   :  { %989 = vrot.lane.b32.xlu1 %v801_v22, %s3344_s23 }
 0x321   :  { %1021 = vrot.lane.b32.xlu1 %v905_v54, %s3344_s23 }
 0x325   :  { %963 = vrot.lane.b32.xlu1 %v700_v57, %s3344_s23 }
 0x329   :  { %995 = vrot.lane.b32.xlu1 %v804_v24, %s3344_s23 }
 0x32d   :  { %961 = vrot.lane.b32.xlu1 %v699_v40, %s3344_s23 }
 0x331   :  { %993 = vrot.lane.b32.xlu1 %v803_v62, %s3344_s23 }
 0x353   :  { %v920_v18 = vpop.permute.xlu1 %919  ;;  %v952_v19 = vpop.permute.xlu0 %951 }
 0x354   :  { %v1038_v58 = vsel %vm323_vm1, %v538_v10, %v920_v18  ;;  %v1046_v1 = vsel %vm323_vm1, %v642_v2, %v952_v19 }
 0x355   :  { %v1105_v15 = vmul.f32 0.2, %v1038_v58  ;;  %v1106_v34 = vmul.f32 0.2, %v1046_v1  ;;  %vm1073_vm2 = vcmp.gt.f32.partialorder %v1038_v58, 0.0  ;;  %vm1074_vm3 = vcmp.gt.f32.partialorder %v1046_v1, 0.0 }
 0x357   :  { %v984_v32 = vpop.permute.xlu1 %983  ;;  %v4798_v27 = vsel %vm1073_vm2, %v1038_v58, %v1105_v15  ;;  %v4800_v31 = vsel %vm1074_vm3, %v1046_v1, %v1106_v34  ;;  %v918_v33 = vpop.permute.xlu0 %917 }
 0x358   :  { %v1054_v37 = vsel %vm323_vm1, %v746_v3, %v984_v32  ;;  %v1170_v38 = vmax.f32 %v4798_v27, %v4800_v31  ;;  %v1037_v40 = vsel %vm323_vm1, %v537_v17, %v918_v33  ;;  %v177_v33 = vld [vmem:[%s5387_s6 + $0x188] sm:$0xff] }
 0x359   :  { %vm1075_vm4 = vcmp.gt.f32.partialorder %v1054_v37, 0.0  ;;  %v1107_v29 = vmul.f32 0.2, %v1054_v37  ;;  %v1101_v21 = vmul.f32 0.2, %v1037_v40  ;;  %vm1069_vm7 = vcmp.gt.f32.partialorder %v1037_v40, 0.0 }
 0x35b   :  { %v4807_v22 = vsel %vm1075_vm4, %v1054_v37, %v1107_v29  ;;  %v1016_v56 = vpop.permute.xlu1 %1015  ;;  %v4829_v18 = vsel %vm1069_vm7, %v1037_v40, %v1101_v21  ;;  %v956_v15 = vpop.permute.xlu0 %955  ;;  %v637_v40 = vadd.f32 %v4775_v63, %v4438_v8  ;;  %v848_v21 = vadd.f32 %v4786_v36, %v5520_v55  ;;  %v5526_v55 = vld [vmem:[#allocation13_spill] sm:$0xff] }
 0x35c   :  { %v1062_v54 = vsel %vm323_vm1, %v850_v7, %v1016_v56  ;;  %v1171_v9 = vmax.f32 %v1170_v38, %v4807_v22 }
 0x35d   :  { %vm1076_vm5 = vcmp.gt.f32.partialorder %v1062_v54, 0.0  ;;  %v1108_v57 = vmul.f32 0.2, %v1062_v54 }
 0x35f   :  { %v4817_v24 = vsel %vm1076_vm5, %v1062_v54, %v1108_v57  ;;  %v950_v20 = vpop.permute.xlu1 %949  ;;  %v4840_v37 = vpop.permute.xlu0 %953  ;;  %v636_v57 = vadd.f32 %v4775_v63, %v4401_v16 }
 0x360   :  { %v1045_v59 = vsel %vm323_vm1, %v641_v61, %v950_v20  ;;  %v1172_v62 = vmax.f32 %v1171_v9, %v4817_v24  ;;  %v635_v9 = vadd.f32 %v4775_v63, %v4408_v12  ;;  %v638_v61 = vadd.f32 %v4775_v63, %v4427_v28  ;;  %v5519_v28 = vld [vmem:[#allocation3_spill] sm:$0xff] }
 0x361   :  { %v1102_v35 = vmul.f32 0.2, %v1045_v59  ;;  %vm1070_vm6 = vcmp.gt.f32.partialorder %v1045_v59, 0.0  ;;  %v532_v20 = vadd.f32 %v4772_v39, %v4365_v41  ;;  %v844_v25 = vadd.f32 %v4786_v36, %v5519_v28 }
 0x362   :  { %1173 = vmax.xlane.f32.xlu0 %v1172_v62  ;;  %v644_v62 = vadd.f32 %v636_v57, %v4629_v52  ;;  %v643_v41 = vadd.f32 %v635_v9, %v4642_v51  ;;  %v645_v57 = vadd.f32 %v637_v40, %v4676_v13 }
 0x363   :  { %v982_v45 = vpop.permute.xlu1 %981  ;;  %v4826_v10 = vsel %vm1070_vm6, %v1045_v59, %v1102_v35  ;;  %v4842_v7 = vpop.permute.xlu0 %959  ;;  %v5517_v59 = vld [vmem:[#allocation7_spill] sm:$0xff]  ;;  %v5518_v35 = vld [vmem:[#allocation9_spill] sm:$0xff] }
 0x364   :  { %v1053_v5 = vsel %vm323_vm1, %v745_v42, %v982_v45  ;;  %v1165_v1 = vmax.f32 %v4829_v18, %v4826_v10  ;;  %v740_v12 = vadd.f32 %v4779_v46, %v5517_v59  ;;  %v536_v42 = vadd.f32 %v4772_v39, %v5518_v35  ;;  %v5521_v45 = vld [vmem:[#allocation10_spill] sm:$0xff]  ;;  %v5525_v59 = vld [vmem:[#allocation11_spill] sm:$0xff] }
 0x365   :  { %vm1071_vm8 = vcmp.gt.f32.partialorder %v1053_v5, 0.0  ;;  %v1103_v2 = vmul.f32 0.2, %v1053_v5  ;;  %v531_v8 = vadd.f32 %v4772_v39, %v5521_v45  ;;  %v534_v35 = vadd.f32 %v4772_v39, %v5525_v59 }
 0x366   :  { %v748_v9 = vadd.f32 %v740_v12, %v4629_v52  ;;  %v544_v28 = vadd.f32 %v536_v42, %v4689_v11 }
 0x367   :  { %v4831_v19 = vsel %vm1071_vm8, %v1053_v5, %v1103_v2  ;;  %v1014_v58 = vpop.permute.xlu1 %1013  ;;  %v4850_v38 = vpop.permute.xlu0 %1023  ;;  %v5522_v5 = vld [vmem:[#allocation16_spill] sm:$0xff] }
 0x368   :  { %v1061_v0 = vsel %vm323_vm1, %v849_v30, %v1014_v58  ;;  %v1166_v3 = vmax.f32 %v1165_v1, %v4831_v19  ;;  %v535_v2 = vadd.f32 %v4772_v39, %v5522_v5  ;;  %v5523_v30 = vld [vmem:[#allocation20_spill] sm:$0xff] }
 0x369   :  { %vm1072_vm9 = vcmp.gt.f32.partialorder %v1061_v0, 0.0  ;;  %v1104_v34 = vmul.f32 0.2, %v1061_v0  ;;  %v739_v58 = vadd.f32 %v4779_v46, %v5523_v30 }
 0x36a   :  { %v4911_v40 = vadd.f32 %v535_v2, %v4710_v6 }
 0x36b   :  { %v4837_v50 = vsel %vm1072_vm9, %v1061_v0, %v1104_v34  ;;  %v924_v32 = vpop.permute.xlu1 %923  ;;  %v4872_v16 = vpop.permute.xlu0 %957  ;;  %v646_v0 = vadd.f32 %v638_v61, %v4655_v43  ;;  %v854_v34 = vadd.f32 %v846_v14, %v4655_v43  ;;  %v852_v61 = vadd.f32 %v844_v25, %v4629_v52  ;;  %v5527_v25 = vld [vmem:[#allocation19_spill] sm:$0xff] }
 0x36c   :  { %v1167_v23 = vmax.f32 %v1166_v3, %v4837_v50  ;;  %v847_v3 = vadd.f32 %v4786_v36, %v4578_v53  ;;  %v856_v14 = vadd.f32 %v848_v21, %v4689_v11  ;;  %v742_v53 = vadd.f32 %v4779_v46, %v5526_v55 }
 0x36d   :  { %v747_v12 = vadd.f32 %v739_v58, %v4642_v51  ;;  %v533_v21 = vadd.f32 %v4772_v39, %v5527_v25  ;;  %v542_v58 = vadd.f32 %v534_v35, %v4655_v43  ;;  %v744_v39 = vadd.f32 %v4779_v46, %v5531_v49 }
 0x36e   :  { %1168 = vmax.xlane.f32.xlu1 %v1167_v23  ;;  %v5524_v23 = vld [vmem:[#allocation8_spill] sm:$0xff]  ;;  %v4917_v42 = vadd.f32 %v847_v3, %v4710_v6  ;;  %v750_v55 = vadd.f32 %v742_v53, %v4655_v43  ;;  %v1047_v49 = vsel %vm323_vm1, %v643_v41, %v4840_v37 }
 0x36f   :  { %v988_v29 = vpop.permute.xlu1 %987  ;;  %v932_v5 = vpop.permute.xlu0 %931  ;;  %v4946_v53 = vadd.f32 %v533_v21, %v4676_v13  ;;  %v752_v37 = vadd.f32 %v744_v39, %v4689_v11  ;;  %vm1078_vm14 = vcmp.gt.f32.partialorder %v1047_v49, 0.0 }
 0x370   :  { %v1056_v2 = vsel %vm323_vm1, %v748_v9, %v988_v29  ;;  %v5532_v29 = vld [vmem:[#allocation35_spill] sm:$0xff]  ;;  %v5533_v9 = vld [vmem:[#allocation36_spill] sm:$0xff] }
 0x371   :  { %v1115_v43 = vmul.f32 0.2, %v1056_v2  ;;  %vm1083_vm12 = vcmp.gt.f32.partialorder %v1056_v2, 0.0 }
 0x373   :  { %v1020_v4 = vpop.permute.xlu1 %1019 }
 0x374   :  { %v1064_v25 = vsel %vm323_vm1, %v852_v61, %v1020_v4  ;;  %v1028_v4 = vpop.permute.xlu0 %1027 }
 0x375   :  { %vm1084_vm13 = vcmp.gt.f32.partialorder %v1064_v25, 0.0 }
 0x377   :  { %v4847_v56 = vpop.permute.xlu1 %921 }
 0x378   :  { %1495 = vrot.lane.b32.xlu0 %v161_v47, %s3344_s23  ;;  %v843_v47 = vadd.f32 %v4786_v36, %v5524_v23 }
 0x37b   :  { %v4852_v54 = vpop.permute.xlu1 %985 }
 0x37f   :  { %v4861_v17 = vpop.permute.xlu1 %1017  ;;  %1527 = vrot.lane.b32.xlu1 %v177_v33, %s3344_s23  ;;  %v540_v33 = vadd.f32 %v532_v20, %v4629_v52  ;;  %v539_v20 = vadd.f32 %v531_v8, %v4642_v51  ;;  %v4920_v52 = vadd.f32 %v843_v47, %v4642_v51  ;;  %v1048_v8 = vsel %vm323_vm1, %v644_v62, %v956_v15  ;;  %v5530_v51 = vld [vmem:[#allocation6_spill] sm:$0xff] }
 0x380   :  { %v640_v47 = vadd.f32 %v4775_v63, %v5530_v51  ;;  %v639_v62 = vadd.f32 %v4775_v63, %v5532_v29  ;;  %v1114_v35 = vmul.f32 0.2, %v1048_v8  ;;  %vm1082_vm11 = vcmp.gt.f32.partialorder %v1048_v8, 0.0 }
 0x381   :  { %v1040_v45 = vsel %vm323_vm1, %v540_v33, %v924_v32  ;;  %v5528_v32 = vld [vmem:[#allocation15_spill] sm:$0xff]  ;;  %v5529_v33 = vld [vmem:[#allocation4_spill] sm:$0xff]  ;;  %v4970_v29 = vsel %vm1083_vm12, %v1056_v2, %v1115_v43  ;;  %v4985_v2 = vsel %vm323_vm1, %v645_v57, %v4872_v16 }
 0x382   :  { %v741_v23 = vadd.f32 %v4779_v46, %v5528_v32  ;;  %v845_v59 = vadd.f32 %v4786_v36, %v5529_v33  ;;  %v1113_v3 = vmul.f32 0.2, %v1040_v45  ;;  %vm1081_vm10 = vcmp.gt.f32.partialorder %v1040_v45, 0.0 }
 0x383   :  { %v4890_v1 = vpop.permute.xlu1 %927  ;;  %v4943_v36 = vadd.f32 %v4779_v46, %v5533_v9  ;;  %v1050_v46 = vsel %vm323_vm1, %v646_v0, %v4842_v7  ;;  %v1116_v33 = vmul.f32 0.2, %v1064_v25  ;;  %v648_v21 = vadd.f32 %v640_v47, %v4689_v11  ;;  %v930_v47 = vpop.permute.xlu0 %929 }
 0x384   :  { %v4949_v32 = vadd.f32 %v741_v23, %v4676_v13  ;;  %v4954_v63 = vadd.f32 %v845_v59, %v4676_v13  ;;  %v4958_v61 = vsel %vm1081_vm10, %v1040_v45, %v1113_v3  ;;  %v1044_v23 = vsel %vm323_vm1, %v544_v28, %v932_v5 }
 0x385   :  { %v4966_v41 = vadd.f32 %v639_v62, %v4710_v6  ;;  %v4968_v13 = vsel %vm1082_vm11, %v1048_v8, %v1114_v35  ;;  %v1110_v59 = vmul.f32 0.2, %v1047_v49  ;;  %v1068_v7 = vsel %vm323_vm1, %v856_v14, %v1028_v4 }
 0x386   :  { %v1122_v0 = vmul.f32 0.2, %v1050_v46  ;;  %v1180_v28 = vmax.f32 %v4958_v61, %v4968_v13  ;;  %v1039_v45 = vsel %vm323_vm1, %v539_v20, %v4847_v56  ;;  %vm1090_vm15 = vcmp.gt.f32.partialorder %v1050_v46, 0.0 }
 0x387   :  { %v4914_v30 = vpop.permute.xlu1 %991  ;;  %v4979_v11 = vsel %vm323_vm1, %v854_v34, %v4850_v38  ;;  %v1129_v5 = vmul.f32 0.2, %v1044_v23  ;;  %v4981_v8 = vsel %vm1084_vm13, %v1064_v25, %v1116_v33  ;;  %vm1097_vm0 = vcmp.gt.f32.partialorder %v1044_v23, 0.0 }
 0x388   :  { %v1181_v14 = vmax.f32 %v1180_v28, %v4970_v29  ;;  %v1132_v3 = vmul.f32 0.2, %v1068_v7  ;;  %v4988_v62 = vsel %vm1078_vm14, %v1047_v49, %v1110_v59  ;;  %vm1100_vm2 = vcmp.gt.f32.partialorder %v1068_v7, 0.0 }
 0x389   :  { %v1109_v56 = vmul.f32 0.2, %v1039_v45  ;;  %v1055_v38 = vsel %vm323_vm1, %v747_v12, %v4852_v54  ;;  %v4992_v34 = vsel %vm1090_vm15, %v1050_v46, %v1122_v0  ;;  %vm1077_vm3 = vcmp.gt.f32.partialorder %v1039_v45, 0.0 }
 0x38a   :  { %v1042_v16 = vsel %vm323_vm1, %v542_v58, %v4890_v1  ;;  %v1182_v57 = vmax.f32 %v1181_v14, %v4981_v8  ;;  %v1124_v20 = vmul.f32 0.2, %v4979_v11  ;;  %v1118_v25 = vmul.f32 0.2, %v4985_v2 }
 0x38b   :  { %v4937_v15 = vpop.permute.xlu1 %925  ;;  %v4999_v9 = vsel %vm1097_vm0, %v1044_v23, %v1129_v5  ;;  %v1063_v35 = vsel %vm323_vm1, %v4920_v52, %v4861_v17  ;;  %v5004_v43 = vsel %vm1100_vm2, %v1068_v7, %v1132_v3  ;;  %v1043_v54 = vsel %vm323_vm1, %v4911_v40, %v930_v47  ;;  %v1026_v52 = vpop.permute.xlu0 %1025 }
 0x38c   :  { %v1111_v12 = vmul.f32 0.2, %v1055_v38  ;;  %v1058_v1 = vsel %vm323_vm1, %v750_v55, %v4914_v30  ;;  %vm1092_vm4 = vcmp.gt.f32.partialorder %v4979_v11, 0.0  ;;  %vm1086_vm5 = vcmp.gt.f32.partialorder %v4985_v2, 0.0 }
 0x38d   :  { %v5012_v49 = vsel %vm1077_vm3, %v1039_v45, %v1109_v56  ;;  %vm1079_vm6 = vcmp.gt.f32.partialorder %v1055_v38, 0.0  ;;  %v1121_v4 = vmul.f32 0.2, %v1042_v16  ;;  %v1112_v46 = vmul.f32 0.2, %v1063_v35 }
 0x38e   :  { %vm1089_vm7 = vcmp.gt.f32.partialorder %v1042_v16, 0.0  ;;  %vm1093_vm9 = vcmp.gt.f32.partialorder %v1043_v54, 0.0  ;;  %v1125_v33 = vmul.f32 0.2, %v1043_v54  ;;  %vm1080_vm10 = vcmp.gt.f32.partialorder %v1063_v35, 0.0 }
 0x38f   :  { %v4962_v51 = vpop.permute.xlu1 %989  ;;  %v1123_v30 = vmul.f32 0.2, %v1058_v1  ;;  %v5015_v55 = vsel %vm1079_vm6, %v1055_v38, %v1111_v12  ;;  %vm1091_vm11 = vcmp.gt.f32.partialorder %v1058_v1, 0.0  ;;  %v1041_v23 = vsel %vm323_vm1, %v4946_v53, %v4937_v15 }
 0x390   :  { %v1067_v0 = vsel %vm323_vm1, %v4917_v42, %v1026_v52  ;;  %v5026_v28 = vsel %vm1089_vm7, %v1042_v16, %v1121_v4  ;;  %v5029_v5 = vsel %vm1080_vm10, %v1063_v35, %v1112_v46  ;;  %v1057_v14 = vsel %vm323_vm1, %v4949_v32, %v4962_v51 }
 0x391   :  { %v5035_v3 = vsel %vm1091_vm11, %v1058_v1, %v1123_v30  ;;  %v1117_v47 = vmul.f32 0.2, %v1041_v23  ;;  %v1190_v56 = vmax.f32 %v5026_v28, %v4992_v34  ;;  %vm1085_vm13 = vcmp.gt.f32.partialorder %v1041_v23, 0.0 }
 0x392   :  { %v1119_v51 = vmul.f32 0.2, %v1057_v14  ;;  %vm1087_vm14 = vcmp.gt.f32.partialorder %v1057_v14, 0.0  ;;  %vm1096_vm3 = vcmp.gt.f32.partialorder %v1067_v0, 0.0 }
 0x393   :  { %v1022_v39 = vpop.permute.xlu1 %1021  ;;  %v1191_v12 = vmax.f32 %v1190_v56, %v5035_v3 }
 0x397   :  { %v964_v58 = vpop.permute.xlu1 %963  ;;  %1183 = vmax.xlane.f32.xlu0 %v1182_v57 }
 0x398   :  { %v1052_v17 = vsel %vm323_vm1, %v648_v21, %v964_v58  ;;  %v1175_v21 = vmax.f32 %v5012_v49, %v4988_v62  ;;  %v5050_v58 = vsel %vm1085_vm13, %v1041_v23, %v1117_v47 }
 0x399   :  { %vm1098_vm8 = vcmp.gt.f32.partialorder %v1052_v17, 0.0  ;;  %v1130_v40 = vmul.f32 0.2, %v1052_v17 }
 0x39a   :  { %v1176_v53 = vmax.f32 %v1175_v21, %v5015_v55 }
 0x39b   :  { %v5020_v59 = vsel %vm1098_vm8, %v1052_v17, %v1130_v40  ;;  %v996_v7 = vpop.permute.xlu1 %995  ;;  %v5058_v17 = vsel %vm1092_vm4, %v4979_v11, %v1124_v20  ;;  %v5068_v40 = vsel %vm1093_vm9, %v1043_v54, %v1125_v33  ;;  %vm1935_vm4 = vcmask 64512  }
 0x39c   :  { %v1060_v45 = vsel %vm323_vm1, %v752_v37, %v996_v7  ;;  %v1200_v42 = vmax.f32 %v4999_v9, %v5020_v59  ;;  %v1065_v37 = vsel %vm323_vm1, %v4954_v63, %v1022_v39  ;;  %v1177_v35 = vmax.f32 %v1176_v53, %v5029_v5  ;;  %v160_v53 = vld [vmem:[%s5387_s6 + $0x100] sm:$0xff] }
 0x39d   :  { %vm1099_vm12 = vcmp.gt.f32.partialorder %v1060_v45, 0.0  ;;  %v1131_v15 = vmul.f32 0.2, %v1060_v45  ;;  %v1120_v4 = vmul.f32 0.2, %v1065_v37  ;;  %v751_v63 = vadd.f32 %v4943_v36, %v4710_v6 }
 0x39e   :  { %vm1088_vm0 = vcmp.gt.f32.partialorder %v1065_v37, 0.0  ;;  %v1128_v6 = vmul.f32 0.2, %v1067_v0  ;;  %v5070_v36 = vsel %vm1087_vm14, %v1057_v14, %v1119_v51  ;;  %v1192_v20 = vmax.f32 %v1191_v12, %v5058_v17  ;;  %v97_v51 = vld [vmem:[%s5391_s5 + $0x108] sm:$0xff] }
 0x39f   :  { %v5043_v38 = vsel %vm1099_vm12, %v1060_v45, %v1131_v15  ;;  %v962_v32 = vpop.permute.xlu1 %961  ;;  %v176_v15 = vld [vmem:[%s5387_s6 + $0x180] sm:$0xff] }
 0x3a0   :  { %v1201_v16 = vmax.f32 %v1200_v42, %v5043_v38  ;;  %v1051_v57 = vsel %vm323_vm1, %v4966_v41, %v962_v32  ;;  %v5063_v41 = vsel %vm1086_vm5, %v4985_v2, %v1118_v25  ;;  %v5076_v25 = vsel %vm1088_vm0, %v1065_v37, %v1120_v4  ;;  %v113_v32 = vld [vmem:[%s5391_s5 + $0x188] sm:$0xff] }
 0x3a1   :  { %vm1094_vm15 = vcmp.gt.f32.partialorder %v1051_v57, 0.0  ;;  %v1126_v1 = vmul.f32 0.2, %v1051_v57  ;;  %v1185_v11 = vmax.f32 %v5050_v58, %v5063_v41  ;;  %v5084_v21 = vsel %vm1096_vm3, %v1067_v0, %v1128_v6 }
 0x3a2   :  { %v1202_v39 = vmax.f32 %v1201_v16, %v5004_v43 }
 0x3a3   :  { %v5065_v52 = vsel %vm1094_vm15, %v1051_v57, %v1126_v1  ;;  %v994_v46 = vpop.permute.xlu1 %993  ;;  %1178 = vmax.xlane.f32.xlu1 %v1177_v35  ;;  %v1186_v33 = vmax.f32 %v1185_v11, %v5070_v36  ;;  %v5534_v1 = vld [vmem:[#allocation17_spill] sm:$0xff] }
 0x3a4   :  { %v1059_v30 = vsel %vm323_vm1, %v751_v63, %v994_v46  ;;  %1203 = vmax.xlane.f32.xlu0 %v1202_v39  ;;  %v1195_v54 = vmax.f32 %v5068_v40, %v5065_v52  ;;  %v1350_v4 = vmul.f32 %v5534_v1, %v113_v32  ;;  %v1334_v39 = vmul.f32 %v5534_v1, %v97_v51  ;;  %v5545_v32 = vld [vmem:[#allocation31_spill] sm:$0xff]  ;;  %v5546_v51 = vld [vmem:[#allocation32_spill] sm:$0xff] }
 0x3a5   :  { %vm1095_vm2 = vcmp.gt.f32.partialorder %v1059_v30, 0.0  ;;  %v1127_v2 = vmul.f32 0.2, %v1059_v30  ;;  %v1187_v45 = vmax.f32 %v1186_v33, %v5076_v25  ;;  %v5553_v1 = vld [vmem:[#allocation39_spill] sm:$0xff] }
 0x3a7   :  { %v5081_v23 = vsel %vm1095_vm2, %v1059_v30, %v1127_v2  ;;  %1193 = vmax.xlane.f32.xlu1 %v1192_v20  ;;  %v5535_v20 = vld [vmem:[#allocation21_spill] sm:$0xff] }
 0x3a8   :  { %v1196_v7 = vmax.f32 %v1195_v54, %v5081_v23  ;;  %v5536_v54 = vld [vmem:[#allocation22_spill] sm:$0xff] }
 0x3aa   :  { %v1197_v14 = vmax.f32 %v1196_v7, %v5084_v21  ;;  %v5537_v7 = vld [vmem:[#allocation24_spill] sm:$0xff] }
 0x3ab   :  { %1188 = vmax.xlane.f32.xlu1 %v1187_v45  ;;  %v5538_v45 = vld [vmem:[#allocation23_spill] sm:$0xff] }
 0x3ac   :  { %1198 = vmax.xlane.f32.xlu0 %v1197_v14  ;;  %v5539_v14 = vld [vmem:[#allocation25_spill] sm:$0xff] }
 0x3bc   :  { %1525 = vrot.lane.b32.xlu1 %v176_v15, %s3344_s23  ;;  %v5540_v15 = vld [vmem:[#allocation26_spill] sm:$0xff] }
 0x3c2   :  { %1493 = vrot.lane.b32.xlu0 %v160_v53, %s3344_s23  ;;  %v5541_v53 = vld [vmem:[#allocation27_spill] sm:$0xff] }
 0x3eb   :  { %v5096_v0 = vpop.xlane.xlu0 %1173 }
 0x3ec   :  { %v1212_v47 = vsub.f32 %v4817_v24, %v5096_v0  ;;  %v1210_v56 = vsub.f32 %v4800_v31, %v5096_v0  ;;  %v1209_v57 = vsub.f32 %v4798_v27, %v5096_v0 }
 0x3ee   :  { %v1251_v42 = vmul.f32 1.442695, %v1212_v47  ;;  %v1247_v63 = vmul.f32 1.442695, %v1210_v56  ;;  %v5542_v47 = vld [vmem:[#allocation28_spill] sm:$0xff]  ;;  %v5544_v56 = vld [vmem:[#allocation30_spill] sm:$0xff] }
 0x3ef   :  { %v1496_v31 = vpop.permute.xlu0 %1495 }
 0x3f0   :  { %3224 = vpow2.f32 %v1251_v42  ;;  %v5543_v42 = vld [vmem:[#allocation29_spill] sm:$0xff] }
 0x3f7   :  { %v5102_v37 = vpop.xlane.xlu1 %1168 }
 0x3f8   :  { %v1205_v16 = vsub.f32 %v4829_v18, %v5102_v37  ;;  %v1206_v24 = vsub.f32 %v4826_v10, %v5102_v37  ;;  %v1654_v18 = vsel %vm323_vm1, %v1334_v39, %v1496_v31  ;;  %v1245_v10 = vmul.f32 1.442695, %v1209_v57  ;;  %v5549_v57 = vld [vmem:[#allocation5_spill] sm:$0xff]  ;;  %v5550_v31 = vld [vmem:[#allocation2_spill] sm:$0xff] }
 0x3fa   :  { %v1237_v35 = vmul.f32 1.442695, %v1205_v16  ;;  %v1239_v12 = vmul.f32 1.442695, %v1206_v24  ;;  %v5547_v16 = vld [vmem:[#allocation33_spill] sm:$0xff]  ;;  %v5548_v24 = vld [vmem:[#allocation34_spill] sm:$0xff] }
 0x3fb   :  { %v1528_v46 = vpop.permute.xlu1 %1527 }
 0x3fc   :  { %3226 = vpow2.f32 %v1237_v35  ;;  %v1670_v6 = vsel %vm323_vm1, %v1350_v4, %v1528_v46  ;;  %v5551_v35 = vld [vmem:[#allocation37_spill] sm:$0xff]  ;;  %v5554_v4 = vld [vmem:[#allocation40_spill] sm:$0xff]  ;;  %v5556_v46 = vld [vmem:[#allocation42_spill] sm:$0xff] }
 0x3fd   :  { %3228 = vpow2.f32 %v1239_v12  ;;  %3127 = vmatprep.subr.mxu1 %v1670_v6  ;;  %v3225_v27 = vpop.eup %3224  ;;  %v5552_v12 = vld [vmem:[#allocation38_spill] sm:$0xff] }
 0x3fe   :  { %3143 = vmatpush3.msra.mxu1 %v1654_v18  ;;  %3230 = vpow2.f32 %v1247_v63  ;;  %1859 = vmatprep.mubr.f32.mxu1 %v3225_v27  ;;  %v5555_v63 = vld [vmem:[#allocation41_spill] sm:$0xff]  ;;  %v5558_v27 = vld [vmem:[#allocation44_spill] sm:$0xff] }
 0x3ff   :  { %3232 = vpow2.f32 %v1245_v10  ;;  %v5557_v10 = vld [vmem:[#allocation43_spill] sm:$0xff] }
 0x409   :  { %v3227_v30 = vpop.eup %3226 }
 0x40a   :  { %v3229_v11 = vpop.eup %3228 }
 0x40b   :  { %1749 = vmatprep.mubr.f32.mxu0 %v3229_v11  ;;  %v3231_v2 = vpop.eup %3230 }
 0x40c   :  { %1750 = vmatmul.mubr.f32.vlgmr.msra.gmra.mxu0 %v3227_v30  ;;  %v3233_v33 = vpop.eup %3232 }
 0x40d   :  { %2880 = vmatpush3.msra.mxu0 %v5535_v20  ;;  %1754 = vmatprep.mubr.f32.mxu0 %v3231_v2 }
 0x40e   :  { %2881 = vmatprep.subr.mxu0 %v5536_v54 }
 0x40f   :  { %2882 = vmatpush3.msra.mxu0 %v5537_v7 }
 0x410   :  { %2883 = vmatprep.subr.mxu0 %v5538_v45  ;;  %1755 = vmatmul.mubr.f32.gmra.mxu0 %v3233_v33 }
 0x411   :  { %2884 = vmatpush3.msra.mxu0 %v5539_v14 }
 0x412   :  { %2885 = vmatprep.subr.mxu0 %v5540_v15 }
 0x413   :  { %2886 = vmatpush3.msra.mxu0 %v5541_v53 }
 0x414   :  { %2887 = vmatprep.subr.mxu0 %v5542_v47 }
 0x415   :  { %2888 = vmatpush3.msra.mxu0 %v5543_v42 }
 0x416   :  { %2889 = vmatprep.subr.mxu0 %v5544_v56  ;;  %v5559_v56 = vld [vmem:[#allocation18_spill] sm:$0xff] }
 0x417   :  { %2890 = vmatpush3.msra.mxu0 %v5545_v32 }
 0x418   :  { %2891 = vmatprep.subr.mxu0 %v5546_v51 }
 0x419   :  { %2892 = vmatpush3.msra.mxu0 %v5547_v16 }
 0x41a   :  { %2893 = vmatprep.subr.mxu0 %v5548_v24 }
 0x41b   :  { %2894 = vmatpush3.msra.mxu0 %v5549_v57 }
 0x41c   :  { %2895 = vmatprep.subr.mxu0 %v5550_v31 }
 0x41d   :  { %2896 = vmatpush3.msra.mxu0 %v4500_v48  ;;  %v1211_v48 = vsub.f32 %v4807_v22, %v5096_v0 }
 0x41e   :  { %2897 = vmatprep.subr.mxu0 %v5551_v35 }
 0x41f   :  { %2898 = vmatpush3.msra.mxu0 %v4516_v60 }
 0x420   :  { %2899 = vmatprep.subr.mxu0 %v4523_v26  ;;  %v1184_v39 = vpop.xlane.xlu0 %1183  ;;  %v1249_v26 = vmul.f32 1.442695, %v1211_v48 }
 0x421   :  { %2900 = vmatpush3.msra.mxu0 %v5552_v12  ;;  %v1218_v60 = vsub.f32 %v4968_v13, %v1184_v39  ;;  %v1220_v22 = vsub.f32 %v4981_v8, %v1184_v39  ;;  %v1217_v0 = vsub.f32 %v4958_v61, %v1184_v39  ;;  %v1219_v14 = vsub.f32 %v4970_v29, %v1184_v39  ;;  %v112_v61 = vld [vmem:[%s5391_s5 + $0x180] sm:$0xff] }
 0x422   :  { %2901 = vmatprep.subr.mxu0 %v5553_v1  ;;  %3234 = vpow2.f32 %v1249_v26  ;;  %v96_v29 = vld [vmem:[%s5391_s5 + $0x100] sm:$0xff]  ;;  %v1349_v32 = vmul.f32 %v5559_v56, %v112_v61 }
 0x423   :  { %2902 = vmatpush3.msra.mxu0 %v5554_v4  ;;  %v1263_v30 = vmul.f32 1.442695, %v1218_v60  ;;  %v1265_v15 = vmul.f32 1.442695, %v1219_v14 }
 0x424   :  { %2903 = vmatprep.subr.mxu0 %v5555_v63 }
 0x425   :  { %2904 = vmatpush3.msra.mxu0 %v5556_v46  ;;  %3236 = vpow2.f32 %v1263_v30 }
 0x426   :  { %2905 = vmatprep.subr.mxu0 %v5557_v10 }
 0x427   :  { %2906 = vmatpush3.msra.mxu0 %v5558_v27 }
 0x428   :  { %2907 = vmatprep.subr.mxu0 %v1670_v6 }
 0x429   :  { %2908 = vmatpush3.msra.mxu0 %v1654_v18 }
 0x42c   :  { %v1179_v11 = vpop.xlane.xlu1 %1178 }
 0x42d   :  { %v1213_v2 = vsub.f32 %v5012_v49, %v1179_v11  ;;  %v1214_v20 = vsub.f32 %v4988_v62, %v1179_v11  ;;  %v1215_v54 = vsub.f32 %v5015_v55, %v1179_v11  ;;  %v1216_v33 = vsub.f32 %v5029_v5, %v1179_v11  ;;  %v5157_v49 = vpop.xlane.xlu0 %1203 }
 0x42e   :  { %v1267_v62 = vmul.f32 1.442695, %v1220_v22  ;;  %v1261_v55 = vmul.f32 1.442695, %v1217_v0  ;;  %v1208_v0 = vsub.f32 %v4837_v50, %v5102_v37 }
 0x42f   :  { %v1253_v7 = vmul.f32 1.442695, %v1213_v2  ;;  %v1255_v13 = vmul.f32 1.442695, %v1214_v20  ;;  %v1257_v6 = vmul.f32 1.442695, %v1215_v54 }
 0x430   :  { %v1259_v18 = vmul.f32 1.442695, %v1216_v33  ;;  %v1194_v45 = vpop.xlane.xlu1 %1193 }
 0x431   :  { %3238 = vpow2.f32 %v1253_v7  ;;  %v1226_v8 = vsub.f32 %v4992_v34, %v1194_v45  ;;  %v1228_v12 = vsub.f32 %v5058_v17, %v1194_v45  ;;  %v1225_v4 = vsub.f32 %v5026_v28, %v1194_v45 }
 0x432   :  { %3240 = vpow2.f32 %v1255_v13  ;;  %v1227_v17 = vsub.f32 %v5035_v3, %v1194_v45  ;;  %v1243_v45 = vmul.f32 1.442695, %v1208_v0 }
 0x433   :  { %3242 = vpow2.f32 %v1257_v6  ;;  %v1279_v51 = vmul.f32 1.442695, %v1226_v8  ;;  %v1283_v10 = vmul.f32 1.442695, %v1228_v12  ;;  %v1277_v60 = vmul.f32 1.442695, %v1225_v4 }
 0x434   :  { %3244 = vpow2.f32 %v1259_v18  ;;  %v1189_v5 = vpop.xlane.xlu1 %1188  ;;  %v1281_v2 = vmul.f32 1.442695, %v1227_v17 }
 0x435   :  { %v1221_v53 = vsub.f32 %v5050_v58, %v1189_v5  ;;  %v5164_v47 = vpop.xlane.xlu0 %1198  ;;  %3246 = vpow2.f32 %v1267_v62  ;;  %v1222_v42 = vsub.f32 %v5063_v41, %v1189_v5  ;;  %v1223_v34 = vsub.f32 %v5070_v36, %v1189_v5  ;;  %v3235_v36 = vpop.eup %3234 }
 0x436   :  { %3248 = vpow2.f32 %v1261_v55  ;;  %v1224_v16 = vsub.f32 %v5076_v25, %v1189_v5  ;;  %v1333_v58 = vmul.f32 %v5559_v56, %v96_v29  ;;  %v1230_v39 = vsub.f32 %v5065_v52, %v5164_v47  ;;  %v3237_v46 = vpop.eup %3236 }
 0x437   :  { %3250 = vpow2.f32 %v1265_v15  ;;  %v1269_v57 = vmul.f32 1.442695, %v1221_v53  ;;  %v1271_v1 = vmul.f32 1.442695, %v1222_v42  ;;  %v1273_v63 = vmul.f32 1.442695, %v1223_v34 }
 0x438   :  { %v1526_v24 = vpop.permute.xlu1 %1525  ;;  %3252 = vpow2.f32 %v1279_v51  ;;  %v1275_v25 = vmul.f32 1.442695, %v1224_v16  ;;  %v1232_v27 = vsub.f32 %v5084_v21, %v5164_v47  ;;  %v1229_v26 = vsub.f32 %v5068_v40, %v5164_v47 }
 0x439   :  { %v1494_v31 = vpop.permute.xlu0 %1493  ;;  %v1669_v35 = vsel %vm323_vm1, %v1349_v32, %v1526_v24  ;;  %3254 = vpow2.f32 %v1269_v57  ;;  %v1234_v52 = vsub.f32 %v5020_v59, %v5157_v49  ;;  %v1287_v11 = vmul.f32 1.442695, %v1230_v39 }
 0x43a   :  { %v1653_v41 = vsel %vm323_vm1, %v1333_v58, %v1494_v31  ;;  %2909 = vmatprep.subr.mxu0 %v1669_v35  ;;  %3128 = vmatprep.subr.mxu1 %v1669_v35  ;;  %3256 = vpow2.f32 %v1271_v1  ;;  %v1231_v20 = vsub.f32 %v5081_v23, %v5164_v47  ;;  %v1236_v21 = vsub.f32 %v5004_v43, %v5157_v49 }
 0x43b   :  { %2910 = vmatpush3.msra.mxu0 %v1653_v41  ;;  %3144 = vmatpush3.msra.mxu1 %v1653_v41  ;;  %3258 = vpow2.f32 %v1273_v63  ;;  %v1291_v54 = vmul.f32 1.442695, %v1232_v27  ;;  %v1233_v59 = vsub.f32 %v4999_v9, %v5157_v49  ;;  %v1285_v33 = vmul.f32 1.442695, %v1229_v26 }
 0x43c   :  { %1860 = vmatmul.mubr.f32.vlgmr.msra.gmra.mxu1 %v3235_v36  ;;  %3260 = vpow2.f32 %v1275_v25  ;;  %v1295_v23 = vmul.f32 1.442695, %v1234_v52  ;;  %v1235_v43 = vsub.f32 %v5043_v38, %v5157_v49  ;;  %v1289_v7 = vmul.f32 1.442695, %v1231_v20 }
 0x43d   :  { %3262 = vpow2.f32 %v1283_v10  ;;  %v1299_v6 = vmul.f32 1.442695, %v1236_v21  ;;  %v1207_v9 = vsub.f32 %v4831_v19, %v5102_v37  ;;  %v1293_v18 = vmul.f32 1.442695, %v1233_v59 }
 0x43e   :  { %v3239_v48 = vpop.eup %3238  ;;  %3264 = vpow2.f32 %v1277_v60  ;;  %v1297_v14 = vmul.f32 1.442695, %v1235_v43 }
 0x43f   :  { %v3241_v28 = vpop.eup %3240  ;;  %3266 = vpow2.f32 %v1287_v11  ;;  %v1241_v49 = vmul.f32 1.442695, %v1207_v9 }
 0x440   :  { %v3243_v30 = vpop.eup %3242  ;;  %1759 = vmatprep.mubr.f32.mxu0 %v3241_v28  ;;  %3268 = vpow2.f32 %v1281_v2 }
 0x441   :  { %v3245_v3 = vpop.eup %3244  ;;  %1760 = vmatmul.mubr.f32.gmra.mxu0 %v3239_v48  ;;  %3270 = vpow2.f32 %v1291_v54 }
 0x442   :  { %1864 = vmatprep.mubr.f32.mxu1 %v3245_v3  ;;  %1764 = vmatprep.mubr.f32.mxu0 %v3237_v46  ;;  %v3247_v40 = vpop.eup %3246  ;;  %3272 = vpow2.f32 %v1285_v33 }
 0x443   :  { %1865 = vmatmul.mubr.f32.gmra.mxu1 %v3243_v30  ;;  %v3249_v22 = vpop.eup %3248  ;;  %3274 = vpow2.f32 %v1295_v23 }
 0x444   :  { %1869 = vmatprep.mubr.f32.mxu1 %v3247_v40  ;;  %v3251_v13 = vpop.eup %3250  ;;  %3276 = vpow2.f32 %v1289_v7 }
 0x445   :  { %1765 = vmatmul.mubr.f32.gmra.mxu0 %v3249_v22  ;;  %v3253_v50 = vpop.eup %3252  ;;  %3278 = vpow2.f32 %v1299_v6 }
 0x446   :  { %v3255_v62 = vpop.eup %3254  ;;  %3280 = vpow2.f32 %v1293_v18 }
 0x447   :  { %1870 = vmatmul.mubr.f32.gmra.mxu1 %v3251_v13  ;;  %v3257_v38 = vpop.eup %3256  ;;  %3282 = vpow2.f32 %v1243_v45 }
 0x448   :  { %v3259_v55 = vpop.eup %3258  ;;  %1769 = vmatprep.mubr.f32.mxu0 %v3257_v38  ;;  %3284 = vpow2.f32 %v1297_v14 }
 0x449   :  { %v3261_v8 = vpop.eup %3260  ;;  %1770 = vmatmul.mubr.f32.gmra.mxu0 %v3255_v62  ;;  %3286 = vpow2.f32 %v1241_v49 }
 0x44a   :  { %1874 = vmatprep.mubr.f32.mxu1 %v3261_v8  ;;  %1774 = vmatprep.mubr.f32.mxu0 %v3253_v50  ;;  %v3263_v19 = vpop.eup %3262 }
 0x44b   :  { %1875 = vmatmul.mubr.f32.gmra.mxu1 %v3259_v55  ;;  %v3265_v37 = vpop.eup %3264 }
 0x44c   :  { %1879 = vmatprep.mubr.f32.mxu1 %v3263_v19  ;;  %v3267_v5 = vpop.eup %3266 }
 0x44d   :  { %1775 = vmatmul.mubr.f32.gmra.mxu0 %v3265_v37  ;;  %v3269_v61 = vpop.eup %3268 }
 0x44e   :  { %1779 = vmatprep.mubr.f32.mxu0 %v3267_v5  ;;  %v3271_v15 = vpop.eup %3270 }
 0x44f   :  { %1880 = vmatmul.mubr.f32.gmra.mxu1 %v3269_v61  ;;  %v3273_v53 = vpop.eup %3272 }
 0x450   :  { %1884 = vmatprep.mubr.f32.mxu1 %v3271_v15  ;;  %v3275_v47 = vpop.eup %3274 }
 0x451   :  { %1780 = vmatmul.mubr.f32.gmra.mxu0 %v3273_v53  ;;  %v3277_v29 = vpop.eup %3276 }
 0x452   :  { %1784 = vmatprep.mubr.f32.mxu0 %v3275_v47  ;;  %v3279_v42 = vpop.eup %3278 }
 0x453   :  { %1885 = vmatmul.mubr.f32.gmra.mxu1 %v3277_v29  ;;  %v3281_v34 = vpop.eup %3280 }
 0x454   :  { %1889 = vmatprep.mubr.f32.mxu1 %v3279_v42  ;;  %v3283_v56 = vpop.eup %3282 }
 0x455   :  { %1785 = vmatmul.mubr.f32.gmra.mxu0 %v3281_v34  ;;  %v3285_v32 = vpop.eup %3284 }
 0x456   :  { %1854 = vmatprep.mubr.f32.mxu0 %v3283_v56  ;;  %v3287_v51 = vpop.eup %3286  ;;  %v192_v56 = vld [vmem:[%s5393_s7] sm:$0xff] }
 0x457   :  { %1890 = vmatmul.mubr.f32.gmra.mxu1 %v3285_v32  ;;  %3029 = vmatprep.subr.mxu0 %v192_v56 }
 0x459   :  { %1855 = vmatmul.mubr.f32.vlgmr.msra.gmra.mxu0 %v3287_v51 }
 0x45a   :  { %3030 = vmatpush3.msra.mxu0 %v192_v56 }
 0x4cc   :  { %v2855_v16 = vpop.f32.mrf.mxu0 }
 0x4ce   :  { %v2856_v24 = vpop.f32.mrf.mxu0 }
 0x4cf   :  { %v2857_v19 = vadd.f32 %v2856_v24, %v2855_v16 }
 0x4d0   :  { %v2858_v58 = vpop.f32.mrf.mxu0 }
 0x4d2   :  { %v2859_v57 = vpop.f32.mrf.mxu0 }
 0x4d3   :  { %v2860_v12 = vadd.f32 %v2859_v57, %v2858_v58 }
 0x4fc   :  { %v2914_v31 = vpop.f32.mrf.mxu1 }
 0x4fe   :  { %v2915_v35 = vpop.f32.mrf.mxu1 }
 0x4ff   :  { %v2916_v1 = vadd.f32 %v2915_v35, %v2914_v31 }
 0x501   :  { %v5199_v41 = vadd.f32 %v2916_v1, %v2860_v12  ;;  %v2861_v36 = vpop.f32.mrf.mxu0  ;;  %v2095_v1 = vld [vmem:[%s5394_s8 + $0x38] sm:$0xff] }
 0x502   :  { %3043 = vmatprep.subr.mxu1 %v2095_v1 }
 0x503   :  { %v1896_v4 = vmax.f32 %v5199_v41, 1e-20  ;;  %v2917_v63 = vpop.f32.mrf.mxu1  ;;  %v2862_v25 = vpop.f32.mrf.mxu0  ;;  %3044 = vmatpush3.msra.mxu1 %v2095_v1 }
 0x504   :  { %v2863_v14 = vadd.f32 %v2862_v25, %v2861_v36  ;;  %v2094_v36 = vld [vmem:[%s5394_s8 + $0x30] sm:$0xff]  ;;  %v2092_v25 = vld [vmem:[%s5394_s8 + $0x20] sm:$0xff] }
 0x505   :  { %3288 = vrcp.f32 %v1896_v4  ;;  %v2918_v39 = vpop.f32.mrf.mxu1  ;;  %v2864_v46 = vpop.f32.mrf.mxu0  ;;  %3045 = vmatprep.subr.mxu1 %v2094_v36 }
 0x506   :  { %v2919_v62 = vadd.f32 %v2918_v39, %v2917_v63  ;;  %v2093_v63 = vld [vmem:[%s5394_s8 + $0x28] sm:$0xff]  ;;  %3046 = vmatpush3.msra.mxu1 %v2094_v36 }
 0x507   :  { %v2920_v17 = vpop.f32.mrf.mxu1  ;;  %v2865_v48 = vpop.f32.mrf.mxu0  ;;  %3047 = vmatprep.subr.mxu1 %v2093_v63 }
 0x508   :  { %v2866_v10 = vadd.f32 %v2865_v48, %v2864_v46  ;;  %v5212_v61 = vadd.f32 %v2919_v62, %v2863_v14  ;;  %3048 = vmatpush3.msra.mxu1 %v2093_v63  ;;  %v2091_v46 = vld [vmem:[%s5394_s8 + $0x18] sm:$0xff] }
 0x509   :  { %v2921_v27 = vpop.f32.mrf.mxu1  ;;  %v2867_v26 = vpop.f32.mrf.mxu0  ;;  %3049 = vmatprep.subr.mxu1 %v2092_v25 }
 0x50a   :  { %v2922_v28 = vadd.f32 %v2921_v27, %v2920_v17  ;;  %v1897_v34 = vmax.f32 %v5212_v61, 1e-20  ;;  %3050 = vmatpush3.msra.mxu1 %v2092_v25  ;;  %v2090_v17 = vld [vmem:[%s5394_s8 + $0x10] sm:$0xff] }
 0x50b   :  { %v2923_v52 = vpop.f32.mrf.mxu1  ;;  %v2868_v11 = vpop.f32.mrf.mxu0  ;;  %3051 = vmatprep.subr.mxu1 %v2091_v46 }
 0x50c   :  { %v5202_v60 = vadd.f32 %v2922_v28, %v2866_v10  ;;  %v2869_v15 = vadd.f32 %v2868_v11, %v2867_v26  ;;  %3052 = vmatpush3.msra.mxu1 %v2091_v46 }
 0x50d   :  { %v2924_v3 = vpop.f32.mrf.mxu1  ;;  %v2870_v2 = vpop.f32.mrf.mxu0  ;;  %3053 = vmatprep.subr.mxu1 %v2090_v17 }
 0x50e   :  { %v1898_v30 = vmax.f32 %v5202_v60, 1e-20  ;;  %v2925_v53 = vadd.f32 %v2924_v3, %v2923_v52  ;;  %3054 = vmatpush3.msra.mxu1 %v2090_v17 }
 0x50f   :  { %v2926_v21 = vpop.f32.mrf.mxu1  ;;  %v2871_v54 = vpop.f32.mrf.mxu0 }
 0x510   :  { %3290 = vrcp.f32 %v1898_v30  ;;  %v2872_v40 = vadd.f32 %v2871_v54, %v2870_v2  ;;  %v5222_v32 = vadd.f32 %v2925_v53, %v2869_v15  ;;  %v2089_v2 = vld [vmem:[%s5394_s8 + $0x8] sm:$0xff] }
 0x511   :  { %v2927_v59 = vpop.f32.mrf.mxu1  ;;  %v2873_v33 = vpop.f32.mrf.mxu0  ;;  %3055 = vmatprep.subr.mxu1 %v2089_v2 }
 0x512   :  { %v3289_v20 = vpop.eup %3288  ;;  %v2928_v22 = vadd.f32 %v2927_v59, %v2926_v21  ;;  %v1899_v58 = vmax.f32 %v5222_v32, 1e-20  ;;  %3056 = vmatpush3.msra.mxu1 %v2089_v2  ;;  %v2096_v21 = vld [vmem:[%s5395_s9] sm:$0xff] }
 0x513   :  { %1921 = vrot.lane.b32.xlu0 %v3289_v20, %s3344_s23  ;;  %v2929_v0 = vpop.f32.mrf.mxu1  ;;  %v2874_v23 = vpop.f32.mrf.mxu0  ;;  %v2088_v20 = vld [vmem:[%s5394_s8] sm:$0xff]  ;;  %3071 = vmatprep.subr.mxu0 %v2096_v21 }
 0x514   :  { %v5206_v43 = vadd.f32 %v2928_v22, %v2872_v40  ;;  %v2875_v51 = vadd.f32 %v2874_v23, %v2873_v33  ;;  %3057 = vmatprep.subr.mxu1 %v2088_v20  ;;  %v2771_v59 = vld [vmem:[%s5396_s4] ss:$0 sm:$0xff] }
 0x515   :  { %v2930_v7 = vpop.f32.mrf.mxu1  ;;  %v2876_v13 = vpop.f32.mrf.mxu0  ;;  %3058 = vmatpush3.msra.mxu1 %v2088_v20 }
 0x516   :  { %v1900_v6 = vmax.f32 %v5206_v43, 1e-20  ;;  %v2931_v16 = vadd.f32 %v2930_v7, %v2929_v0 }
 0x517   :  { %v2932_v9 = vpop.f32.mrf.mxu1  ;;  %v2877_v18 = vpop.f32.mrf.mxu0 }
 0x518   :  { %3292 = vrcp.f32 %v1900_v6  ;;  %v2878_v45 = vadd.f32 %v2877_v18, %v2876_v13  ;;  %v5225_v57 = vadd.f32 %v2931_v16, %v2875_v51 }
 0x519   :  { %v2933_v38 = vpop.f32.mrf.mxu1  ;;  %v2911_v49 = vpop.f32.mrf.mxu0 }
 0x51a   :  { %v2934_v55 = vadd.f32 %v2933_v38, %v2932_v9  ;;  %v1901_v31 = vmax.f32 %v5225_v57, 1e-20 }
 0x51b   :  { %v2912_v8 = vpop.f32.mrf.mxu0 }
 0x51c   :  { %v5210_v37 = vadd.f32 %v2934_v55, %v2878_v45  ;;  %v2913_v5 = vadd.f32 %v2912_v8, %v2911_v49 }
 0x51d   :  { %v3291_v50 = vpop.eup %3290 }
 0x51e   :  { %1925 = vrot.lane.b32.xlu0 %v3291_v50, %s3344_s23  ;;  %v1902_v47 = vmax.f32 %v5210_v37, 1e-20  ;;  %v5215_v29 = vadd.f32 %v2913_v5, %v2857_v19 }
 0x520   :  { %3294 = vrcp.f32 %v1902_v47  ;;  %v1895_v42 = vmax.f32 %v5215_v29, 1e-20 }
 0x522   :  { %3296 = vrcp.f32 %v1895_v42 }
 0x523   :  { %3298 = vrcp.f32 %v1897_v34 }
 0x524   :  { %3300 = vrcp.f32 %v1899_v58 }
 0x525   :  { %v3293_v24 = vpop.eup %3292  ;;  %3302 = vrcp.f32 %v1901_v31 }
 0x526   :  { %1929 = vrot.lane.b32.xlu0 %v3293_v24, %s3344_s23 }
 0x52d   :  { %v3295_v35 = vpop.eup %3294 }
 0x52e   :  { %1933 = vrot.lane.b32.xlu0 %v3295_v35, %s3344_s23 }
 0x52f   :  { %v3297_v12 = vpop.eup %3296 }
 0x530   :  { %1919 = vrot.lane.b32.xlu1 %v3297_v12, %s3344_s23  ;;  %v3299_v4 = vpop.eup %3298 }
 0x531   :  { %v3301_v39 = vpop.eup %3300 }
 0x532   :  { %v3303_v48 = vpop.eup %3302 }
 0x534   :  { %1923 = vrot.lane.b32.xlu1 %v3299_v4, %s3344_s23 }
 0x538   :  { %1927 = vrot.lane.b32.xlu1 %v3301_v39, %s3344_s23 }
 0x53c   :  { %1931 = vrot.lane.b32.xlu1 %v3303_v48, %s3344_s23 }
 0x585   :  { %v1922_v27 = vpop.permute.xlu0 %1921 }
 0x590   :  { %v1926_v26 = vpop.permute.xlu0 %1925 }
 0x598   :  { %v1930_v52 = vpop.permute.xlu0 %1929 }
 0x5a0   :  { %v1934_v3 = vpop.permute.xlu0 %1933 }
 0x5a2   :  { %v1920_v10 = vpop.permute.xlu1 %1919 }
 0x5a3   :  { %3031 = vmatprep.mubr.msk.f32.mxu0 %vm1935_vm4, %v1920_v10 }
 0x5a4   :  { %3032 = vmatmul.mubr.msk.f32.vlgmr.msra.gmra.mxu0 %vm1935_vm4, %v1922_v27 }
 0x5a5   :  { %3072 = vmatpush3.msra.mxu0 %v2096_v21 }
 0x5a6   :  { %v1924_v28 = vpop.permute.xlu1 %1923 }
 0x5a7   :  { %3034 = vmatprep.mubr.msk.f32.mxu0 %vm1935_vm4, %v1924_v28 }
 0x5a8   :  { %3035 = vmatmul.mubr.msk.f32.gmra.mxu0 %vm1935_vm4, %v1926_v26 }
 0x5aa   :  { %v1928_v30 = vpop.permute.xlu1 %1927 }
 0x5ab   :  { %3037 = vmatprep.mubr.msk.f32.mxu0 %vm1935_vm4, %v1928_v30 }
 0x5ac   :  { %3038 = vmatmul.mubr.msk.f32.gmra.mxu0 %vm1935_vm4, %v1930_v52 }
 0x5ae   :  { %v1932_v11 = vpop.permute.xlu1 %1931 }
 0x5af   :  { %3040 = vmatprep.mubr.msk.f32.mxu0 %vm1935_vm4, %v1932_v11  ;;  %v5560_v11 = vmov 8  }
 0x5b0   :  { %3041 = vmatmul.mubr.msk.f32.gmra.mxu0 %vm1935_vm4, %v1934_v3 }
 0x664   :  { %v3033_v54 = vpop.f32.mrf.mxu0 }
 0x665   :  { %v2058_v40 = vmul.f32 %v3033_v54, %v5199_v41 }
 0x666   :  { %v2018_v33 = vpop.f32.mrf.mxu0 }
 0x667   :  { %v2057_v22 = vmul.f32 %v2018_v33, %v5215_v29  ;;  %v2073_v0 = vadd.f32 %v2771_v59, %v2058_v40 }
 0x668   :  { %v3036_v23 = vpop.f32.mrf.mxu0 }
 0x669   :  { %v2072_v7 = vadd.f32 %v2771_v59, %v2057_v22  ;;  %v2060_v13 = vmul.f32 %v3036_v23, %v5202_v60  ;;  %v2081_v45 = vmax.f32 %v2073_v0, 0.0 }
 0x66a   :  { %v2028_v6 = vpop.f32.mrf.mxu0 }
 0x66b   :  { %v2080_v9 = vmax.f32 %v2072_v7, 0.0  ;;  %v2059_v18 = vmul.f32 %v2028_v6, %v5212_v61  ;;  %v2075_v50 = vadd.f32 %v2771_v59, %v2060_v13  ;;  %v3336_v6 = vld [vmem:[%s5392_s1 + $0x30] sm:$0xff] }
 0x66c   :  { %v3039_v14 = vpop.f32.mrf.mxu0 }
 0x66d   :  { %v2074_v41 = vadd.f32 %v2771_v59, %v2059_v18  ;;  %v2062_v62 = vmul.f32 %v3039_v14, %v5206_v43  ;;  %3059 = vmatprep.mubr.msk.f32.mxu1 %vm323_vm1, %v2080_v9  ;;  %v2083_v8 = vmax.f32 %v2075_v50, 0.0  ;;  %v3337_v18 = vld [vmem:[%s5392_s1 + $0x8] sm:$0xff]  ;;  %v3339_v14 = vld [vmem:[%s5392_s1 + $0x18] sm:$0xff] }
 0x66e   :  { %v2038_v38 = vpop.f32.mrf.mxu0  ;;  %3060 = vmatmul.mubr.msk.f32.vlgmr.msra.gmra.mxu1 %vm323_vm1, %v2081_v45 }
 0x66f   :  { %v2082_v49 = vmax.f32 %v2074_v41, 0.0  ;;  %v2061_v55 = vmul.f32 %v2038_v38, %v5222_v32  ;;  %v2077_v60 = vadd.f32 %v2771_v59, %v2062_v62 }
 0x670   :  { %v3042_v19 = vpop.f32.mrf.mxu0 }
 0x671   :  { %v2076_v5 = vadd.f32 %v2771_v59, %v2061_v55  ;;  %v2064_v61 = vmul.f32 %v3042_v19, %v5210_v37  ;;  %3062 = vmatprep.mubr.msk.f32.mxu1 %vm323_vm1, %v2082_v49  ;;  %v2085_v47 = vmax.f32 %v2077_v60, 0.0  ;;  %v3353_v37 = vmov 1  }
 0x672   :  { %v2048_v15 = vpop.f32.mrf.mxu0  ;;  %3063 = vmatmul.mubr.msk.f32.gmra.mxu1 %vm323_vm1, %v2083_v8  ;;  %3220 = vset.pattern.permute.xlu0 %v3353_v37 }
 0x673   :  { %v2084_v43 = vmax.f32 %v2076_v5, 0.0  ;;  %v2063_v53 = vmul.f32 %v2048_v15, %v5225_v57  ;;  %v2079_v29 = vadd.f32 %v2771_v59, %v2064_v61  ;;  %3221 = vset.pattern.permute.xlu1 %v3353_v37  ;;  %v3341_v37 = vld [vmem:[%s5392_s1 + $0x20] sm:$0xff] }
 0x675   :  { %v2078_v42 = vadd.f32 %v2771_v59, %v2063_v53  ;;  %3065 = vmatprep.mubr.msk.f32.mxu1 %vm323_vm1, %v2084_v43  ;;  %v2087_v56 = vmax.f32 %v2079_v29, 0.0  ;;  %v5561_v59 = vsub.s32 0, %v4576_v44  ;;  %v3338_v44 = vld [vmem:[%s5392_s1] sm:$0xff]  ;;  %v3340_v43 = vld [vmem:[%s5392_s1 + $0x10] sm:$0xff] }
 0x676   :  { %3066 = vmatmul.mubr.msk.f32.gmra.mxu1 %vm323_vm1, %v2085_v47 }
 0x677   :  { %v2086_v34 = vmax.f32 %v2078_v42, 0.0 }
 0x679   :  { %3068 = vmatprep.mubr.msk.f32.mxu1 %vm323_vm1, %v2086_v34 }
 0x67a   :  { %3069 = vmatmul.mubr.msk.f32.gmra.mxu1 %vm323_vm1, %v2087_v56 }
 0x72e   :  { %v3061_v32 = vpop.f32.mrf.mxu1 }
 0x72f   :  { %v2520_v39 = vsel %vm1935_vm4, %v3061_v32, 1.0 }
 0x730   :  { %v2187_v51 = vpop.f32.mrf.mxu1 }
 0x731   :  { %3073 = vmatprep.mubr.msk.f32.mxu0 %vm1935_vm4, %v2187_v51  ;;  %v2519_v46 = vsel %vm1935_vm4, %v2187_v51, 1.0 }
 0x732   :  { %v3064_v16 = vpop.f32.mrf.mxu1  ;;  %3074 = vmatmul.mubr.msk.f32.vlgmr.msra.gmra.mxu0 %vm1935_vm4, %v3061_v32 }
 0x733   :  { %v2522_v63 = vsel %vm1935_vm4, %v3064_v16, 1.0 }
 0x734   :  { %v2197_v24 = vpop.f32.mrf.mxu1 }
 0x735   :  { %3076 = vmatprep.mubr.msk.f32.mxu0 %vm1935_vm4, %v2197_v24  ;;  %v2521_v25 = vsel %vm1935_vm4, %v2197_v24, 1.0 }
 0x736   :  { %v3067_v58 = vpop.f32.mrf.mxu1  ;;  %3077 = vmatmul.mubr.msk.f32.gmra.mxu0 %vm1935_vm4, %v3064_v16 }
 0x737   :  { %v2524_v36 = vsel %vm1935_vm4, %v3067_v58, 1.0 }
 0x738   :  { %v2207_v57 = vpop.f32.mrf.mxu1 }
 0x739   :  { %3079 = vmatprep.mubr.msk.f32.mxu0 %vm1935_vm4, %v2207_v57  ;;  %v2523_v4 = vsel %vm1935_vm4, %v2207_v57, 1.0 }
 0x73a   :  { %v3070_v31 = vpop.f32.mrf.mxu1  ;;  %3080 = vmatmul.mubr.msk.f32.gmra.mxu0 %vm1935_vm4, %v3067_v58 }
 0x73b   :  { %v2526_v35 = vsel %vm1935_vm4, %v3070_v31, 1.0 }
 0x73c   :  { %v2217_v12 = vpop.f32.mrf.mxu1  ;;  %3085 = vmatprep.subr.mxu1 %v2526_v35 }
 0x73d   :  { %3082 = vmatprep.mubr.msk.f32.mxu0 %vm1935_vm4, %v2217_v12  ;;  %3086 = vmatpush3.msra.mxu1 %v2526_v35  ;;  %v2525_v1 = vsel %vm1935_vm4, %v2217_v12, 1.0 }
 0x73e   :  { %3083 = vmatmul.mubr.msk.f32.gmra.mxu0 %vm1935_vm4, %v3070_v31  ;;  %3087 = vmatprep.subr.mxu1 %v2525_v1  ;;  %v3342_v31 = vld [vmem:[%s5392_s1 + $0x28] sm:$0xff] }
 0x73f   :  { %3088 = vmatpush3.msra.mxu1 %v2525_v1 }
 0x740   :  { %3089 = vmatprep.subr.mxu1 %v2524_v36 }
 0x741   :  { %3090 = vmatpush3.msra.mxu1 %v2524_v36 }
 0x742   :  { %3091 = vmatprep.subr.mxu1 %v2523_v4 }
 0x743   :  { %3092 = vmatpush3.msra.mxu1 %v2523_v4 }
 0x744   :  { %3093 = vmatprep.subr.mxu1 %v2522_v63 }
 0x745   :  { %3094 = vmatpush3.msra.mxu1 %v2522_v63  ;;  %v3343_v63 = vld [vmem:[%s5392_s1 + $0x38] sm:$0xff] }
 0x746   :  { %3095 = vmatprep.subr.mxu1 %v2521_v25 }
 0x747   :  { %3096 = vmatpush3.msra.mxu1 %v2521_v25 }
 0x748   :  { %3097 = vmatprep.subr.mxu1 %v2520_v39 }
 0x749   :  { %3098 = vmatpush3.msra.mxu1 %v2520_v39 }
 0x74a   :  { %3099 = vmatprep.subr.mxu1 %v2519_v46 }
 0x74b   :  { %3100 = vmatpush3.msra.mxu1 %v2519_v46 }
 0x7f2   :  { %v3075_v17 = vpop.f32.mrf.mxu0 }
 0x7f3   :  { %2394 = vperm.xlu0 %3220, %v3075_v17  }
 0x7f4   :  { %v2316_v48 = vpop.f32.mrf.mxu0 }
 0x7f5   :  { %2389 = vperm.xlu1 %3221, %v2316_v48  }
 0x7f6   :  { %v3078_v10 = vpop.f32.mrf.mxu0 }
 0x7f8   :  { %v2326_v27 = vpop.f32.mrf.mxu0 }
 0x7f9   :  { %2399 = vperm.xlu1 %3221, %v2326_v27  }
 0x7fa   :  { %v3081_v28 = vpop.f32.mrf.mxu0 }
 0x7fc   :  { %v2336_v26 = vpop.f32.mrf.mxu0 }
 0x7fd   :  { %2404 = vperm.xlu1 %3221, %v3078_v10   ;;  %2409 = vperm.xlu0 %3220, %v2336_v26  }
 0x7fe   :  { %v3084_v30 = vpop.f32.mrf.mxu0 }
 0x800   :  { %v2346_v52 = vpop.f32.mrf.mxu0 }
 0x801   :  { %2414 = vperm.xlu1 %3221, %v3081_v28   ;;  %2419 = vperm.xlu0 %3220, %v2346_v52  }
 0x805   :  { %2424 = vperm.xlu1 %3221, %v3084_v30  }
 0x809   :  { %3222 = vset.pattern.permute.xlu1 %v5560_v11 }
 0x81f   :  { %2355 = vxpose.xlu0.b32.start [1/8] (short) (narrow) %v2316_v48, 8 }
 0x823   :  { %2356 = vxpose.xlu0.b32.cont [2/8] (short) (narrow) %v3075_v17, 8 }
 0x827   :  { %2357 = vxpose.xlu0.b32.cont [3/8] (short) (narrow) %v2326_v27, 8 }
 0x82b   :  { %2358 = vxpose.xlu0.b32.cont [4/8] (short) (narrow) %v3078_v10, 8 }
 0x82f   :  { %2359 = vxpose.xlu0.b32.cont [5/8] (short) (narrow) %v2336_v26, 8 }
 0x833   :  { %2360 = vxpose.xlu0.b32.cont [6/8] (short) (narrow) %v3081_v28, 8 }
 0x837   :  { %2361 = vxpose.xlu0.b32.cont [7/8] (short) (narrow) %v2346_v52, 8 }
 0x83b   :  { %2362 = vxpose.xlu0.b32.end [8/8] (short) (narrow) %v3084_v30, 8 }
 0x864   :  { %3223 = vset.pattern.permute.xlu0 %v5560_v11 }
 0x86e   :  { %v2395_v3 = vpop.permute.xlu0 %2394 }
 0x870   :  { %v2390_v2 = vpop.permute.xlu1 %2389 }
 0x874   :  { %v2400_v21 = vpop.permute.xlu1 %2399 }
 0x878   :  { %v2410_v20 = vpop.permute.xlu0 %2409  ;;  %v2405_v22 = vpop.permute.xlu1 %2404 }
 0x87c   :  { %v2420_v54 = vpop.permute.xlu0 %2419  ;;  %v2415_v29 = vpop.permute.xlu1 %2414 }
 0x880   :  { %v2425_v16 = vpop.permute.xlu1 %2424 }
 0x89b   :  { %v2371_v40 = vpop.trf.xlu0 }
 0x89c   :  { %v2430_v33 = vrot.slane %v2371_v40, %v5561_v59 }
 0x89e   :  { %v2437_v0 = vadd.f32 %v2430_v33, %v2420_v54  ;;  %v2432_v23 = vadd.f32 %v2430_v33, %v2395_v3  ;;  %v2431_v7 = vadd.f32 %v2430_v33, %v2390_v2  ;;  %v2434_v13 = vadd.f32 %v2430_v33, %v2405_v22 }
 0x89f   :  { %v2433_v62 = vadd.f32 %v2430_v33, %v2400_v21  ;;  %v2435_v47 = vadd.f32 %v2430_v33, %v2410_v20  ;;  %v2436_v51 = vadd.f32 %v2430_v33, %v2415_v29  ;;  %v2438_v12 = vadd.f32 %v2430_v33, %v2425_v16 }
 0x8a0   :  { %v2445_v9 = vadd.f32 %v3336_v6, %v2437_v0  ;;  %v2440_v45 = vadd.f32 %v3337_v18, %v2432_v23  ;;  %v2439_v50 = vadd.f32 %v3338_v44, %v2431_v7  ;;  %v2442_v41 = vadd.f32 %v3339_v14, %v2434_v13 }
 0x8a1   :  { %v2441_v53 = vadd.f32 %v3340_v43, %v2433_v62  ;;  %v2443_v32 = vadd.f32 %v3341_v37, %v2435_v47  ;;  %v2444_v35 = vadd.f32 %v3342_v31, %v2436_v51  ;;  %v2446_v25 = vadd.f32 %v3343_v63, %v2438_v12  ;;  %v2796_v63 = vld [vmem:[%s5397_s10] ss:$0 sm:$0xff] }
 0x8a2   :  { %vm2453_vm5 = vcmp.gt.f32.partialorder %v2445_v9, 0.0  ;;  %v2461_v38 = vmul.f32 0.2, %v2445_v9  ;;  %vm2448_vm6 = vcmp.gt.f32.partialorder %v2440_v45, 0.0  ;;  %v2456_v49 = vmul.f32 0.2, %v2440_v45 }
 0x8a3   :  { %vm2447_vm7 = vcmp.gt.f32.partialorder %v2439_v50, 0.0  ;;  %v2455_v55 = vmul.f32 0.2, %v2439_v50  ;;  %v2458_v15 = vmul.f32 0.2, %v2442_v41  ;;  %vm2450_vm8 = vcmp.gt.f32.partialorder %v2442_v41, 0.0 }
 0x8a4   :  { %v5320_v8 = vsel %vm2453_vm5, %v2445_v9, %v2461_v38  ;;  %v2464_v60 = vsel %vm2448_vm6, %v2440_v45, %v2456_v49  ;;  %v2457_v56 = vmul.f32 0.2, %v2441_v53  ;;  %vm2449_vm9 = vcmp.gt.f32.partialorder %v2441_v53, 0.0 }
 0x8a5   :  { %v2489_v19 = vsel %vm323_vm1, %v5320_v8, -inf  ;;  %v2474_v5 = vsel %vm323_vm1, %v2464_v60, -inf  ;;  %v2463_v61 = vsel %vm2447_vm7, %v2439_v50, %v2455_v55  ;;  %v2466_v34 = vsel %vm2450_vm8, %v2442_v41, %v2458_v15 }
 0x8a6   :  { %2490 = vmax.xlane.f32.xlu0 %v2489_v19  ;;  %2475 = vmax.xlane.f32.xlu1 %v2474_v5  ;;  %v2471_v42 = vsel %vm323_vm1, %v2463_v61, -inf  ;;  %v2480_v24 = vsel %vm323_vm1, %v2466_v34, -inf  ;;  %v2465_v58 = vsel %vm2449_vm9, %v2441_v53, %v2457_v56  ;;  %v2459_v57 = vmul.f32 0.2, %v2443_v32 }
 0x8a7   :  { %vm2451_vm10 = vcmp.gt.f32.partialorder %v2443_v32, 0.0  ;;  %v2477_v1 = vsel %vm323_vm1, %v2465_v58, -inf  ;;  %v2460_v4 = vmul.f32 0.2, %v2444_v35  ;;  %vm2452_vm11 = vcmp.gt.f32.partialorder %v2444_v35, 0.0 }
 0x8a8   :  { %v2467_v36 = vsel %vm2451_vm10, %v2443_v32, %v2459_v57  ;;  %v2462_v17 = vmul.f32 0.2, %v2446_v25  ;;  %vm2454_vm12 = vcmp.gt.f32.partialorder %v2446_v25, 0.0 }
 0x8a9   :  { %v2483_v39 = vsel %vm323_vm1, %v2467_v36, -inf  ;;  %v2468_v46 = vsel %vm2452_vm11, %v2444_v35, %v2460_v4 }
 0x8aa   :  { %2472 = vmax.xlane.f32.xlu1 %v2471_v42  ;;  %v2486_v48 = vsel %vm323_vm1, %v2468_v46, -inf  ;;  %v2470_v10 = vsel %vm2454_vm12, %v2446_v25, %v2462_v17 }
 0x8ab   :  { %v2492_v27 = vsel %vm323_vm1, %v2470_v10, -inf }
 0x8ae   :  { %2481 = vmax.xlane.f32.xlu1 %v2480_v24 }
 0x8b2   :  { %2478 = vmax.xlane.f32.xlu1 %v2477_v1 }
 0x8b6   :  { %2484 = vmax.xlane.f32.xlu1 %v2483_v39 }
 0x8ba   :  { %2487 = vmax.xlane.f32.xlu1 %v2486_v48 }
 0x8be   :  { %2493 = vmax.xlane.f32.xlu1 %v2492_v27 }
 0x92f   :  { %v2476_v28 = vpop.xlane.xlu1 %2475  ;;  %v2491_v59 = vpop.xlane.xlu0 %2490 }
 0x930   :  { %v2496_v26 = vsub.f32 %v2464_v60, %v2476_v28  ;;  %v2501_v23 = vsub.f32 %v5320_v8, %v2491_v59 }
 0x932   :  { %v2505_v11 = vmul.f32 1.442695, %v2496_v26  ;;  %v2515_v18 = vmul.f32 1.442695, %v2501_v23 }
 0x933   :  { %v2473_v30 = vpop.xlane.xlu1 %2472 }
 0x934   :  { %v2495_v52 = vsub.f32 %v2463_v61, %v2473_v30 }
 0x936   :  { %v2503_v3 = vmul.f32 1.442695, %v2495_v52 }
 0x937   :  { %v2482_v2 = vpop.xlane.xlu1 %2481 }
 0x938   :  { %3304 = vpow2.f32 %v2503_v3  ;;  %v2498_v20 = vsub.f32 %v2466_v34, %v2482_v2 }
 0x939   :  { %3306 = vpow2.f32 %v2505_v11 }
 0x93a   :  { %v2509_v40 = vmul.f32 1.442695, %v2498_v20 }
 0x93b   :  { %v2479_v21 = vpop.xlane.xlu1 %2478 }
 0x93c   :  { %v2497_v54 = vsub.f32 %v2465_v58, %v2479_v21 }
 0x93e   :  { %v2507_v33 = vmul.f32 1.442695, %v2497_v54 }
 0x93f   :  { %v2485_v22 = vpop.xlane.xlu1 %2484 }
 0x940   :  { %3308 = vpow2.f32 %v2507_v33  ;;  %v2499_v0 = vsub.f32 %v2467_v36, %v2485_v22 }
 0x941   :  { %3310 = vpow2.f32 %v2509_v40 }
 0x942   :  { %v2511_v7 = vmul.f32 1.442695, %v2499_v0 }
 0x943   :  { %v2488_v13 = vpop.xlane.xlu1 %2487 }
 0x944   :  { %3312 = vpow2.f32 %v2511_v7  ;;  %v2500_v6 = vsub.f32 %v2468_v46, %v2488_v13 }
 0x945   :  { %v3305_v9 = vpop.eup %3304 }
 0x946   :  { %v3307_v45 = vpop.eup %3306  ;;  %v2513_v44 = vmul.f32 1.442695, %v2500_v6  ;;  %3101 = vmatprep.mubr.msk.f32.mxu1 %vm323_vm1, %v3305_v9 }
 0x947   :  { %3102 = vmatmul.mubr.msk.f32.vlgmr.msra.gmra.mxu1 %vm323_vm1, %v3307_v45  ;;  %v2494_v50 = vpop.xlane.xlu1 %2493 }
 0x948   :  { %3314 = vpow2.f32 %v2513_v44  ;;  %v2502_v14 = vsub.f32 %v2470_v10, %v2494_v50 }
 0x949   :  { %3316 = vpow2.f32 %v2515_v18 }
 0x94a   :  { %v2517_v41 = vmul.f32 1.442695, %v2502_v14 }
 0x94c   :  { %3318 = vpow2.f32 %v2517_v41 }
 0x94d   :  { %v3309_v62 = vpop.eup %3308 }
 0x94e   :  { %v3311_v38 = vpop.eup %3310  ;;  %3104 = vmatprep.mubr.msk.f32.mxu1 %vm323_vm1, %v3309_v62 }
 0x94f   :  { %3105 = vmatmul.mubr.msk.f32.gmra.mxu1 %vm323_vm1, %v3311_v38 }
 0x951   :  { %v3313_v49 = vpop.eup %3312 }
 0x952   :  { %3107 = vmatprep.mubr.msk.f32.mxu1 %vm323_vm1, %v3313_v49 }
 0x955   :  { %v3315_v55 = vpop.eup %3314 }
 0x956   :  { %v3317_v8 = vpop.eup %3316  ;;  %3108 = vmatmul.mubr.msk.f32.gmra.mxu1 %vm323_vm1, %v3315_v55 }
 0x957   :  { %3110 = vmatprep.mubr.msk.f32.mxu1 %vm323_vm1, %v3317_v8 }
 0x959   :  { %v3319_v60 = vpop.eup %3318 }
 0x95a   :  { %3111 = vmatmul.mubr.msk.f32.gmra.mxu1 %vm323_vm1, %v3319_v60 }
 0xa07   :  { %v3103_v19 = vpop.f32.mrf.mxu1 }
 0xa08   :  { %v2657_v5 = vmax.f32 %v3103_v19, 1e-20 }
 0xa09   :  { %v2617_v61 = vpop.f32.mrf.mxu1 }
 0xa0a   :  { %3320 = vrcp.f32 %v2657_v5  ;;  %v2656_v15 = vmax.f32 %v2617_v61, 1e-20 }
 0xa0c   :  { %3322 = vrcp.f32 %v2656_v15 }
 0xa0f   :  { %v3106_v43 = vpop.f32.mrf.mxu1 }
 0xa10   :  { %v2659_v53 = vmax.f32 %v3106_v43, 1e-20 }
 0xa11   :  { %v2627_v47 = vpop.f32.mrf.mxu1 }
 0xa12   :  { %3324 = vrcp.f32 %v2659_v53  ;;  %v2658_v29 = vmax.f32 %v2627_v47, 1e-20 }
 0xa14   :  { %3326 = vrcp.f32 %v2658_v29 }
 0xa16   :  { %v3109_v42 = vpop.f32.mrf.mxu1 }
 0xa17   :  { %v3321_v34 = vpop.eup %3320  ;;  %v2661_v56 = vmax.f32 %v3109_v42, 1e-20 }
 0xa18   :  { %2679 = vperm.xlu1 %3222, %v3321_v34   ;;  %v2637_v37 = vpop.f32.mrf.mxu1 }
 0xa19   :  { %3328 = vrcp.f32 %v2661_v56  ;;  %v2660_v32 = vmax.f32 %v2637_v37, 1e-20  ;;  %v3323_v16 = vpop.eup %3322 }
 0xa1a   :  { %v3112_v51 = vpop.f32.mrf.mxu1 }
 0xa1b   :  { %v2663_v24 = vmax.f32 %v3112_v51, 1e-20 }
 0xa1c   :  { %2674 = vperm.xlu1 %3222, %v3323_v16   ;;  %v2647_v58 = vpop.f32.mrf.mxu1 }
 0xa1d   :  { %3330 = vrcp.f32 %v2663_v24  ;;  %v2662_v57 = vmax.f32 %v2647_v58, 1e-20 }
 0xa1e   :  { %3332 = vrcp.f32 %v2660_v32 }
 0xa1f   :  { %v3325_v31 = vpop.eup %3324  ;;  %3334 = vrcp.f32 %v2662_v57 }
 0xa20   :  { %2689 = vperm.xlu1 %3222, %v3325_v31  }
 0xa21   :  { %v3327_v35 = vpop.eup %3326 }
 0xa24   :  { %2684 = vperm.xlu1 %3222, %v3327_v35  }
 0xa26   :  { %v3329_v12 = vpop.eup %3328 }
 0xa28   :  { %2699 = vperm.xlu1 %3222, %v3329_v12  }
 0xa2a   :  { %v3331_v1 = vpop.eup %3330 }
 0xa2b   :  { %v3333_v36 = vpop.eup %3332  ;;  %2709 = vperm.xlu0 %3223, %v3331_v1  }
 0xa2c   :  { %2694 = vperm.xlu1 %3222, %v3333_v36   ;;  %v3335_v4 = vpop.eup %3334 }
 0xa30   :  { %2704 = vperm.xlu1 %3222, %v3335_v4  }
 0xa93   :  { %v2680_v25 = vpop.permute.xlu1 %2679 }
 0xa94   :  { %v2713_v39 = vmul.f32 %v3103_v19, %v2680_v25 }
 0xa96   :  { %v2728_v46 = vadd.f32 %v2796_v63, %v2713_v39 }
 0xa97   :  { %v2675_v17 = vpop.permute.xlu1 %2674 }
 0xa98   :  { %2736 = vst.msk [vmem:[%s5398_s11 + $0x8] sm:$0xff] %vm1935_vm4, %v2728_v46  ;;  %v2712_v48 = vmul.f32 %v2675_v17, %v2617_v61 }
 0xa9a   :  { %v2727_v10 = vadd.f32 %v2796_v63, %v2712_v48 }
 0xa9b   :  { %v2690_v27 = vpop.permute.xlu1 %2689 }
 0xa9c   :  { %2735 = vst.msk [vmem:[%s5398_s11] sm:$0xff] %vm1935_vm4, %v2727_v10  ;;  %v2715_v28 = vmul.f32 %v3106_v43, %v2690_v27 }
 0xa9e   :  { %v2730_v26 = vadd.f32 %v2796_v63, %v2715_v28 }
 0xa9f   :  { %v2685_v30 = vpop.permute.xlu1 %2684 }
 0xaa0   :  { %2738 = vst.msk [vmem:[%s5398_s11 + $0x18] sm:$0xff] %vm1935_vm4, %v2730_v26  ;;  %v2714_v52 = vmul.f32 %v2685_v30, %v2627_v47 }
 0xaa2   :  { %v2729_v11 = vadd.f32 %v2796_v63, %v2714_v52 }
 0xaa3   :  { %v2700_v3 = vpop.permute.xlu1 %2699 }
 0xaa4   :  { %2737 = vst.msk [vmem:[%s5398_s11 + $0x10] sm:$0xff] %vm1935_vm4, %v2729_v11  ;;  %v2717_v2 = vmul.f32 %v3109_v42, %v2700_v3 }
 0xaa6   :  { %v2732_v20 = vadd.f32 %v2796_v63, %v2717_v2  ;;  %v2710_v21 = vpop.permute.xlu0 %2709 }
 0xaa7   :  { %v2719_v54 = vmul.f32 %v3112_v51, %v2710_v21  ;;  %v2695_v40 = vpop.permute.xlu1 %2694 }
 0xaa8   :  { %2740 = vst.msk [vmem:[%s5398_s11 + $0x28] sm:$0xff] %vm1935_vm4, %v2732_v20  ;;  %v2716_v59 = vmul.f32 %v2695_v40, %v2637_v37 }
 0xaa9   :  { %v2734_v33 = vadd.f32 %v2796_v63, %v2719_v54 }
 0xaaa   :  { %v2731_v22 = vadd.f32 %v2796_v63, %v2716_v59 }
 0xaab   :  { %2742 = vst.msk [vmem:[%s5398_s11 + $0x38] sm:$0xff] %vm1935_vm4, %v2734_v33  ;;  %v2705_v0 = vpop.permute.xlu1 %2704 }
 0xaac   :  { %2739 = vst.msk [vmem:[%s5398_s11 + $0x20] sm:$0xff] %vm1935_vm4, %v2731_v22  ;;  %v2718_v23 = vmul.f32 %v2705_v0, %v2647_v58 }
 0xaae   :  { %v2733_v7 = vadd.f32 %v2796_v63, %v2718_v23 }
 0xab0   :  { %2741 = vst.msk [vmem:[%s5398_s11 + $0x30] sm:$0xff] %vm1935_vm4, %v2733_v7 }

</bundles_post_ra>
